<compile_context>
chip_gen: v5e
topology: v5e:2x2
jax: 0.10.0
libtpu: 0.0.40
codegen_flags: <defaults>
</compile_context>

<pallas_src>
import functools
import numpy as np
import jax
import jax.numpy as jnp
from jax.experimental import pallas as pl
from jax.experimental.pallas import tpu as pltpu


# ----------------------------- helpers --------------------------------------

def _round_up(x, m):
    return ((x + m - 1) // m) * m


def _vreg_bytes(shape, dtype):
    """Approximate VMEM footprint of an array including (8, 128) tile padding."""
    s = list(shape)
    s[-1] = _round_up(s[-1], 128)
    if len(s) >= 2:
        s[-2] = _round_up(s[-2], 8)
    return int(np.prod(s)) * jnp.dtype(dtype).itemsize


def _vmem_capacity_bytes(default=64 << 20):
    # Narrow guard: host-side hardware query only (falls back to the v7x-safe 64 MiB).
    try:
        return int(pltpu.get_tpu_info().vmem_capacity_bytes)
    except Exception:
        return default


# ----------------------------- kernels ---------------------------------------

def _kv_proj_kernel(k_ref, v_ref, wk_ref, bk_ref, wv_ref, bv_ref,
                    khm_ref, vhm_ref, *, num_head, d_k, d_v):
    """Project K/V once per token block; emit head-major (h, block_k, d) tiles so
    the attention kernel's inner loop needs no reshapes/transposes."""
    f32 = jnp.float32
    ks = k_ref[0]                                            # (block_k, d_model)
    vs = v_ref[0]
    n = ks.shape[0]
    kp = jnp.dot(ks, wk_ref[...], preferred_element_type=f32) + bk_ref[...]
    vp = jnp.dot(vs, wv_ref[...], preferred_element_type=f32) + bv_ref[...]
    khm_ref[0] = kp.reshape(n, num_head, d_k).transpose(1, 0, 2).astype(khm_ref.dtype)
    vhm_ref[0] = vp.reshape(n, num_head, d_v).transpose(1, 0, 2).astype(vhm_ref.dtype)


def _mha_attn_kernel(q_ref, k_ref, v_ref, wq_ref, bq_ref, wo_ref, vecs_ref,
                     out_ref, q_scr, m_scr, l_scr, acc_scr,
                     *, num_head, d_k, d_v, block_k, nk_valid, mask_k, eps):
    """Flash attention over one (q-tile, k-tile) pair + fused output projection,
    residual and LayerNorm at the last k-tile."""
    f32 = jnp.float32
    cdt = wq_ref.dtype
    ki = pl.program_id(2)
    nk_steps = pl.num_programs(2)

    # --- once per q-tile: fused Q projection (1/sqrt(d_k) folded into W_q/b_q
    #     host-side), single head-major relayout, accumulator init ---
    @pl.when(ki == 0)
    def _():
        xq = q_ref[0]                                                    # (bq, d_model)
        qp = jnp.dot(xq, wq_ref[...], preferred_element_type=f32) + bq_ref[...]
        bq_t = xq.shape[0]
        q_scr[...] = qp.reshape(bq_t, num_head, d_k).transpose(1, 0, 2).astype(cdt)
        m_scr[...] = jnp.full(m_scr.shape, -jnp.inf, dtype=f32)
        l_scr[...] = jnp.zeros(l_scr.shape, dtype=f32)
        acc_scr[...] = jnp.zeros(acc_scr.shape, dtype=f32)

    # --- online softmax over one K/V block (accumulation kept unnormalized) ---
    s = jnp.einsum('hqd,hkd->hqk', q_scr[...], k_ref[0],
                   preferred_element_type=f32)                           # (h, bq, bk)
    if mask_k:  # static: only emitted when nk was zero-padded to a block multiple
        col = ki * block_k + jax.lax.broadcasted_iota(jnp.int32, (1, 1, block_k), 2)
        s = jnp.where(col < nk_valid, s, -jnp.inf)

    m_prev = m_scr[...]                                                  # (h, bq)
    m_new = jnp.maximum(m_prev, jnp.max(s, axis=-1))
    alpha = jnp.exp(m_prev - m_new)
    p = jnp.exp(s - m_new[..., None])                                    # (h, bq, bk)
    l_scr[...] = alpha * l_scr[...] + jnp.sum(p, axis=-1)
    acc_scr[...] = alpha[..., None] * acc_scr[...] + jnp.einsum(
        'hqk,hkd->hqd', p.astype(cdt), v_ref[0], preferred_element_type=f32)
    m_scr[...] = m_new

    # --- once per q-tile: deferred normalization, output projection,
    #     residual + LayerNorm (dropout = identity in eval mode) ---
    @pl.when(ki == nk_steps - 1)
    def _():
        inv_l = pl.reciprocal(l_scr[...], approx=True)                   # (h, bq), EUP
        o = acc_scr[...] * inv_l[..., None]                              # (h, bq, d_v)
        bq_t = o.shape[1]
        o = o.transpose(1, 0, 2).reshape(bq_t, num_head * d_v)           # once per q-tile
        vecs = vecs_ref[...]                                             # (3, d_model): b_o, ln_g, ln_b
        attn = jnp.dot(o.astype(cdt), wo_ref[...],
                       preferred_element_type=f32) + vecs[0:1]
        y = q_ref[0].astype(f32) + attn                                  # residual
        mu = jnp.mean(y, axis=-1, keepdims=True)
        var = jnp.mean(jnp.square(y - mu), axis=-1, keepdims=True)
        yn = (y - mu) * jax.lax.rsqrt(var + eps)
        out_ref[0] = (yn * vecs[1:2] + vecs[2:3]).astype(out_ref.dtype)


# ----------------------------- wrapper ----------------------------------------

def mha_pallas(queries, keys, values, params, *, d_model, num_head,
               d_k=None, d_v=None, block_q=None, block_k=None,
               compute_dtype=jnp.bfloat16):
    """MultiHeadAttention forward (eval mode): LayerNorm(queries + Attention(q, k, v))."""
    f32 = jnp.float32
    cdt = compute_dtype
    b_s, nq, _ = queries.shape
    nk = keys.shape[1]
    d_k = d_model // num_head if d_k is None else d_k
    d_v = d_model // num_head if d_v is None else d_v
    out_dtype = queries.dtype

    # ---- generation-aware VMEM budget & block-size selection ----
    vmem_cap = _vmem_capacity_bytes()
    budget = int(0.75 * vmem_cap)
    if block_q is None:
        block_q = 512 if vmem_cap >= (100 << 20) else 256     # v5e/v6e (128 MiB) vs v7x (64 MiB)
        block_q = min(block_q, _round_up(nq, 8))
    if block_k is None:
        block_k = min(256, _round_up(nk, 8))
    assert block_q % 8 == 0 and block_k % 8 == 0

    def attn_vmem_estimate(bq_t, bk_t):
        est = 0
        est += 2 * _vreg_bytes((bq_t, d_model), cdt)                     # q blocks (double-buffered)
        est += 2 * _vreg_bytes((num_head, bk_t, d_k), cdt)               # k blocks
        est += 2 * _vreg_bytes((num_head, bk_t, d_v), cdt)               # v blocks
        est += 2 * _vreg_bytes((bq_t, d_model), out_dtype)               # out blocks
        est += 2 * (_vreg_bytes((d_model, num_head * d_k), cdt)          # weights (worst case: 2 bufs)
                    + _vreg_bytes((num_head * d_v, d_model), cdt)
                    + _vreg_bytes((1, num_head * d_k), f32)
                    + _vreg_bytes((3, d_model), f32))
        est += _vreg_bytes((num_head, bq_t, d_k), cdt)                   # q_scr
        est += 2 * _vreg_bytes((num_head, bq_t), f32)                    # m, l
        est += _vreg_bytes((num_head, bq_t, d_v), f32)                   # acc
        est += 3 * _vreg_bytes((num_head, bq_t, bk_t), f32)              # scores / exp / cast copy
        est += 6 * _vreg_bytes((bq_t, d_model), f32)                     # epilogue temporaries
        return est

    # shrink blocks until the working set fits the generation-dependent budget
    while attn_vmem_estimate(block_q, block_k) > budget and (block_q > 128 or block_k > 128):
        if block_q >= block_k and block_q > 128:
            block_q = max(128, _round_up(block_q // 2, 8))
        else:
            block_k = max(128, _round_up(block_k // 2, 8))

    nq_pad = _round_up(nq, block_q)
    nk_pad = _round_up(nk, block_k)
    est = attn_vmem_estimate(block_q, block_k)
    vmem_limit = min(max(int(1.5 * est) + (4 << 20), 32 << 20), int(0.9 * vmem_cap))

    # ---- host-side weight prep (scale folded into W_q/b_q; b_o + LN packed) ----
    scale = np.float32(1.0 / np.sqrt(d_k))
    # PyTorch Linear stores W as (out, in); the kernels compute x @ W.T.
    wq = (params["W_q"].T * scale).astype(cdt)                  # (d_model, h*d_k)
    wk = params["W_k"].T.astype(cdt)                            # (d_model, h*d_k)
    wv = params["W_v"].T.astype(cdt)                            # (d_model, h*d_v)
    wo = params["W_o"].T.astype(cdt)                            # (h*d_v, d_model)
    bq = (params["b_q"] * scale).reshape(1, -1).astype(f32)
    bk = params["b_k"].reshape(1, -1).astype(f32)
    bv = params["b_v"].reshape(1, -1).astype(f32)
    vecs = jnp.stack([params["b_o"], params["ln_g"], params["ln_b"]]).astype(f32)   # (3, d_model)

    # ---- activations: compute dtype (bf16 halves HBM traffic), zero-pad to block multiples ----
    q_in = queries.astype(cdt)
    k_in = keys.astype(cdt)
    v_in = values.astype(cdt)
    if nq_pad != nq:
        q_in = jnp.pad(q_in, ((0, 0), (0, nq_pad - nq), (0, 0)))
    if nk_pad != nk:
        k_in = jnp.pad(k_in, ((0, 0), (0, nk_pad - nk), (0, 0)))
        v_in = jnp.pad(v_in, ((0, 0), (0, nk_pad - nk), (0, 0)))

    # ---- kernel 1: K/V projections, head-major layout, done once per token ----
    khm, vhm = pl.pallas_call(
        functools.partial(_kv_proj_kernel, num_head=num_head, d_k=d_k, d_v=d_v),
        out_shape=(jax.ShapeDtypeStruct((b_s, num_head, nk_pad, d_k), cdt),
                   jax.ShapeDtypeStruct((b_s, num_head, nk_pad, d_v), cdt)),
        grid_spec=pltpu.PrefetchScalarGridSpec(
            num_scalar_prefetch=0,
            grid=(b_s, nk_pad // block_k),
            in_specs=[
                pl.BlockSpec((1, block_k, d_model), lambda b, ki: (b, ki, 0)),
                pl.BlockSpec((1, block_k, d_model), lambda b, ki: (b, ki, 0)),
                pl.BlockSpec((d_model, num_head * d_k), lambda b, ki: (0, 0)),
                pl.BlockSpec((1, num_head * d_k), lambda b, ki: (0, 0)),
                pl.BlockSpec((d_model, num_head * d_v), lambda b, ki: (0, 0)),
                pl.BlockSpec((1, num_head * d_v), lambda b, ki: (0, 0)),
            ],
            out_specs=(
                pl.BlockSpec((1, num_head, block_k, d_k), lambda b, ki: (b, 0, ki, 0)),
                pl.BlockSpec((1, num_head, block_k, d_v), lambda b, ki: (b, 0, ki, 0)),
            )),
        compiler_params=pltpu.CompilerParams(
            dimension_semantics=("parallel", "parallel")),
    )(k_in, v_in, wk, bk, wv, bv)

    # ---- kernel 2: flash attention + output projection + residual LayerNorm ----
    kernel = functools.partial(
        _mha_attn_kernel, num_head=num_head, d_k=d_k, d_v=d_v,
        block_k=block_k, nk_valid=nk, mask_k=(nk_pad != nk), eps=1e-5)

    out_pad = pl.pallas_call(
        kernel,
        out_shape=jax.ShapeDtypeStruct((b_s, nq_pad, d_model), out_dtype),
        grid_spec=pltpu.PrefetchScalarGridSpec(
            num_scalar_prefetch=0,
            grid=(b_s, nq_pad // block_q, nk_pad // block_k),
            in_specs=[
                pl.BlockSpec((1, block_q, d_model), lambda b, qi, ki: (b, qi, 0)),
                pl.BlockSpec((1, num_head, block_k, d_k), lambda b, qi, ki: (b, 0, ki, 0)),
                pl.BlockSpec((1, num_head, block_k, d_v), lambda b, qi, ki: (b, 0, ki, 0)),
                pl.BlockSpec((d_model, num_head * d_k), lambda b, qi, ki: (0, 0)),
                pl.BlockSpec((1, num_head * d_k), lambda b, qi, ki: (0, 0)),
                pl.BlockSpec((num_head * d_v, d_model), lambda b, qi, ki: (0, 0)),
                pl.BlockSpec((3, d_model), lambda b, qi, ki: (0, 0)),
            ],
            out_specs=pl.BlockSpec((1, block_q, d_model), lambda b, qi, ki: (b, qi, 0)),
            scratch_shapes=[
                pltpu.VMEM((num_head, block_q, d_k), cdt),       # projected Q (head-major)
                pltpu.VMEM((num_head, block_q), jnp.float32),    # running max m
                pltpu.VMEM((num_head, block_q), jnp.float32),    # running denom l
                pltpu.VMEM((num_head, block_q, d_v), jnp.float32),  # unnormalized output acc
            ]),
        compiler_params=pltpu.CompilerParams(
            dimension_semantics=("parallel", "parallel", "arbitrary"),
            vmem_limit_bytes=vmem_limit),
    )(q_in, khm, vhm, wq, bq, wo, vecs)

    return out_pad if nq_pad == nq else out_pad[:, :nq, :]


# ----------------------------- reference & params -----------------------------

def _xavier_uniform(key, out_dim, in_dim):
    bound = float(np.sqrt(6.0 / (in_dim + out_dim)))
    return jax.random.uniform(key, (out_dim, in_dim), jnp.float32, -bound, bound)


def make_mha_params(key, d_model, num_head, d_k=None, d_v=None):
    d_k = d_model // num_head if d_k is None else d_k
    d_v = d_model // num_head if d_v is None else d_v
    kq, kk, kv, ko = jax.random.split(key, 4)
    return dict(
        W_q=_xavier_uniform(kq, num_head * d_k, d_model),
        b_q=jnp.zeros((num_head * d_k,), jnp.float32),
        W_k=_xavier_uniform(kk, num_head * d_k, d_model),
        b_k=jnp.zeros((num_head * d_k,), jnp.float32),
        W_v=_xavier_uniform(kv, num_head * d_v, d_model),
        b_v=jnp.zeros((num_head * d_v,), jnp.float32),
        W_o=_xavier_uniform(ko, d_model, num_head * d_v),
        b_o=jnp.zeros((d_model,), jnp.float32),
        ln_g=jnp.ones((d_model,), jnp.float32),
        ln_b=jnp.zeros((d_model,), jnp.float32),
    )


def mha_ref(queries, keys, values, params, *, d_model, num_head, d_k=None, d_v=None):
    """Pure-JAX reference mirroring the PyTorch forward (eval mode)."""
    d_k = d_model // num_head if d_k is None else d_k
    d_v = d_model // num_head if d_v is None else d_v
    b_s, nq, _ = queries.shape
    nk = keys.shape[1]

    def lin(y, W, b):
        return jnp.einsum("bnd,od->bno", y, W) + b

    q = lin(queries, params["W_q"], params["b_q"]).reshape(b_s, nq, num_head, d_k).transpose(0, 2, 1, 3)
    k = lin(keys, params["W_k"], params["b_k"]).reshape(b_s, nk, num_head, d_k).transpose(0, 2, 3, 1)
    v = lin(values, params["W_v"], params["b_v"]).reshape(b_s, nk, num_head, d_v).transpose(0, 2, 1, 3)
    att = jax.nn.softmax(jnp.matmul(q, k) / np.sqrt(d_k), axis=-1)
    out = jnp.matmul(att, v).transpose(0, 2, 1, 3).reshape(b_s, nq, num_head * d_v)
    out = lin(out, params["W_o"], params["b_o"])
    y = queries + out                      # dropout = identity in eval mode
    mu = jnp.mean(y, -1, keepdims=True)
    var = jnp.mean(jnp.square(y - mu), -1, keepdims=True)
    return (y - mu) / jnp.sqrt(var + 1e-5) * params["ln_g"] + params["ln_b"]


# ----------------------------- demo / check -----------------------------------

if __name__ == "__main__":
    d_model, num_head = 128, 4             # d_model multiple of 128 -> lane-dense stores
    key = jax.random.PRNGKey(0)
    kp, k1, k2, k3, k4, k5, k6 = jax.random.split(key, 7)
    params = make_mha_params(kp, d_model, num_head)

    # Case 1: divisible shapes, f32 compute -> tight check of the kernel math;
    # multi-tile (2 x 2 x 2) grid exercises the online-softmax accumulators.
    b_s, nq, nk = 2, 256, 256
    q1 = jax.random.normal(k1, (b_s, nq, d_model), jnp.float32)
    kk1 = jax.random.normal(k2, (b_s, nk, d_model), jnp.float32)
    vv1 = jax.random.normal(k3, (b_s, nk, d_model), jnp.float32)
    ref1 = mha_ref(q1, kk1, vv1, params, d_model=d_model, num_head=num_head)
    out1 = jax.block_until_ready(
        mha_pallas(q1, kk1, vv1, params, d_model=d_model, num_head=num_head,
                   block_q=128, block_k=128, compute_dtype=jnp.float32))
    assert out1.shape == ref1.shape
    assert jnp.allclose(out1, ref1, atol=5e-3, rtol=5e-3), "f32 mismatch vs reference"

    # Case 2: non-divisible nq/nk (exercises zero-padding + key-tail masking),
    # bf16 activations/weights (default performance path) -> looser tolerance.
    b_s, nq, nk = 2, 160, 200
    q2 = jax.random.normal(k4, (b_s, nq, d_model), jnp.float32)
    kk2 = jax.random.normal(k5, (b_s, nk, d_model), jnp.float32)
    vv2 = jax.random.normal(k6, (b_s, nk, d_model), jnp.float32)
    ref2 = mha_ref(q2, kk2, vv2, params, d_model=d_model, num_head=num_head)
    out2 = jax.block_until_ready(
        mha_pallas(q2, kk2, vv2, params, d_model=d_model, num_head=num_head,
                   block_q=128, block_k=128))
    assert out2.shape == ref2.shape
    assert jnp.allclose(out2, ref2, atol=5e-2, rtol=5e-2), "bf16 mismatch vs reference"

    print("KERNEL_OK")
</pallas_src>

<mosaic_0001>
module attributes {stable_mosaic.version = 11 : i64} {
  func.func @_kv_proj_kernel(%arg0: i32, %arg1: i32, %arg2: memref<1x128x128xf32, #tpu.memory_space<vmem>>, %arg3: memref<1x128x128xf32, #tpu.memory_space<vmem>>, %arg4: memref<128x128xf32, #tpu.memory_space<vmem>>, %arg5: memref<1x128xf32, #tpu.memory_space<vmem>>, %arg6: memref<128x128xf32, #tpu.memory_space<vmem>>, %arg7: memref<1x128xf32, #tpu.memory_space<vmem>>, %arg8: memref<1x4x128x32xf32, #tpu.memory_space<vmem>>, %arg9: memref<1x4x128x32xf32, #tpu.memory_space<vmem>>) attributes {dimension_semantics = [#tpu.dimension_semantics<parallel>, #tpu.dimension_semantics<parallel>], iteration_bounds = array<i64: 2, 2>, scalar_prefetch = 0 : i64, scratch_operands = 0 : i64, tpu.core_type = #tpu.core_type<tc>, window_params = [{transform_indices = @transform_0, window_bounds = array<i64: 1, 128, 128>}, {transform_indices = @transform_1, window_bounds = array<i64: 1, 128, 128>}, {pipeline_mode = #tpu.pipeline_mode<synchronous>, transform_indices = @transform_2, window_bounds = array<i64: 128, 128>}, {pipeline_mode = #tpu.pipeline_mode<synchronous>, transform_indices = @transform_3, window_bounds = array<i64: 1, 128>}, {pipeline_mode = #tpu.pipeline_mode<synchronous>, transform_indices = @transform_4, window_bounds = array<i64: 128, 128>}, {pipeline_mode = #tpu.pipeline_mode<synchronous>, transform_indices = @transform_5, window_bounds = array<i64: 1, 128>}, {transform_indices = @transform_6, window_bounds = array<i64: 1, 4, 128, 32>}, {transform_indices = @transform_7, window_bounds = array<i64: 1, 4, 128, 32>}]} {
    %c0 = arith.constant 0 : index
    %c0_0 = arith.constant 0 : index
    %c0_1 = arith.constant 0 : index
    %0 = vector.load %arg2[%c0, %c0_0, %c0_1] : memref<1x128x128xf32, #tpu.memory_space<vmem>>, vector<1x128x128xf32>
    %1 = vector.shape_cast %0 : vector<1x128x128xf32> to vector<128x128xf32>
    %c0_2 = arith.constant 0 : index
    %c0_3 = arith.constant 0 : index
    %c0_4 = arith.constant 0 : index
    %2 = vector.load %arg3[%c0_2, %c0_3, %c0_4] : memref<1x128x128xf32, #tpu.memory_space<vmem>>, vector<1x128x128xf32>
    %3 = vector.shape_cast %2 : vector<1x128x128xf32> to vector<128x128xf32>
    %c0_5 = arith.constant 0 : index
    %c0_6 = arith.constant 0 : index
    %4 = vector.load %arg4[%c0_5, %c0_6] : memref<128x128xf32, #tpu.memory_space<vmem>>, vector<128x128xf32>
    %cst = arith.constant dense<0.000000e+00> : vector<128x128xf32>
    %5 = tpu.matmul %1, %4, %cst {dimension_numbers = #tpu.dot_dimension_numbers<[1], [0], [0], [1], [0, 0, 1, 1], [], []>} : vector<128x128xf32>, vector<128x128xf32>, vector<128x128xf32> -> vector<128x128xf32>
    %c0_7 = arith.constant 0 : index
    %c0_8 = arith.constant 0 : index
    %6 = vector.load %arg5[%c0_7, %c0_8] : memref<1x128xf32, #tpu.memory_space<vmem>>, vector<1x128xf32>
    %7 = vector.broadcast %6 : vector<1x128xf32> to vector<128x128xf32>
    %8 = arith.addf %5, %7 : vector<128x128xf32>
    %c0_9 = arith.constant 0 : index
    %c0_10 = arith.constant 0 : index
    %9 = vector.load %arg6[%c0_9, %c0_10] : memref<128x128xf32, #tpu.memory_space<vmem>>, vector<128x128xf32>
    %cst_11 = arith.constant dense<0.000000e+00> : vector<128x128xf32>
    %10 = tpu.matmul %3, %9, %cst_11 {dimension_numbers = #tpu.dot_dimension_numbers<[1], [0], [0], [1], [0, 0, 1, 1], [], []>} : vector<128x128xf32>, vector<128x128xf32>, vector<128x128xf32> -> vector<128x128xf32>
    %c0_12 = arith.constant 0 : index
    %c0_13 = arith.constant 0 : index
    %11 = vector.load %arg7[%c0_12, %c0_13] : memref<1x128xf32, #tpu.memory_space<vmem>>, vector<1x128xf32>
    %12 = vector.broadcast %11 : vector<1x128xf32> to vector<128x128xf32>
    %13 = arith.addf %10, %12 : vector<128x128xf32>
    %14 = vector.shape_cast %8 : vector<128x128xf32> to vector<128x4x32xf32>
    %15 = tpu.transpose %14, [1, 0, 2] : vector<128x4x32xf32> -> vector<4x128x32xf32>
    %c0_14 = arith.constant 0 : index
    %c0_15 = arith.constant 0 : index
    %c0_16 = arith.constant 0 : index
    %c0_17 = arith.constant 0 : index
    %16 = vector.load %arg8[%c0_14, %c0_15, %c0_16, %c0_17] : memref<1x4x128x32xf32, #tpu.memory_space<vmem>>, vector<1x4x128x32xf32>
    %17 = vector.shape_cast %16 : vector<1x4x128x32xf32> to vector<4x128x32xf32>
    %18 = vector.shape_cast %15 : vector<4x128x32xf32> to vector<1x4x128x32xf32>
    tpu.vector_store %arg8[%c0_14, %c0_15, %c0_16, %c0_17], %18 {strides = array<i32>} : memref<1x4x128x32xf32, #tpu.memory_space<vmem>>, vector<1x4x128x32xf32>,
    %19 = vector.shape_cast %13 : vector<128x128xf32> to vector<128x4x32xf32>
    %20 = tpu.transpose %19, [1, 0, 2] : vector<128x4x32xf32> -> vector<4x128x32xf32>
    %c0_18 = arith.constant 0 : index
    %c0_19 = arith.constant 0 : index
    %c0_20 = arith.constant 0 : index
    %c0_21 = arith.constant 0 : index
    %21 = vector.load %arg9[%c0_18, %c0_19, %c0_20, %c0_21] : memref<1x4x128x32xf32, #tpu.memory_space<vmem>>, vector<1x4x128x32xf32>
    %22 = vector.shape_cast %21 : vector<1x4x128x32xf32> to vector<4x128x32xf32>
    %23 = vector.shape_cast %20 : vector<4x128x32xf32> to vector<1x4x128x32xf32>
    tpu.vector_store %arg9[%c0_18, %c0_19, %c0_20, %c0_21], %23 {strides = array<i32>} : memref<1x4x128x32xf32, #tpu.memory_space<vmem>>, vector<1x4x128x32xf32>,
    return
  }
  func.func @transform_0(%arg0: i32, %arg1: i32) -> (i32, i32, i32) {
    %c0_i32 = arith.constant 0 : i32
    %c0_i32_0 = arith.constant 0 : i32
    return %arg0, %arg1, %c0_i32 : i32, i32, i32
  }
  func.func @transform_1(%arg0: i32, %arg1: i32) -> (i32, i32, i32) {
    %c0_i32 = arith.constant 0 : i32
    %c0_i32_0 = arith.constant 0 : i32
    return %arg0, %arg1, %c0_i32 : i32, i32, i32
  }
  func.func @transform_2(%arg0: i32, %arg1: i32) -> (i32, i32) {
    %c0_i32 = arith.constant 0 : i32
    %c0_i32_0 = arith.constant 0 : i32
    %c0_i32_1 = arith.constant 0 : i32
    return %c0_i32, %c0_i32_0 : i32, i32
  }
  func.func @transform_3(%arg0: i32, %arg1: i32) -> (i32, i32) {
    %c0_i32 = arith.constant 0 : i32
    %c0_i32_0 = arith.constant 0 : i32
    %c0_i32_1 = arith.constant 0 : i32
    return %c0_i32, %c0_i32_0 : i32, i32
  }
  func.func @transform_4(%arg0: i32, %arg1: i32) -> (i32, i32) {
    %c0_i32 = arith.constant 0 : i32
    %c0_i32_0 = arith.constant 0 : i32
    %c0_i32_1 = arith.constant 0 : i32
    return %c0_i32, %c0_i32_0 : i32, i32
  }
  func.func @transform_5(%arg0: i32, %arg1: i32) -> (i32, i32) {
    %c0_i32 = arith.constant 0 : i32
    %c0_i32_0 = arith.constant 0 : i32
    %c0_i32_1 = arith.constant 0 : i32
    return %c0_i32, %c0_i32_0 : i32, i32
  }
  func.func @transform_6(%arg0: i32, %arg1: i32) -> (i32, i32, i32, i32) {
    %c0_i32 = arith.constant 0 : i32
    %c0_i32_0 = arith.constant 0 : i32
    %c0_i32_1 = arith.constant 0 : i32
    return %arg0, %c0_i32, %arg1, %c0_i32_0 : i32, i32, i32, i32
  }
  func.func @transform_7(%arg0: i32, %arg1: i32) -> (i32, i32, i32, i32) {
    %c0_i32 = arith.constant 0 : i32
    %c0_i32_0 = arith.constant 0 : i32
    %c0_i32_1 = arith.constant 0 : i32
    return %arg0, %c0_i32, %arg1, %c0_i32_0 : i32, i32, i32, i32
  }
}

</mosaic_0001>

<bundles_post_ra>
// kernel: tpu_custom_call.1
= control target key start
LH: loop header
LB: loop body
LE: loop exit
PB: predicated region body
PF: predicated region fallthrough
CT: control target
= control target key end

     0   :  { %s8598_s0 = inlined_call_operand.hbm [shape: f32[2,256,128], index: 0, kind: input, shape index: {}]   ;;  %s8599_s1 = inlined_call_operand.hbm [shape: f32[2,256,128], index: 1, kind: input, shape index: {}]   ;;  %s8600_s2 = inlined_call_operand.hbm [shape: f32[128,128], index: 2, kind: input, shape index: {}]   ;;  %s8601_s3 = inlined_call_operand.vmem [shape: f32[1,128], index: 3, kind: input, shape index: {}]   ;;  %s8602_s4 = inlined_call_operand.hbm [shape: f32[128,128], index: 4, kind: input, shape index: {}]   ;;  %s8603_s5 = inlined_call_operand.vmem [shape: f32[1,128], index: 5, kind: input, shape index: {}]   ;;  %s8604_s6 = inlined_call_operand.vmem [shape: f32[2,4,256,32], index: 6, kind: output, shape index: {0}]   ;;  %s8605_s7 = inlined_call_operand.vmem [shape: f32[2,4,256,32], index: 7, kind: output, shape index: {1}]  }
   0x1   :  { %8616 = sst [smem:[#allocation21_spill]] %s8600_s2 }
   0x2   :  { %8617 = sst [smem:[#allocation22_spill]] %s8602_s4 }
   0x3   :  { %8618 = sst [smem:[#allocation23_spill]] %s8604_s6 }
   0x4   :  { %8619 = sst [smem:[#allocation24_spill]] %s8605_s7 }
   0x5   :  { %13 = vsyncpa [#allocation3], 0 }
   0x6   :  { %15 = vsyncpa [#allocation3 + $0x1], 0 }
   0x7   :  { %16 = vsyncpa [#allocation5], 0 }
   0x8   :  { %18 = vsyncpa [#allocation5 + $0x1], 0 }
   0x9   :  { %19 = vsyncpa [#allocation8], 0  ;;  %s5746_s24 = smov 0   ;;  %s5748_s25 = smov 0  }
   0xa   :  { %s5750_s26 = smov 0   ;;  %s5752_s27 = smov 0  }
   0xb   :  { %s5754_s28 = smov 0   ;;  %s5756_s29 = smov 0  }
   0xc   :  { %s5758_s30 = smov 0   ;;  %s5760_s8 = smov 0  }
   0xd LB: > { %8620 = sst [smem:[#allocation15_spill]] %s5687_s29  ;;  %s5785_s9 = sadd.s32 4294967295, %s5695_s8   ;;  %s5695_s8 = sphi %s5760_s8, %s25_s8   ;;  %s5691_s30 = sphi %s5758_s30, %s8669_s30   ;;  %s5687_s29 = sphi %s5756_s29, %s8668_s29   ;;  %s5683_s28 = sphi %s5754_s28, %s8674_s28   ;;  %s5679_s27 = sphi %s5752_s27, %s8673_s27   ;;  %s5675_s26 = sphi %s5750_s26, %s8672_s26   ;;  %s5671_s25 = sphi %s5748_s25, %s8671_s25   ;;  %s5667_s24 = sphi %s5746_s24, %s8670_s24  }
   0xe   : > { %8621 = sst [smem:[#allocation16_spill]] %s5691_s30  ;;  %p59_p0 = scmp.ne.s32.totalorder %s5671_s25, %s5667_s24 }
   0xf   : > { %p60_p1 = scmp.eq.s32.totalorder %s5785_s9, 0  ;;  %p197_p2 = scmp.eq.s32.totalorder %s5785_s9, 3 }
  0x10   : > { %p5328_p3 = scmp.ge.s32.totalorder %s5695_s8, 1  ;;  %p238_p4 = scmp.lt.s32.totalorder %s5695_s8, 5 }
  0x11   : > { %p5794_p5 = por %p60_p1, %p59_p0  ;;  %s8624_s2 = sld [smem:[#allocation21_spill]] }
  0x12   : > { %p5798_p6 = pnand %p5328_p3, %p238_p4  ;;  %s5697_s15 = smov [#allocation6]  }
  0x13   : > { %s251_s16 = sshll.u32 %s5697_s15, 4  ;;  %s8625_s4 = sld [smem:[#allocation22_spill]]  ;;  %s252_s16 = int_to_ptr.vmem [resolvable:$true] %s251_s16 }
  0x14   : > { %p5401_p7 = pneg %p5798_p6  ;;  %s8606_s20 = smov 128  }
  0x15   : > { %s8608_s21 = smov 8   ;;  %s5700_s22 = smov [#allocation7]  }
  0x16   : > { %p5402_p8 = pnand %p5401_p7, %p60_p1  ;;  %s268_s23 = sshll.u32 %s5700_s22, 4  ;;  %s269_s23 = int_to_ptr.vmem [resolvable:$true] %s268_s23 }
  0x17   : > { %s249_s14 = sshll.u32 %s8624_s2, 4  ;;  %s34_s24 = sadd.s32 1, %s5687_s29  ;;  %s250_s14 = int_to_ptr.hbm [resolvable:$true] %s249_s14 }
  0x18   : > { %5404 = dma.hbm_to_vmem [thread:$0]  (!%p5402_p8), %s250_s14, 2048, %s252_s16, [#allocation5], %s8606_s20, %s8606_s20, %s8608_s21  }
  0x19   : > { %s266_s19 = sshll.u32 %s8625_s4, 4  ;;  %p35_p9 = scmp.ge.s32.totalorder %s34_s24, 2  ;;  %s267_s19 = int_to_ptr.hbm [resolvable:$true] %s266_s19 }
  0x1a   : > { %5407 = dma.hbm_to_vmem [thread:$0]  (!%p5402_p8), %s267_s19, 2048, %s269_s23, [#allocation8], %s8606_s20, %s8606_s20, %s8608_s21  }
  0x1b   : > { %s37_s12 = sadd.s32 1, %s5691_s30  ;;  %s46_s13 = sadd.s32 1, %s5675_s26 }
  0x1c   : > { %p53_p10 = scmp.ne.s32.totalorder %s5675_s26, %s5671_s25  ;;  %s8676_s24 = smov (%p35_p9, %s34_s24), 0 }
  0x1d   : > { %8626 = sst [smem:[#allocation17_spill]] %s8676_s24  ;;  %s8678_s12 = smov (!%p35_p9, %s37_s12), %s5691_s30 }
  0x1e   : > { %s42_s14 = ssub.s32 %s5687_s29, %s8676_s24  ;;  %p54_p11 = scmp.eq.s32.totalorder %s5695_s8, 0 }
  0x1f   : > { %p39_p12 = scmp.ge.s32.totalorder %s8678_s12, 2  ;;  %p5831_p13 = por %p197_p2, %p53_p10 }
  0x20   : > { %p5835_p0 = por %p54_p11, %p53_p10  ;;  %p5417_p3 = scmp.lt.s32.totalorder %s5695_s8, 4 }
  0x21   : > { %s8680_s12 = smov (%p39_p12, %s8678_s12), 0  ;;  %s285_s17 = sand.u32 1, %s5675_s26  }
  0x22   : > { %8629 = sst [smem:[#allocation18_spill]] %s8680_s12  ;;  %s5333_s18 = sshll.u32 %s5687_s29, 4 }
  0x23   : > { %s41_s19 = ssub.s32 %s5691_s30, %s8680_s12  ;;  %s5332_s23 = sshll.u32 %s285_s17, 7 }
  0x24   : > { %s43_s22 = sor.u32 %s42_s14, %s41_s19  ;;  %s5334_s20 = sshll.u32 %s5691_s30, 5 }
  0x25   : > { %p44_p4 = scmp.eq.s32.totalorder %s43_s22, 0  ;;  %s289_s21 = scalar_lea.vmem [#allocation2], %s5332_s23 }
  0x26   : > { %s299_s2 = sshll.u32 %s289_s21, 4  ;;  %s294_s24 = sadd.s32 %s5334_s20, %s5333_s18  ;;  %s300_s2 = int_to_ptr.vmem [resolvable:$true] %s299_s2 }
  0x27   : > { %s5848_s4 = scalar_select %p44_p4, %s5675_s26, %s46_s13  }
  0x28   : > { %s5335_s7 = sshll.u32 %s294_s24, 3  ;;  %p5854_p2 = pnand %p5417_p3, %p5835_p0 }
  0x29   : > { %8630 = sst [smem:[#allocation19_spill]] %s5848_s4  ;;  %s296_s14 = scalar_lea.hbm %s8598_s0, %s5335_s7 }
  0x2a   : > { %s297_s19 = sshll.u32 %s296_s14, 4  ;;  %s320_s20 = scalar_lea.hbm %s8599_s1, %s5335_s7  ;;  %s298_s19 = int_to_ptr.hbm [resolvable:$true] %s297_s19 }
  0x2b   : > { %s286_s18 = scalar_lea.sflag [#allocation3], %s285_s17  ;;  %s8632_s24 = smov 8  }
  0x2c   : > { %s8633_s16 = smov 128   ;;  %s321_s22 = sshll.u32 %s320_s20, 4  ;;  %s322_s22 = int_to_ptr.hbm [resolvable:$true] %s321_s22 }
  0x2d   : > { %5411 = dma.hbm_to_vmem [thread:$0]  (!%p5854_p2), %s298_s19, 2048, %s300_s2, %s286_s18, %s8633_s16, %s8633_s16, %s8632_s24  }
  0x2e   : > { %s313_s30 = scalar_lea.vmem [#allocation4], %s5332_s23  ;;  %s309_s29 = sand.u32 1, %s5695_s8  }
  0x2f   : > { %s323_s4 = sshll.u32 %s313_s30, 4  ;;  %s310_s12 = scalar_lea.sflag [#allocation5], %s309_s29  ;;  %s324_s4 = int_to_ptr.vmem [resolvable:$true] %s323_s4 }
  0x30   : > { %5414 = dma.hbm_to_vmem [thread:$0]  (!%p5854_p2), %s322_s22, 2048, %s324_s4, %s310_s12, %s8633_s16, %s8633_s16, %s8632_s24  }
  0x31   : > { %335 = sbr.rel (%p5798_p6) target bundleno = 974 (0x3ce), region = 44 }
  0x36   : > { %s5878_s7 = sand.u32 1, %s5671_s25  }
  0x37   : > { %s5341_s2 = sshll.u32 %s5878_s7, 7  ;;  %s338_s30 = scalar_lea.sflag [#allocation3], %s5878_s7 }
  0x38   : > { %s5882_s17 = scalar_lea.vmem [#allocation2], %s5341_s2 }
  0x39   : > { %5650 = dma.done.wait (%p5794_p5), %s338_s30, 2048  }
  0x3a   : > { %5652 = vsyncadd (%p5794_p5), %s338_s30, 4294965248  ;;  %s347_s4 = sand.u32 1, %s5785_s9   ;;  %s5889_s11 = scalar_lea.vmem [#allocation4], %s5341_s2 }
  0x3b   : > { %s348_s6 = scalar_lea.sflag [#allocation5], %s347_s4 }
  0x3c   : > { %5654 = dma.done.wait (%p5794_p5), %s348_s6, 2048  }
  0x3d   : > { %5656 = vsyncadd (%p5794_p5), %s348_s6, 4294965248 }
  0x3e   : > { %5658 = dma.done.wait (%p60_p1), [#allocation5], 2048  }
  0x3f   : > { %5660 = vsyncadd (%p60_p1), [#allocation5], 4294965248 }
  0x40   : > { %5662 = dma.done.wait (%p60_p1), [#allocation8], 2048  }
  0x41   : > { %5664 = vsyncadd (%p60_p1), [#allocation8], 4294965248  ;;  %v452_v0 = vld [vmem:[#allocation6 + $0x78] sm:$0xff]  ;;  %v451_v1 = vld [vmem:[#allocation6 + $0x70] sm:$0xff]  ;;  %s5701_s23 = smov 32   ;;  %s5702_s14 = smov 64  }
  0x42   : > { %457 = vmatpush.msra.mxu0 %v452_v0  ;;  %v537_v2 = vld [vmem:[#allocation7 + $0x78] sm:$0xff]  ;;  %5357 = vmatpush.msra.mxu2 %v452_v0  ;;  %v450_v3 = vld [vmem:[#allocation6 + $0x68] sm:$0xff]  ;;  %v536_v4 = vld [vmem:[#allocation7 + $0x70] sm:$0xff]  ;;  %s5703_s13 = smov 96   ;;  %vm768_vm0 = vcmask 1047556   ;;  %vm2528_vm1 = vcmask 261120  }
  0x43   : > { %542 = vmatpush.msra.mxu1 %v537_v2  ;;  %5373 = vmatpush.msra.mxu3 %v537_v2  ;;  %v535_v5 = vld [vmem:[#allocation7 + $0x68] sm:$0xff]  ;;  %v449_v6 = vld [vmem:[#allocation6 + $0x60] sm:$0xff]  ;;  %v448_v8 = vld [vmem:[#allocation6 + $0x58] sm:$0xff]  ;;  %s5345_s20 = sshll.u32 %s5878_s7, 9  ;;  %s5349_s7 = sshll.u32 (%p5831_p13), %s5679_s27, 4 }
  0x44   : > { %458 = vmatpush.msra.mxu0 %v451_v1  ;;  %5358 = vmatpush.msra.mxu2 %v451_v1  ;;  %v534_v7 = vld [vmem:[#allocation7 + $0x60] sm:$0xff]  ;;  %v533_v9 = vld [vmem:[#allocation7 + $0x58] sm:$0xff]  ;;  %v447_v10 = vld [vmem:[#allocation6 + $0x50] sm:$0xff]  ;;  %s6197_s18 = scalar_lea.vmem [#allocation9], %s5345_s20  ;;  %s6281_s24 = scalar_lea.vmem [#allocation10], %s5345_s20 }
  0x45   : > { %543 = vmatpush.msra.mxu1 %v536_v4  ;;  %5374 = vmatpush.msra.mxu3 %v536_v4  ;;  %v532_v11 = vld [vmem:[#allocation7 + $0x50] sm:$0xff]  ;;  %v446_v12 = vld [vmem:[#allocation6 + $0x48] sm:$0xff]  ;;  %v445_v14 = vld [vmem:[#allocation6 + $0x40] sm:$0xff]  ;;  %s5350_s2 = sshll.u32 (%p5831_p13), %s5683_s28, 7 }
  0x46   : > { %459 = vmatpush.msra.mxu0 %v450_v3  ;;  %5359 = vmatpush.msra.mxu2 %v450_v3  ;;  %v531_v13 = vld [vmem:[#allocation7 + $0x48] sm:$0xff]  ;;  %v530_v15 = vld [vmem:[#allocation7 + $0x40] sm:$0xff]  ;;  %v444_v16 = vld [vmem:[#allocation6 + $0x38] sm:$0xff]  ;;  %s4590_s30 = sadd.s32 (%p5831_p13), %s5350_s2, %s5349_s7 }
  0x47   : > { %544 = vmatpush.msra.mxu1 %v535_v5  ;;  %5375 = vmatpush.msra.mxu3 %v535_v5  ;;  %v529_v17 = vld [vmem:[#allocation7 + $0x38] sm:$0xff]  ;;  %v443_v18 = vld [vmem:[#allocation6 + $0x30] sm:$0xff]  ;;  %v442_v20 = vld [vmem:[#allocation6 + $0x28] sm:$0xff] }
  0x48   : > { %460 = vmatpush.msra.mxu0 %v449_v6  ;;  %5360 = vmatpush.msra.mxu2 %v449_v6  ;;  %v528_v19 = vld [vmem:[#allocation7 + $0x30] sm:$0xff]  ;;  %v527_v21 = vld [vmem:[#allocation7 + $0x28] sm:$0xff]  ;;  %v441_v22 = vld [vmem:[#allocation6 + $0x20] sm:$0xff] }
  0x49   : > { %545 = vmatpush.msra.mxu1 %v534_v7  ;;  %5376 = vmatpush.msra.mxu3 %v534_v7  ;;  %v526_v23 = vld [vmem:[#allocation7 + $0x20] sm:$0xff]  ;;  %v440_v24 = vld [vmem:[#allocation6 + $0x18] sm:$0xff]  ;;  %v439_v26 = vld [vmem:[#allocation6 + $0x10] sm:$0xff] }
  0x4a   : > { %461 = vmatpush.msra.mxu0 %v448_v8  ;;  %5361 = vmatpush.msra.mxu2 %v448_v8  ;;  %v525_v25 = vld [vmem:[#allocation7 + $0x18] sm:$0xff]  ;;  %v524_v27 = vld [vmem:[#allocation7 + $0x10] sm:$0xff]  ;;  %v438_v28 = vld [vmem:[#allocation6 + $0x8] sm:$0xff] }
  0x4b   : > { %546 = vmatpush.msra.mxu1 %v533_v9  ;;  %5377 = vmatpush.msra.mxu3 %v533_v9  ;;  %v523_v29 = vld [vmem:[#allocation7 + $0x8] sm:$0xff]  ;;  %v437_v30 = vld [vmem:[#allocation6] sm:$0xff]  ;;  %v407_v40 = vld [vmem:[%s5882_s17 + $0x10] sm:$0xff] }
  0x4c   : > { %462 = vmatpush.msra.mxu0 %v447_v10  ;;  %5362 = vmatpush.msra.mxu2 %v447_v10  ;;  %v405_v31 = vld [vmem:[%s5882_s17] sm:$0xff]  ;;  %v406_v36 = vld [vmem:[%s5882_s17 + $0x8] sm:$0xff]  ;;  %v423_v41 = vld [vmem:[%s5889_s11 + $0x10] sm:$0xff] }
  0x4d   : > { %547 = vmatpush.msra.mxu1 %v532_v11  ;;  %5378 = vmatpush.msra.mxu3 %v532_v11  ;;  %v522_v32 = vld [vmem:[#allocation7] sm:$0xff]  ;;  %v422_v37 = vld [vmem:[%s5889_s11 + $0x8] sm:$0xff]  ;;  %v415_v42 = vld [vmem:[%s5882_s17 + $0x50] sm:$0xff] }
  0x4e   : > { %463 = vmatpush.msra.mxu0 %v446_v12  ;;  %5363 = vmatpush.msra.mxu2 %v446_v12  ;;  %v421_v33 = vld [vmem:[%s5889_s11] sm:$0xff]  ;;  %v414_v38 = vld [vmem:[%s5882_s17 + $0x48] sm:$0xff]  ;;  %v431_v43 = vld [vmem:[%s5889_s11 + $0x50] sm:$0xff] }
  0x4f   : > { %548 = vmatpush.msra.mxu1 %v531_v13  ;;  %5379 = vmatpush.msra.mxu3 %v531_v13  ;;  %v413_v34 = vld [vmem:[%s5882_s17 + $0x40] sm:$0xff]  ;;  %v430_v39 = vld [vmem:[%s5889_s11 + $0x48] sm:$0xff]  ;;  %v408_v44 = vld [vmem:[%s5882_s17 + $0x18] sm:$0xff] }
  0x50   : > { %464 = vmatpush.msra.mxu0 %v445_v14  ;;  %5364 = vmatpush.msra.mxu2 %v445_v14  ;;  %v429_v35 = vld [vmem:[%s5889_s11 + $0x40] sm:$0xff]  ;;  %v424_v45 = vld [vmem:[%s5889_s11 + $0x18] sm:$0xff]  ;;  %v410_v52 = vld [vmem:[%s5882_s17 + $0x28] sm:$0xff] }
  0x51   : > { %549 = vmatpush.msra.mxu1 %v530_v15  ;;  %5380 = vmatpush.msra.mxu3 %v530_v15  ;;  %v416_v46 = vld [vmem:[%s5882_s17 + $0x58] sm:$0xff]  ;;  %v409_v48 = vld [vmem:[%s5882_s17 + $0x20] sm:$0xff]  ;;  %v426_v53 = vld [vmem:[%s5889_s11 + $0x28] sm:$0xff] }
  0x52   : > { %465 = vmatpush.msra.mxu0 %v444_v16  ;;  %5365 = vmatpush.msra.mxu2 %v444_v16  ;;  %v432_v47 = vld [vmem:[%s5889_s11 + $0x58] sm:$0xff]  ;;  %v425_v49 = vld [vmem:[%s5889_s11 + $0x20] sm:$0xff]  ;;  %v418_v54 = vld [vmem:[%s5882_s17 + $0x68] sm:$0xff] }
  0x53   : > { %550 = vmatpush.msra.mxu1 %v529_v17  ;;  %5381 = vmatpush.msra.mxu3 %v529_v17  ;;  %v417_v50 = vld [vmem:[%s5882_s17 + $0x60] sm:$0xff]  ;;  %v434_v60 = vld [vmem:[%s5889_s11 + $0x68] sm:$0xff]  ;;  %v411_v63 = vld [vmem:[%s5882_s17 + $0x30] sm:$0xff] }
  0x54   : > { %466 = vmatpush.msra.mxu0 %v443_v18  ;;  %5366 = vmatpush.msra.mxu2 %v443_v18  ;;  %v433_v51 = vld [vmem:[%s5889_s11 + $0x60] sm:$0xff]  ;;  %v427_v3 = vld [vmem:[%s5889_s11 + $0x30] sm:$0xff]  ;;  %v412_v13 = vld [vmem:[%s5882_s17 + $0x38] sm:$0xff] }
  0x55   : > { %551 = vmatpush.msra.mxu1 %v528_v19  ;;  %5382 = vmatpush.msra.mxu3 %v528_v19  ;;  %v5929_v55 = vld [vmem:[%s8601_s3] ss:$0 sm:$0xff]  ;;  %v419_v8 = vld [vmem:[%s5882_s17 + $0x70] sm:$0xff]  ;;  %v428_v16 = vld [vmem:[%s5889_s11 + $0x38] sm:$0xff] }
  0x56   : > { %467 = vmatpush.msra.mxu0 %v442_v20  ;;  %5367 = vmatpush.msra.mxu2 %v442_v20  ;;  %v5941_v58 = vld [vmem:[%s8603_s5] ss:$0 sm:$0xff]  ;;  %v435_v12 = vld [vmem:[%s5889_s11 + $0x70] sm:$0xff]  ;;  %v420_v19 = vld [vmem:[%s5882_s17 + $0x78] sm:$0xff]  ;;  %s5351_s17 = sshll.u32 (%p5831_p13), %s4590_s30, 3 }
  0x57   : > { %552 = vmatpush.msra.mxu1 %v527_v21  ;;  %5383 = vmatpush.msra.mxu3 %v527_v21 }
  0x58   : > { %468 = vmatpush.msra.mxu0 %v441_v22  ;;  %5368 = vmatpush.msra.mxu2 %v441_v22  ;;  %v436_v22 = vld [vmem:[%s5889_s11 + $0x78] sm:$0xff]  ;;  %s8663_s11 = sld [smem:[#allocation23_spill]] (%p5831_p13) }
  0x59   : > { %553 = vmatpush.msra.mxu1 %v526_v23  ;;  %5384 = vmatpush.msra.mxu3 %v526_v23 }
  0x5a   : > { %469 = vmatpush.msra.mxu0 %v440_v24  ;;  %5369 = vmatpush.msra.mxu2 %v440_v24 }
  0x5b   : > { %554 = vmatpush.msra.mxu1 %v525_v25  ;;  %5385 = vmatpush.msra.mxu3 %v525_v25 }
  0x5c   : > { %470 = vmatpush.msra.mxu0 %v439_v26  ;;  %5370 = vmatpush.msra.mxu2 %v439_v26 }
  0x5d   : > { %555 = vmatpush.msra.mxu1 %v524_v27  ;;  %5386 = vmatpush.msra.mxu3 %v524_v27 }
  0x5e   : > { %471 = vmatpush.msra.mxu0 %v438_v28  ;;  %5371 = vmatpush.msra.mxu2 %v438_v28  ;;  %s8309_s9 = scalar_lea.vmem (%p5831_p13), %s8663_s11, %s5351_s17 }
  0x5f   : > { %556 = vmatpush.msra.mxu1 %v523_v29  ;;  %5387 = vmatpush.msra.mxu3 %v523_v29 }
  0x60   : > { %472 = vmatpush.msra.mxu0 %v437_v30  ;;  %5372 = vmatpush.msra.mxu2 %v437_v30 }
  0x61   : > { %473 = vmatmul.f32.vlgmr.msra.gmra.mxu0 %v405_v31  ;;  %557 = vmatpush.msra.mxu1 %v522_v32 }
  0x62   : > { %558 = vmatmul.f32.vlgmr.msra.gmra.mxu1 %v421_v33  ;;  %497 = vmatmul.f32.vlgmr.msra.gmra.mxu2 %v413_v34 }
  0x63   : > { %5388 = vmatpush.msra.mxu3 %v522_v32 }
  0x64   : > { %582 = vmatmul.f32.vlgmr.msra.gmra.mxu3 %v429_v35 }
  0x69   : > { %476 = vmatmul.f32.gmra.mxu0 %v406_v36 }
  0x6a   : > { %561 = vmatmul.f32.gmra.mxu1 %v422_v37  ;;  %500 = vmatmul.f32.gmra.mxu2 %v414_v38 }
  0x6c   : > { %585 = vmatmul.f32.gmra.mxu3 %v430_v39  ;;  %v5704_v39 = vmov 1983009808  }
  0x71   : > { %479 = vmatmul.f32.gmra.mxu0 %v407_v40  ;;  %v773_v40 = vunpack.c.l.s4 %v5704_v39 }
  0x72   : > { %564 = vmatmul.f32.gmra.mxu1 %v423_v41  ;;  %503 = vmatmul.f32.gmra.mxu2 %v415_v42 }
  0x73   : > { %v6088_v41 = vunpack.c.0.s8 %v773_v40 }
  0x74   : > { %588 = vmatmul.f32.gmra.mxu3 %v431_v43 }
  0x79   : > { %482 = vmatmul.f32.gmra.mxu0 %v408_v44 }
  0x7a   : > { %567 = vmatmul.f32.gmra.mxu1 %v424_v45  ;;  %506 = vmatmul.f32.gmra.mxu2 %v416_v46 }
  0x7c   : > { %591 = vmatmul.f32.gmra.mxu3 %v432_v47  ;;  %v5705_v47 = vmov 1934713408  }
  0x81   : > { %485 = vmatmul.f32.gmra.mxu0 %v409_v48  ;;  %v797_v48 = vunpack.c.l.s4 %v5705_v47 }
  0x82   : > { %570 = vmatmul.f32.gmra.mxu1 %v425_v49  ;;  %509 = vmatmul.f32.gmra.mxu2 %v417_v50 }
  0x84   : > { %594 = vmatmul.f32.gmra.mxu3 %v433_v51 }
  0x89   : > { %488 = vmatmul.f32.gmra.mxu0 %v410_v52 }
  0x8a   : > { %573 = vmatmul.f32.gmra.mxu1 %v426_v53  ;;  %512 = vmatmul.f32.gmra.mxu2 %v418_v54 }
  0x8c   : > { %597 = vmatmul.f32.gmra.mxu3 %v434_v60 }
  0x91   : > { %491 = vmatmul.f32.gmra.mxu0 %v411_v63 }
  0x92   : > { %576 = vmatmul.f32.gmra.mxu1 %v427_v3  ;;  %515 = vmatmul.f32.gmra.mxu2 %v419_v8  ;;  %v6110_v8 = vunpack.c.0.s8 %v797_v48 }
  0x94   : > { %600 = vmatmul.f32.gmra.mxu3 %v435_v12 }
  0x99   : > { %494 = vmatmul.f32.gmra.mxu0 %v412_v13 }
  0x9a   : > { %579 = vmatmul.f32.gmra.mxu1 %v428_v16  ;;  %518 = vmatmul.f32.gmra.mxu2 %v420_v19 }
  0x9c   : > { %603 = vmatmul.f32.gmra.mxu3 %v436_v22 }
  0xde   : > { %v474_v56 = vpop.f32.mrf.mxu0 }
  0xdf   : > { %v5932_v57 = vadd.f32 %v5929_v55, %v474_v56  ;;  %v559_v59 = vpop.f32.mrf.mxu1 }
  0xe0   : > { %v5947_v61 = vadd.f32 %v5941_v58, %v559_v59 }
  0xe1   : > { %719 = vrot.lane.b32.xlu2 %v5932_v57, %s5701_s23  ;;  %671 = vrot.lane.b32.xlu1 %v5932_v57, %s5702_s14  ;;  %v770_v42 = vrot.slane %v5932_v57, 4 }
  0xe2   : > { %623 = vrot.lane.b32.xlu0 %v5932_v57, %s5703_s13  ;;  %v2755_v49 = vrot.slane %v5947_v61, 4 }
  0xe5   : > { %v498_v62 = vpop.f32.mrf.mxu2 }
  0xe6   : > { %v5957_v0 = vadd.f32 %v5929_v55, %v498_v62  ;;  %v477_v6 = vpop.f32.mrf.mxu0 }
  0xe7   : > { %v562_v1 = vpop.f32.mrf.mxu1  ;;  %v583_v2 = vpop.f32.mrf.mxu3  ;;  %v5980_v9 = vadd.f32 %v5929_v55, %v477_v6 }
  0xe8   : > { %v5967_v4 = vadd.f32 %v5941_v58, %v562_v1  ;;  %v5970_v5 = vadd.f32 %v5941_v58, %v583_v2  ;;  %v1218_v54 = vrot.slane %v5957_v0, 4 }
  0xe9   : > { %2705 = vrot.lane.b32.xlu2 %v5947_v61, %s5701_s23  ;;  %2657 = vrot.lane.b32.xlu1 %v5947_v61, %s5702_s14  ;;  %v826_v53 = vrot.slane %v5980_v9, 4 }
  0xea   : > { %2609 = vrot.lane.b32.xlu0 %v5947_v61, %s5703_s13  ;;  %v2811_v2 = vrot.slane %v5967_v4, 4  ;;  %v3203_v3 = vrot.slane %v5970_v5, 4 }
  0xed   : > { %v501_v7 = vpop.f32.mrf.mxu2 }
  0xee   : > { %v5983_v10 = vadd.f32 %v5929_v55, %v501_v7  ;;  %v480_v15 = vpop.f32.mrf.mxu0 }
  0xef   : > { %v586_v11 = vpop.f32.mrf.mxu3  ;;  %v6004_v17 = vadd.f32 %v5929_v55, %v480_v15  ;;  %v565_v18 = vpop.f32.mrf.mxu1 }
  0xf0   : > { %v5994_v14 = vadd.f32 %v5941_v58, %v586_v11  ;;  %v6014_v20 = vadd.f32 %v5941_v58, %v565_v18  ;;  %v1274_v15 = vrot.slane %v5983_v10, 4 }
  0xf1   : > { %639 = vrot.lane.b32.xlu2 %v5957_v0, %s5703_s13  ;;  %735 = vrot.lane.b32.xlu1 %v5957_v0, %s5701_s23 }
  0xf2   : > { %687 = vrot.lane.b32.xlu0 %v5957_v0, %s5702_s14 }
  0xf5   : > { %v504_v21 = vpop.f32.mrf.mxu2 }
  0xf6   : > { %v6024_v23 = vadd.f32 %v5929_v55, %v504_v21  ;;  %v483_v26 = vpop.f32.mrf.mxu0 }
  0xf7   : > { %v589_v24 = vpop.f32.mrf.mxu3  ;;  %v6042_v27 = vadd.f32 %v5929_v55, %v483_v26  ;;  %v568_v28 = vpop.f32.mrf.mxu1 }
  0xf8   : > { %v6033_v25 = vadd.f32 %v5941_v58, %v589_v24  ;;  %v6051_v29 = vadd.f32 %v5941_v58, %v568_v28  ;;  %v1330_v19 = vrot.slane %v6024_v23, 4 }
  0xf9   : > { %2625 = vrot.lane.b32.xlu2 %v5970_v5, %s5703_s13  ;;  %2611 = vrot.lane.b32.xlu1 %v5967_v4, %s5703_s13 }
  0xfa   : > { %2673 = vrot.lane.b32.xlu0 %v5970_v5, %s5702_s14 }
  0xfd   : > { %v507_v30 = vpop.f32.mrf.mxu2 }
  0xfe   : > { %v6060_v32 = vadd.f32 %v5929_v55, %v507_v30  ;;  %v486_v36 = vpop.f32.mrf.mxu0  ;;  %v3315_v30 = vrot.slane %v6033_v25, 4 }
  0xff   : > { %v592_v33 = vpop.f32.mrf.mxu3  ;;  %v6082_v38 = vadd.f32 %v5929_v55, %v486_v36  ;;  %v571_v43 = vpop.f32.mrf.mxu1 }
 0x100   : > { %v6071_v35 = vadd.f32 %v5941_v58, %v592_v33  ;;  %v6102_v62 = vadd.f32 %v5941_v58, %v571_v43 }
 0x101   : > { %673 = vrot.lane.b32.xlu2 %v5980_v9, %s5702_s14  ;;  %689 = vrot.lane.b32.xlu1 %v5983_v10, %s5702_s14 }
 0x102   : > { %625 = vrot.lane.b32.xlu0 %v5980_v9, %s5703_s13 }
 0x105   : > { %v510_v18 = vpop.f32.mrf.mxu2 }
 0x106   : > { %v6136_v47 = vadd.f32 %v5929_v55, %v510_v18 }
 0x109   : > { %2659 = vrot.lane.b32.xlu2 %v5967_v4, %s5702_s14  ;;  %2675 = vrot.lane.b32.xlu1 %v5994_v14, %s5702_s14 }
 0x10a   : > { %721 = vrot.lane.b32.xlu0 %v5980_v9, %s5701_s23 }
 0x111   : > { %737 = vrot.lane.b32.xlu2 %v5983_v10, %s5701_s23  ;;  %627 = vrot.lane.b32.xlu1 %v6004_v17, %s5703_s13 }
 0x112   : > { %2707 = vrot.lane.b32.xlu0 %v5967_v4, %s5701_s23 }
 0x119   : > { %2613 = vrot.lane.b32.xlu2 %v6014_v20, %s5703_s13  ;;  %723 = vrot.lane.b32.xlu1 %v6004_v17, %s5701_s23 }
 0x11a   : > { %641 = vrot.lane.b32.xlu0 %v5983_v10, %s5703_s13 }
 0x121   : > { %691 = vrot.lane.b32.xlu2 %v6024_v23, %s5702_s14  ;;  %2709 = vrot.lane.b32.xlu1 %v6014_v20, %s5701_s23 }
 0x122   : > { %2627 = vrot.lane.b32.xlu0 %v5994_v14, %s5703_s13 }
 0x129   : > { %2677 = vrot.lane.b32.xlu2 %v6033_v25, %s5702_s14  ;;  %643 = vrot.lane.b32.xlu1 %v6024_v23, %s5703_s13 }
 0x12a   : > { %675 = vrot.lane.b32.xlu0 %v6004_v17, %s5702_s14 }
 0x131   : > { %725 = vrot.lane.b32.xlu2 %v6042_v27, %s5701_s23  ;;  %2629 = vrot.lane.b32.xlu1 %v6033_v25, %s5703_s13 }
 0x132   : > { %2661 = vrot.lane.b32.xlu0 %v6014_v20, %s5702_s14 }
 0x139   : > { %2711 = vrot.lane.b32.xlu2 %v6051_v29, %s5701_s23  ;;  %629 = vrot.lane.b32.xlu1 %v6042_v27, %s5703_s13 }
 0x13a   : > { %739 = vrot.lane.b32.xlu0 %v6024_v23, %s5701_s23 }
 0x13b   : > { %v720_v31 = vpop.permute.xlu2 %719 }
 0x13c   : > { %v780_v44 = vrot.slane %v720_v31, 4 }
 0x141   : > { %645 = vrot.lane.b32.xlu2 %v6060_v32, %s5703_s13  ;;  %677 = vrot.lane.b32.xlu1 %v6042_v27, %s5702_s14 }
 0x142   : > { %2615 = vrot.lane.b32.xlu0 %v6051_v29, %s5703_s13 }
 0x143   : > { %v6068_v34 = vpop.permute.xlu2 %2705 }
 0x149   : > { %2631 = vrot.lane.b32.xlu2 %v6071_v35, %s5703_s13  ;;  %2663 = vrot.lane.b32.xlu1 %v6051_v29, %s5702_s14 }
 0x14a   : > { %693 = vrot.lane.b32.xlu0 %v6060_v32, %s5702_s14 }
 0x14b   : > { %v6079_v37 = vpop.permute.xlu2 %639 }
 0x14c   : > { %v1230_v48 = vrot.slane %v6079_v37, 4 }
 0x151   : > { %631 = vrot.lane.b32.xlu2 %v6082_v38, %s5703_s13  ;;  %741 = vrot.lane.b32.xlu1 %v6060_v32, %s5701_s23 }
 0x152   : > { %2679 = vrot.lane.b32.xlu0 %v6071_v35, %s5702_s14 }
 0x153   : > { %v6093_v45 = vpop.permute.xlu2 %2625  ;;  %v672_v46 = vpop.permute.xlu1 %671 }
 0x154   : > { %v767_v50 = vrot.slane %v672_v46, 4  ;;  %v771_v51 = vsel %vm768_vm0, %v672_v46, %v770_v42  ;;  %v624_v52 = vpop.permute.xlu0 %623 }
 0x155   : > { %v779_v56 = vperm.slane %v771_v51, %v6088_v41  ;;  %v781_v59 = vsel %vm768_vm0, %v780_v44, %v624_v52  ;;  %v782_v60 = vrot.slane %v624_v52, 4 }
 0x156   : > { %v769_v63 = vsel %vm768_vm0, %v767_v50, %v5932_v57  ;;  %v787_v1 = vperm.slane %v781_v59, %v6088_v41  ;;  %v3259_v57 = vrot.slane %v5994_v14, 4 }
 0x157   : > { %v775_v6 = vperm.slane %v769_v63, %v6088_v41  ;;  %v806_v7 = vrot.slane %v779_v56, 4  ;;  %v783_v11 = vsel %vm768_vm0, %v720_v31, %v782_v60  ;;  %v2765_v31 = vrot.slane %v6068_v34, 4 }
 0x158   : > { %v791_v12 = vperm.slane %v783_v11, %v6088_v41  ;;  %v792_v13 = vrot.slane %v787_v1, 4 }
 0x159   : > { %v794_v16 = vrot.slane %v775_v6, 4  ;;  %679 = vrot.lane.b32.xlu2 %v6082_v38, %s5702_s14  ;;  %2617 = vrot.lane.b32.xlu1 %v6102_v62, %s5703_s13 }
 0x15a   : > { %v793_v24 = vsel %vm768_vm0, %v792_v13, %v775_v6  ;;  %v804_v26 = vrot.slane %v791_v12, 4  ;;  %v807_v28 = vsel %vm768_vm0, %v791_v12, %v806_v7  ;;  %727 = vrot.lane.b32.xlu0 %v6082_v38, %s5701_s23 }
 0x15b   : > { %v795_v33 = vsel %vm768_vm0, %v787_v1, %v794_v16  ;;  %v799_v36 = vperm.slane %v793_v24, %v6110_v8  ;;  %v815_v39 = vperm.slane %v807_v28, %v6110_v8  ;;  %v674_v40 = vpop.permute.xlu2 %673  ;;  %v2658_v42 = vpop.permute.xlu1 %2657 }
 0x15c   : > { %v803_v43 = vperm.slane %v795_v33, %v6110_v8  ;;  %v805_v44 = vsel %vm768_vm0, %v804_v26, %v779_v56  ;;  %v827_v46 = vsel %vm768_vm0, %v674_v40, %v826_v53  ;;  %v824_v63 = vrot.slane %v674_v40, 4  ;;  %v2610_v11 = vpop.permute.xlu0 %2609 }
 0x15d   : > { %v811_v51 = vperm.slane %v805_v44, %v6110_v8  ;;  %v822_v52 = vrot.slane %v815_v39, 4  ;;  %v816_v59 = vrot.slane %v799_v36, 4  ;;  %v2753_v1 = vrot.slane %v2658_v42, 4 }
 0x15e   : > { %v818_v60 = vrot.slane %v803_v43, 4  ;;  %v6144_v53 = vperm.slane %v827_v46, %v6088_v41  ;;  %v2756_v33 = vsel %vm768_vm0, %v2658_v42, %v2755_v49  ;;  %v825_v46 = vsel %vm768_vm0, %v824_v63, %v5980_v9 }
 0x15f   : > { %v820_v6 = vrot.slane %v811_v51, 4  ;;  %v823_v7 = vsel %vm768_vm0, 0.0, %v822_v52  ;;  %v1675_v56 = vsel %vm768_vm0, %v822_v52, %v811_v51  ;;  %v2754_v43 = vsel %vm768_vm0, %v2753_v1, %v5947_v61 }
 0x160   : > { %v819_v12 = vsel %vm768_vm0, 0.0, %v818_v60  ;;  %v1664_v13 = vsel %vm768_vm0, %v818_v60, %v799_v36  ;;  %v1679_v16 = vperm.slane %v1675_v56, %v6088_v41  ;;  %v1680_v18 = vrot.slane %v823_v7, 4 }
 0x161   : > { %v821_v24 = vsel %vm768_vm0, 0.0, %v820_v6  ;;  %v1668_v26 = vperm.slane %v1664_v13, %v6088_v41  ;;  %v1669_v28 = vrot.slane %v819_v12, 4  ;;  %2665 = vrot.lane.b32.xlu2 %v6102_v62, %s5702_s14  ;;  %695 = vrot.lane.b32.xlu1 %v6136_v47, %s5702_s14  ;;  %v817_v36 = vsel %vm768_vm0, 0.0, %v816_v59 }
 0x162   : > { %v1681_v39 = vsel %vm768_vm0, %v1680_v18, %v821_v24  ;;  %v1700_v40 = vrot.slane %v1679_v16, 4  ;;  %2713 = vrot.lane.b32.xlu0 %v6102_v62, %s5701_s23  ;;  %v2760_v52 = vperm.slane %v2754_v43, %v6088_v41  ;;  %v2764_v59 = vperm.slane %v2756_v33, %v6088_v41 }
 0x163   : > { %v1670_v49 = vsel %vm768_vm0, %v1669_v28, %v817_v36  ;;  %v1685_v42 = vperm.slane %v1681_v39, %v6088_v41  ;;  %v1688_v44 = vrot.slane %v1668_v26, 4  ;;  %v2766_v60 = vsel %vm768_vm0, %v2765_v31, %v2610_v11  ;;  %v2660_v56 = vpop.permute.xlu2 %2659 }
 0x164   : > { %v1674_v51 = vperm.slane %v1670_v49, %v6088_v41  ;;  %v2767_v6 = vrot.slane %v2610_v11, 4  ;;  %v2772_v7 = vperm.slane %v2766_v60, %v6088_v41  ;;  %v2779_v63 = vrot.slane %v2760_v52, 4 }
 0x165   : > { %v1698_v61 = vrot.slane %v1685_v42, 4  ;;  %v1701_v1 = vsel %vm768_vm0, %v1685_v42, %v1700_v40  ;;  %v2791_v28 = vrot.slane %v2764_v59, 4  ;;  %v736_v40 = vpop.permute.xlu1 %735 }
 0x166   : > { %v1686_v12 = vrot.slane %v1674_v51, 4  ;;  %v1689_v13 = vsel %vm768_vm0, %v1674_v51, %v1688_v44  ;;  %v1709_v9 = vperm.slane %v1701_v1, %v6110_v8  ;;  %v2768_v31 = vsel %vm768_vm0, %v6068_v34, %v2767_v6 }
 0x167   : > { %v1697_v18 = vperm.slane %v1689_v13, %v6110_v8  ;;  %v1699_v24 = vsel %vm768_vm0, %v1698_v61, %v1679_v16  ;;  %v2776_v39 = vperm.slane %v2768_v31, %v6088_v41  ;;  %v2777_v42 = vrot.slane %v2772_v7, 4  ;;  %v6186_v16 = vpop.permute.xlu0 %687 }
 0x168   : > { %v1687_v33 = vsel %vm768_vm0, %v1686_v12, %v1668_v26  ;;  %v1705_v11 = vperm.slane %v1699_v24, %v6110_v8  ;;  %v1714_v36 = vrot.slane %v1709_v9, 4  ;;  %v2780_v44 = vsel %vm768_vm0, %v2772_v7, %v2779_v63 }
 0x169   : > { %v1693_v43 = vperm.slane %v1687_v33, %v6110_v8  ;;  %v1716_v49 = vrot.slane %v1697_v18, 4  ;;  %743 = vrot.lane.b32.xlu2 %v6136_v47, %s5701_s23  ;;  %v2788_v51 = vperm.slane %v2780_v44, %v6110_v8  ;;  %v2789_v60 = vrot.slane %v2776_v39, 4 }
 0x16a   : > { %v1710_v34 = vrot.slane %v1705_v11, 4  ;;  %v1715_v26 = vsel %vm768_vm0, %v1714_v36, %v1697_v18  ;;  %647 = vrot.lane.b32.xlu0 %v6136_v47, %s5703_s13  ;;  %v2778_v6 = vsel %vm768_vm0, %v2777_v42, %v2760_v52  ;;  %v2792_v7 = vsel %vm768_vm0, %v2776_v39, %v2791_v28 }
 0x16b   : > { %v1712_v61 = vrot.slane %v1693_v43, 4  ;;  %v1717_v1 = vsel %vm768_vm0, %v1709_v9, %v1716_v49  ;;  %2561 = vst.msk [vmem:[%s6197_s18 + $0x100] sm:$0xff] %vm2528_vm1, %v1715_v26  ;;  %v2784_v13 = vperm.slane %v2778_v6, %v6110_v8  ;;  %v2790_v9 = vsel %vm768_vm0, %v2789_v60, %v2764_v59  ;;  %v6223_v42 = vpop.permute.xlu2 %737 }
 0x16c   : > { %v1711_v12 = vsel %vm768_vm0, %v1710_v34, %v1693_v43  ;;  %2577 = vst.msk [vmem:[%s6197_s18 + $0x180] sm:$0xff] %vm2528_vm1, %v1717_v1  ;;  %v2800_v63 = vperm.slane %v2792_v7, %v6110_v8  ;;  %v2796_v24 = vperm.slane %v2790_v9, %v6110_v8  ;;  %v2803_v31 = vrot.slane %v2788_v51, 4 }
 0x16d   : > { %v1713_v18 = vsel %vm768_vm0, %v1705_v11, %v1712_v61  ;;  %2529 = vst.msk [vmem:[%s6197_s18] sm:$0xff] %vm2528_vm1, %v1711_v12  ;;  %v2809_v52 = vrot.slane %v2660_v56, 4  ;;  %v6216_v28 = vperm.slane %v825_v46, %v6088_v41  ;;  %v2801_v33 = vrot.slane %v2784_v13, 4  ;;  %v6235_v12 = vpop.permute.xlu1 %2611 }
 0x16e   : > { %2545 = vst.msk [vmem:[%s6197_s18 + $0x80] sm:$0xff] %vm2528_vm1, %v1713_v18  ;;  %v2807_v36 = vrot.slane %v2800_v63, 4  ;;  %v2812_v59 = vsel %vm768_vm0, %v2660_v56, %v2811_v2  ;;  %v2804_v39 = vsel %vm768_vm0, 0.0, %v2803_v31  ;;  %v2805_v11 = vrot.slane %v2796_v24, 4 }
 0x16f   : > { %v3649_v43 = vsel %vm768_vm0, %v2803_v31, %v2784_v13  ;;  %v1228_v49 = vrot.slane %v736_v40, 4  ;;  %v3654_v46 = vrot.slane %v2804_v39, 4  ;;  %v2810_v26 = vsel %vm768_vm0, %v2809_v52, %v5967_v4  ;;  %v6244_v18 = vpop.permute.xlu0 %2673 }
 0x170   : > { %v2808_v44 = vsel %vm768_vm0, 0.0, %v2807_v36  ;;  %v3653_v34 = vperm.slane %v3649_v43, %v6088_v41  ;;  %v2802_v51 = vsel %vm768_vm0, 0.0, %v2801_v33  ;;  %v2806_v2 = vsel %vm768_vm0, 0.0, %v2805_v11 }
 0x171   : > { %v3660_v56 = vsel %vm768_vm0, %v2807_v36, %v2796_v24  ;;  %v3665_v60 = vrot.slane %v2808_v44, 4  ;;  %v862_v61 = vrot.slane %v6144_v53, 4  ;;  %v3655_v1 = vsel %vm768_vm0, %v3654_v46, %v2802_v51 }
 0x172   : > { %v3664_v6 = vperm.slane %v3660_v56, %v6088_v41  ;;  %v3673_v7 = vrot.slane %v3653_v34, 4  ;;  %v3659_v13 = vperm.slane %v3655_v1, %v6088_v41  ;;  %v6240_v9 = vperm.slane %v2810_v26, %v6088_v41 }
 0x173   : > { %v3666_v4 = vsel %vm768_vm0, %v3665_v60, %v2806_v2  ;;  %v1229_v63 = vsel %vm768_vm0, %v1228_v49, %v6079_v37  ;;  %v6248_v52 = vperm.slane %v2812_v59, %v6088_v41  ;;  %v1231_v33 = vsel %vm768_vm0, %v736_v40, %v1230_v48  ;;  %v595_v40 = vpop.f32.mrf.mxu3 }
 0x174   : > { %v3670_v24 = vperm.slane %v3666_v4, %v6088_v41  ;;  %v3685_v31 = vrot.slane %v3664_v6, 4  ;;  %v3671_v36 = vrot.slane %v3659_v13, 4  ;;  %v3674_v39 = vsel %vm768_vm0, %v3659_v13, %v3673_v7 }
 0x175   : > { %v1235_v11 = vperm.slane %v1229_v63, %v6088_v41  ;;  %v1239_v43 = vperm.slane %v1231_v33, %v6088_v41  ;;  %v3682_v49 = vperm.slane %v3674_v39, %v6110_v8  ;;  %v1216_v26 = vrot.slane %v6186_v16, 4  ;;  %v6271_v63 = vpop.permute.xlu2 %2613 }
 0x176   : > { %v3683_v44 = vrot.slane %v3670_v24, 4  ;;  %v3686_v46 = vsel %vm768_vm0, %v3670_v24, %v3685_v31  ;;  %v3672_v59 = vsel %vm768_vm0, %v3671_v36, %v3653_v34  ;;  %v1219_v34 = vsel %vm768_vm0, %v6186_v16, %v1218_v54 }
 0x177   : > { %v3694_v37 = vperm.slane %v3686_v46, %v6110_v8  ;;  %v1240_v51 = vrot.slane %v1235_v11, 4  ;;  %v1252_v48 = vrot.slane %v1239_v43, 4  ;;  %v3678_v2 = vperm.slane %v3672_v59, %v6110_v8 }
 0x178   : > { %v3684_v56 = vsel %vm768_vm0, %v3683_v44, %v3664_v6  ;;  %v3701_v60 = vrot.slane %v3682_v49, 4  ;;  %v1217_v1 = vsel %vm768_vm0, %v1216_v26, %v5957_v0  ;;  %v1227_v6 = vperm.slane %v1219_v34, %v6088_v41  ;;  %v690_v26 = vpop.permute.xlu1 %689 }
 0x179   : > { %v3690_v7 = vperm.slane %v3684_v56, %v6110_v8  ;;  %v3699_v13 = vrot.slane %v3694_v37, 4  ;;  %v1223_v4 = vperm.slane %v1217_v1, %v6088_v41  ;;  %v3697_v24 = vrot.slane %v3678_v2, 4  ;;  %v489_v56 = vpop.f32.mrf.mxu0 }
 0x17a   : > { %v3702_v31 = vsel %vm768_vm0, %v3694_v37, %v3701_v60  ;;  %v6276_v33 = vadd.f32 %v5941_v58, %v595_v40  ;;  %v1254_v46 = vrot.slane %v1227_v6, 4  ;;  %v850_v59 = vrot.slane %v6216_v28, 4 }
 0x17b   : > { %v3695_v36 = vrot.slane %v3690_v7, 4  ;;  %v3700_v39 = vsel %vm768_vm0, %v3699_v13, %v3682_v49  ;;  %4561 = vst.msk [vmem:[%s6281_s24 + $0x180] sm:$0xff] %vm2528_vm1, %v3702_v31  ;;  %v1241_v0 = vsel %vm768_vm0, %v1240_v51, %v1223_v4  ;;  %v1242_v54 = vrot.slane %v1223_v4, 4 }
 0x17c   : > { %v3698_v16 = vsel %vm768_vm0, %v3690_v7, %v3697_v24  ;;  %4545 = vst.msk [vmem:[%s6281_s24 + $0x100] sm:$0xff] %vm2528_vm1, %v3700_v39  ;;  %v1247_v44 = vperm.slane %v1241_v0, %v6110_v8  ;;  %v1253_v49 = vsel %vm768_vm0, %v1252_v48, %v1227_v6  ;;  %2681 = vrot.lane.b32.xlu1 %v6276_v33, %s5702_s14  ;;  %v6301_v48 = vpop.permute.xlu0 %625  ;;  %v2835_v60 = vrot.slane %v6240_v9, 4 }
 0x17d   : > { %v3696_v37 = vsel %vm768_vm0, %v3695_v36, %v3678_v2  ;;  %4529 = vst.msk [vmem:[%s6281_s24 + $0x80] sm:$0xff] %vm2528_vm1, %v3698_v16  ;;  %v1243_v51 = vsel %vm768_vm0, %v1235_v11, %v1242_v54  ;;  %v1259_v40 = vperm.slane %v1253_v49, %v6110_v8  ;;  %2633 = vrot.lane.b32.xlu0 %v6276_v33, %s5703_s13  ;;  %v2847_v13 = vrot.slane %v6248_v52, 4 }
 0x17e   : > { %4513 = vst.msk [vmem:[%s6281_s24] sm:$0xff] %vm2528_vm1, %v3696_v37  ;;  %v1251_v1 = vperm.slane %v1243_v51, %v6110_v8  ;;  %v1255_v2 = vsel %vm768_vm0, %v1239_v43, %v1254_v46  ;;  %v1264_v7 = vrot.slane %v1247_v44, 4  ;;  %v3201_v34 = vrot.slane %v6244_v18, 4 }
 0x17f   : > { %v1263_v11 = vperm.slane %v1255_v2, %v6110_v8  ;;  %v3204_v4 = vsel %vm768_vm0, %v6244_v18, %v3203_v3  ;;  %v1268_v31 = vrot.slane %v1259_v40, 4  ;;  %v1284_v6 = vrot.slane %v6223_v42, 4 }
 0x180   : > { %v1266_v24 = vrot.slane %v1251_v1, 4  ;;  %v6317_v36 = vadd.f32 %v5929_v55, %v489_v56  ;;  %v1265_v43 = vsel %vm768_vm0, 0.0, %v1264_v7  ;;  %v2823_v0 = vrot.slane %v6235_v12, 4  ;;  %v692_v1 = vpop.permute.xlu2 %691 }
 0x181   : > { %v1270_v39 = vrot.slane %v1263_v11, 4  ;;  %v3202_v54 = vsel %vm768_vm0, %v3201_v34, %v5970_v5  ;;  %v6329_v18 = vperm.slane %v3204_v4, %v6088_v41  ;;  %v1269_v2 = vsel %vm768_vm0, 0.0, %v1268_v31  ;;  %v574_v34 = vpop.f32.mrf.mxu1 }
 0x182   : > { %v1267_v16 = vsel %vm768_vm0, 0.0, %v1266_v24  ;;  %v2096_v49 = vsel %vm768_vm0, %v1266_v24, %v1247_v44  ;;  %v6326_v3 = vperm.slane %v3202_v54, %v6088_v41  ;;  %633 = vrot.lane.b32.xlu2 %v6317_v36, %s5703_s13  ;;  %v1272_v11 = vrot.slane %v690_v26, 4 }
 0x183   : > { %v1271_v46 = vsel %vm768_vm0, 0.0, %v1270_v39  ;;  %v2100_v37 = vperm.slane %v2096_v49, %v6088_v41  ;;  %v2101_v51 = vrot.slane %v1267_v16, 4  ;;  %v2107_v56 = vsel %vm768_vm0, %v1270_v39, %v1259_v40 }
 0x184   : > { %v2111_v44 = vperm.slane %v2107_v56, %v6088_v41  ;;  %v2112_v7 = vrot.slane %v1271_v46, 4  ;;  %729 = vrot.lane.b32.xlu1 %v6317_v36, %s5701_s23  ;;  %v2879_v54 = vrot.slane %v6271_v63, 4  ;;  %v1275_v40 = vsel %vm768_vm0, %v690_v26, %v1274_v15  ;;  %v2676_v46 = vpop.permute.xlu1 %2675  ;;  %v722_v26 = vpop.permute.xlu0 %721 }
 0x185   : > { %v2102_v4 = vsel %vm768_vm0, %v2101_v51, %v1265_v43  ;;  %v2120_v24 = vrot.slane %v2100_v37, 4  ;;  %681 = vrot.lane.b32.xlu0 %v6317_v36, %s5702_s14  ;;  %v1273_v49 = vsel %vm768_vm0, %v1272_v11, %v5983_v10  ;;  %v6355_v15 = vadd.f32 %v5941_v58, %v574_v34 }
 0x186   : > { %v2106_v31 = vperm.slane %v2102_v4, %v6088_v41  ;;  %v2113_v39 = vsel %vm768_vm0, %v2112_v7, %v1269_v2  ;;  %v2132_v16 = vrot.slane %v2111_v44, 4  ;;  %v6359_v2 = vperm.slane %v1273_v49, %v6088_v41 }
 0x187   : > { %v2117_v43 = vperm.slane %v2113_v39, %v6088_v41  ;;  %v1328_v7 = vrot.slane %v692_v1, 4  ;;  %v6364_v51 = vperm.slane %v1275_v40, %v6088_v41  ;;  %v836_v21 = vrot.slane %v722_v26, 4 }
 0x188   : > { %v2118_v50 = vrot.slane %v2106_v31, 4  ;;  %v2121_v4 = vsel %vm768_vm0, %v2106_v31, %v2120_v24  ;;  %v1331_v31 = vsel %vm768_vm0, %v692_v1, %v1330_v19 }
 0x189   : > { %v2129_v10 = vperm.slane %v2121_v4, %v6110_v8  ;;  %v2130_v11 = vrot.slane %v2117_v43, 4  ;;  %v2133_v39 = vsel %vm768_vm0, %v2117_v43, %v2132_v16  ;;  %v1329_v24 = vsel %vm768_vm0, %v1328_v7, %v6024_v23 }
 0x18a   : > { %v2119_v56 = vsel %vm768_vm0, %v2118_v50, %v2100_v37  ;;  %v2141_v34 = vperm.slane %v2133_v39, %v6110_v8  ;;  %2619 = vrot.lane.b32.xlu2 %v6355_v15, %s5703_s13  ;;  %v838_v50 = vrot.slane %v6301_v48, 4  ;;  %v1298_v4 = vrot.slane %v6359_v2, 4 }
 0x18b   : > { %v2125_v49 = vperm.slane %v2119_v56, %v6110_v8  ;;  %v2131_v16 = vsel %vm768_vm0, %v2130_v11, %v2111_v44  ;;  %v2148_v40 = vrot.slane %v2129_v10, 4  ;;  %v3257_v23 = vrot.slane %v2676_v46, 4  ;;  %v513_v56 = vpop.f32.mrf.mxu2  ;;  %v2678_v11 = vpop.permute.xlu2 %2677 }
 0x18c   : > { %v2137_v37 = vperm.slane %v2131_v16, %v6110_v8  ;;  %v2146_v43 = vrot.slane %v2141_v34, 4  ;;  %2715 = vrot.lane.b32.xlu1 %v6355_v15, %s5701_s23  ;;  %v6384_v1 = vperm.slane %v1329_v24, %v6088_v41  ;;  %v6387_v44 = vperm.slane %v1331_v31, %v6088_v41 }
 0x18d   : > { %v2144_v7 = vrot.slane %v2125_v49, 4  ;;  %v2149_v19 = vsel %vm768_vm0, %v2141_v34, %v2148_v40  ;;  %2667 = vrot.lane.b32.xlu0 %v6355_v15, %s5702_s14  ;;  %v1310_v34 = vrot.slane %v6364_v51, 4  ;;  %v3258_v24 = vsel %vm768_vm0, %v3257_v23, %v5994_v14 }
 0x18e   : > { %v2142_v39 = vrot.slane %v2137_v37, 4  ;;  %v2147_v16 = vsel %vm768_vm0, %v2146_v43, %v2129_v10  ;;  %2585 = vst.msk [vmem:[%s6197_s18 + $0x1c0] sm:$0xff] %vm2528_vm1, %v2149_v19  ;;  %v3260_v31 = vsel %vm768_vm0, %v2676_v46, %v3259_v57  ;;  %v6404_v22 = vperm.slane %v3258_v24, %v6088_v41 }
 0x18f   : > { %v2145_v40 = vsel %vm768_vm0, %v2137_v37, %v2144_v7  ;;  %2569 = vst.msk [vmem:[%s6197_s18 + $0x140] sm:$0xff] %vm2528_vm1, %v2147_v16  ;;  %v839_v43 = vsel %vm768_vm0, %v722_v26, %v838_v50  ;;  %v6411_v23 = vadd.f32 %v5929_v55, %v513_v56  ;;  %v3313_v37 = vrot.slane %v2678_v11, 4  ;;  %v6413_v7 = vpop.permute.xlu1 %627 }
 0x190   : > { %v2143_v10 = vsel %vm768_vm0, %v2142_v39, %v2125_v49  ;;  %2553 = vst.msk [vmem:[%s6197_s18 + $0xc0] sm:$0xff] %vm2528_vm1, %v2145_v40  ;;  %v837_v19 = vsel %vm768_vm0, %v836_v21, %v6301_v48  ;;  %v847_v49 = vperm.slane %v839_v43, %v6088_v41  ;;  %v2708_v39 = vpop.permute.xlu0 %2707  ;;  %v6423_v26 = vperm.slane %v3260_v31, %v6088_v41 }
 0x191   : > { %2537 = vst.msk [vmem:[%s6197_s18 + $0x40] sm:$0xff] %vm2528_vm1, %v2143_v10  ;;  %v843_v55 = vperm.slane %v837_v19, %v6088_v41  ;;  %v3314_v50 = vsel %vm768_vm0, %v3313_v37, %v6033_v25  ;;  %v3316_v56 = vsel %vm768_vm0, %v2678_v11, %v3315_v30  ;;  %v894_v24 = vrot.slane %v6413_v7, 4 }
 0x192   : > { %697 = vrot.lane.b32.xlu2 %v6411_v23, %s5702_s14  ;;  %v860_v48 = vrot.slane %v847_v49, 4  ;;  %v863_v16 = vsel %vm768_vm0, %v847_v49, %v862_v61  ;;  %v2821_v30 = vrot.slane %v2708_v39, 4  ;;  %v6448_v61 = vperm.slane %v3314_v50, %v6088_v41 }
 0x193   : > { %v848_v40 = vrot.slane %v843_v55, 4  ;;  %v851_v31 = vsel %vm768_vm0, %v843_v55, %v850_v59  ;;  %v871_v10 = vperm.slane %v863_v16, %v6110_v8  ;;  %v6451_v37 = vperm.slane %v3316_v56, %v6088_v41 }
 0x194   : > { %649 = vrot.lane.b32.xlu1 %v6411_v23, %s5703_s13  ;;  %v859_v11 = vperm.slane %v851_v31, %v6110_v8  ;;  %v861_v43 = vsel %vm768_vm0, %v860_v48, %v6144_v53  ;;  %8634 = vst [vmem:[#allocation20_spill] sm:$0xff] %v6448_v61  ;;  %v2822_v55 = vsel %vm768_vm0, %v2821_v30, %v6235_v12 }
 0x195   : > { %745 = vrot.lane.b32.xlu0 %v6411_v23, %s5701_s23  ;;  %v849_v59 = vsel %vm768_vm0, %v848_v40, %v6216_v28  ;;  %v867_v19 = vperm.slane %v861_v43, %v6110_v8  ;;  %v878_v49 = vrot.slane %v871_v10, 4  ;;  %v2824_v50 = vsel %vm768_vm0, %v2708_v39, %v2823_v0 }
 0x196   : > { %v855_v53 = vperm.slane %v849_v59, %v6110_v8  ;;  %v874_v48 = vrot.slane %v859_v11, 4  ;;  %v2828_v56 = vperm.slane %v2822_v55, %v6088_v41  ;;  %v2832_v40 = vperm.slane %v2824_v50, %v6088_v41 }
 0x197   : > { %v876_v16 = vrot.slane %v867_v19, 4  ;;  %v879_v31 = vsel %vm768_vm0, 0.0, %v878_v49  ;;  %v1729_v28 = vsel %vm768_vm0, %v878_v49, %v867_v19  ;;  %v598_v49 = vpop.f32.mrf.mxu3 }
 0x198   : > { %v872_v10 = vrot.slane %v855_v53, 4  ;;  %v875_v43 = vsel %vm768_vm0, 0.0, %v874_v48  ;;  %v1718_v30 = vsel %vm768_vm0, %v874_v48, %v855_v53  ;;  %v1733_v11 = vperm.slane %v1729_v28, %v6088_v41 }
 0x199   : > { %v877_v12 = vsel %vm768_vm0, 0.0, %v876_v16  ;;  %v1722_v0 = vperm.slane %v1718_v30, %v6088_v41  ;;  %v1723_v39 = vrot.slane %v875_v43, 4  ;;  %v1734_v59 = vrot.slane %v879_v31, 4 }
 0x19a   : > { %v873_v55 = vsel %vm768_vm0, 0.0, %v872_v10  ;;  %v1754_v21 = vrot.slane %v1733_v11, 4  ;;  %v2833_v46 = vrot.slane %v2828_v56, 4  ;;  %v2836_v19 = vsel %vm768_vm0, %v2828_v56, %v2835_v60 }
 0x19b   : > { %v1724_v50 = vsel %vm768_vm0, %v1723_v39, %v873_v55  ;;  %v1735_v53 = vsel %vm768_vm0, %v1734_v59, %v877_v12  ;;  %v1742_v48 = vrot.slane %v1722_v0, 4  ;;  %v2844_v16 = vperm.slane %v2836_v19, %v6110_v8 }
 0x19c   : > { %v1728_v28 = vperm.slane %v1724_v50, %v6088_v41  ;;  %v1739_v31 = vperm.slane %v1735_v53, %v6088_v41  ;;  %v2834_v10 = vsel %vm768_vm0, %v2833_v46, %v6240_v9  ;;  %v2845_v43 = vrot.slane %v2832_v40, 4 }
 0x19d   : > { %v2840_v30 = vperm.slane %v2834_v10, %v6110_v8  ;;  %v2848_v60 = vsel %vm768_vm0, %v2832_v40, %v2847_v13  ;;  %v2859_v56 = vrot.slane %v2844_v16, 4  ;;  %v6489_v12 = vadd.f32 %v5941_v58, %v598_v49 }
 0x19e   : > { %v1740_v39 = vrot.slane %v1728_v28, 4  ;;  %v1743_v59 = vsel %vm768_vm0, %v1728_v28, %v1742_v48  ;;  %v1752_v55 = vrot.slane %v1739_v31, 4  ;;  %v1755_v19 = vsel %vm768_vm0, %v1739_v31, %v1754_v21 }
 0x19f   : > { %v1751_v50 = vperm.slane %v1743_v59, %v6110_v8  ;;  %v1763_v9 = vperm.slane %v1755_v19, %v6110_v8  ;;  %v2846_v46 = vsel %vm768_vm0, %v2845_v43, %v6248_v52  ;;  %v2856_v53 = vperm.slane %v2848_v60, %v6110_v8  ;;  %2683 = vrot.lane.b32.xlu2 %v6489_v12, %s5702_s14  ;;  %v642_v59 = vpop.permute.xlu0 %641 }
 0x1a0   : > { %v1741_v58 = vsel %vm768_vm0, %v1740_v39, %v1722_v0  ;;  %v1753_v13 = vsel %vm768_vm0, %v1752_v55, %v1733_v11  ;;  %v2852_v40 = vperm.slane %v2846_v46, %v6110_v8  ;;  %v2857_v21 = vrot.slane %v2840_v30, 4  ;;  %2635 = vrot.lane.b32.xlu1 %v6489_v12, %s5703_s13 }
 0x1a1   : > { %v1747_v49 = vperm.slane %v1741_v58, %v6110_v8  ;;  %v1759_v52 = vperm.slane %v1753_v13, %v6110_v8  ;;  %v1768_v48 = vrot.slane %v1763_v9, 4  ;;  %v1770_v16 = vrot.slane %v1751_v50, 4  ;;  %v724_v13 = vpop.permute.xlu1 %723 }
 0x1a2   : > { %v2858_v28 = vsel %vm768_vm0, 0.0, %v2857_v21  ;;  %v2860_v31 = vsel %vm768_vm0, 0.0, %v2859_v56  ;;  %v2861_v0 = vrot.slane %v2852_v40, 4  ;;  %v2863_v11 = vrot.slane %v2856_v53, 4 }
 0x1a3   : > { %v1764_v10 = vrot.slane %v1759_v52, 4  ;;  %v1766_v43 = vrot.slane %v1747_v49, 4  ;;  %v1769_v60 = vsel %vm768_vm0, %v1768_v48, %v1751_v50  ;;  %v1771_v39 = vsel %vm768_vm0, %v1763_v9, %v1770_v16 }
 0x1a4   : > { %2562 = vst.msk [vmem:[%s6197_s18 + $0x108] sm:$0xff] %vm2528_vm1, %v1769_v60  ;;  %v2862_v55 = vsel %vm768_vm0, 0.0, %v2861_v0  ;;  %v2864_v19 = vsel %vm768_vm0, 0.0, %v2863_v11  ;;  %v3703_v46 = vsel %vm768_vm0, %v2859_v56, %v2840_v30  ;;  %v3708_v58 = vrot.slane %v2860_v31, 4 }
 0x1a5   : > { %v1765_v53 = vsel %vm768_vm0, %v1764_v10, %v1747_v49  ;;  %v1767_v21 = vsel %vm768_vm0, %v1759_v52, %v1766_v43  ;;  %2578 = vst.msk [vmem:[%s6197_s18 + $0x188] sm:$0xff] %vm2528_vm1, %v1771_v39  ;;  %v3707_v50 = vperm.slane %v3703_v46, %v6088_v41  ;;  %v3714_v9 = vsel %vm768_vm0, %v2863_v11, %v2852_v40  ;;  %v6541_v46 = vpop.permute.xlu2 %725 }
 0x1a6   : > { %2530 = vst.msk [vmem:[%s6197_s18 + $0x8] sm:$0xff] %vm2528_vm1, %v1765_v53  ;;  %v3709_v16 = vsel %vm768_vm0, %v3708_v58, %v2858_v28  ;;  %v3718_v30 = vperm.slane %v3714_v9, %v6088_v41  ;;  %v3719_v56 = vrot.slane %v2864_v19, 4  ;;  %v895_v40 = vsel %vm768_vm0, %v724_v13, %v894_v24 }
 0x1a7   : > { %2546 = vst.msk [vmem:[%s6197_s18 + $0x88] sm:$0xff] %vm2528_vm1, %v1767_v21  ;;  %v3713_v52 = vperm.slane %v3709_v16, %v6088_v41  ;;  %v3727_v31 = vrot.slane %v3707_v50, 4  ;;  %v892_v10 = vrot.slane %v724_v13, 4  ;;  %v1285_v28 = vsel %vm768_vm0, %v1284_v6, %v642_v59 }
 0x1a8   : > { %v3720_v0 = vsel %vm768_vm0, %v3719_v56, %v2862_v55  ;;  %v3739_v11 = vrot.slane %v3718_v30, 4  ;;  %v6546_v55 = vperm.slane %v895_v40, %v6088_v41  ;;  %v1286_v13 = vrot.slane %v642_v59, 4 }
 0x1a9   : > { %v3724_v60 = vperm.slane %v3720_v0, %v6088_v41  ;;  %v3725_v39 = vrot.slane %v3713_v52, 4  ;;  %v3728_v19 = vsel %vm768_vm0, %v3713_v52, %v3727_v31  ;;  %v1291_v9 = vperm.slane %v1285_v28, %v6088_v41  ;;  %v492_v0 = vpop.f32.mrf.mxu0  ;;  %v6561_v28 = vpop.permute.xlu0 %2627 }
 0x1aa   : > { %v3736_v58 = vperm.slane %v3728_v19, %v6110_v8  ;;  %v893_v31 = vsel %vm768_vm0, %v892_v10, %v6413_v7  ;;  %v1287_v59 = vsel %vm768_vm0, %v6223_v42, %v1286_v13 }
 0x1ab   : > { %v3726_v53 = vsel %vm768_vm0, %v3725_v39, %v3707_v50  ;;  %v3737_v6 = vrot.slane %v3724_v60, 4  ;;  %v3740_v21 = vsel %vm768_vm0, %v3724_v60, %v3739_v11  ;;  %v1296_v50 = vrot.slane %v1291_v9, 4 }
 0x1ac   : > { %v3732_v16 = vperm.slane %v3726_v53, %v6110_v8  ;;  %v3748_v56 = vperm.slane %v3740_v21, %v6110_v8  ;;  %v3755_v52 = vrot.slane %v3736_v58, 4  ;;  %v1299_v11 = vsel %vm768_vm0, %v1291_v9, %v1298_v4  ;;  %v6574_v4 = vld [vmem:[%s8601_s3] ss:$0 sm:$0xff]  ;;  %v2710_v53 = vpop.permute.xlu1 %2709 }
 0x1ad   : > { %v3738_v40 = vsel %vm768_vm0, %v3737_v6, %v3718_v30  ;;  %v1295_v30 = vperm.slane %v1287_v59, %v6088_v41  ;;  %v1297_v42 = vsel %vm768_vm0, %v1296_v50, %v6359_v2  ;;  %v1307_v10 = vperm.slane %v1299_v11, %v6110_v8 }
 0x1ae   : > { %v3744_v60 = vperm.slane %v3738_v40, %v6110_v8  ;;  %v3751_v39 = vrot.slane %v3732_v16, 4  ;;  %v3753_v19 = vrot.slane %v3748_v56, 4  ;;  %v3756_v7 = vsel %vm768_vm0, %v3748_v56, %v3755_v52 }
 0x1af   : > { %4562 = vst.msk [vmem:[%s6281_s24 + $0x188] sm:$0xff] %vm2528_vm1, %v3756_v7  ;;  %v6577_v13 = vadd.f32 %v6574_v4, %v492_v0  ;;  %v1303_v2 = vperm.slane %v1297_v42, %v6110_v8  ;;  %v6585_v56 = vperm.slane %v893_v31, %v6088_v41  ;;  %v1308_v52 = vrot.slane %v1295_v30, 4 }
 0x1b0   : > { %v3749_v6 = vrot.slane %v3744_v60, 4  ;;  %v3752_v21 = vsel %vm768_vm0, %v3744_v60, %v3751_v39  ;;  %v3754_v9 = vsel %vm768_vm0, %v3753_v19, %v3736_v58  ;;  %v1311_v0 = vsel %vm768_vm0, %v1295_v30, %v1310_v34 }
 0x1b1   : > { %4530 = vst.msk [vmem:[%s6281_s24 + $0x88] sm:$0xff] %vm2528_vm1, %v3752_v21  ;;  %v1322_v40 = vrot.slane %v1307_v10, 4  ;;  %731 = vrot.lane.b32.xlu2 %v6577_v13, %s5701_s23  ;;  %683 = vrot.lane.b32.xlu1 %v6577_v13, %s5702_s14  ;;  %v1319_v59 = vperm.slane %v1311_v0, %v6110_v8  ;;  %v1320_v31 = vrot.slane %v1303_v2, 4  ;;  %v2877_v50 = vrot.slane %v2710_v53, 4  ;;  %v577_v21 = vpop.f32.mrf.mxu1 }
 0x1b2   : > { %v3750_v58 = vsel %vm768_vm0, %v3749_v6, %v3732_v16  ;;  %4546 = vst.msk [vmem:[%s6281_s24 + $0x108] sm:$0xff] %vm2528_vm1, %v3754_v9  ;;  %635 = vrot.lane.b32.xlu0 %v6577_v13, %s5703_s13  ;;  %v1309_v34 = vsel %vm768_vm0, %v1308_v52, %v6364_v51  ;;  %v2880_v16 = vsel %vm768_vm0, %v2710_v53, %v2879_v54  ;;  %v916_v42 = vrot.slane %v6546_v55, 4  ;;  %v6620_v52 = vpop.permute.xlu2 %2711 }
 0x1b3   : > { %4514 = vst.msk [vmem:[%s6281_s24 + $0x8] sm:$0xff] %vm2528_vm1, %v3750_v58  ;;  %v1323_v11 = vsel %vm768_vm0, 0.0, %v1322_v40  ;;  %v2150_v60 = vsel %vm768_vm0, %v1322_v40, %v1303_v2  ;;  %v1315_v39 = vperm.slane %v1309_v34, %v6110_v8  ;;  %v1321_v19 = vsel %vm768_vm0, 0.0, %v1320_v31 }
 0x1b4   : > { %v1326_v7 = vrot.slane %v1319_v59, 4  ;;  %v2154_v30 = vperm.slane %v2150_v60, %v6088_v41  ;;  %v2155_v10 = vrot.slane %v1323_v11, 4  ;;  %v2878_v51 = vsel %vm768_vm0, %v2877_v50, %v6271_v63  ;;  %v676_v63 = vpop.permute.xlu0 %675  ;;  %v6631_v11 = vld [vmem:[%s8603_s5] ss:$0 sm:$0xff]  ;;  %v6662_v34 = vpop.permute.xlu1 %643 }
 0x1b5   : > { %v6616_v6 = vperm.slane %v2880_v16, %v6088_v41  ;;  %v1324_v9 = vrot.slane %v1315_v39, 4  ;;  %v904_v0 = vrot.slane %v6585_v56, 4  ;;  %v6634_v60 = vadd.f32 %v6631_v11, %v577_v21  ;;  %v516_v16 = vpop.f32.mrf.mxu2 }
 0x1b6   : > { %v1327_v54 = vsel %vm768_vm0, 0.0, %v1326_v7  ;;  %v2161_v53 = vsel %vm768_vm0, %v1326_v7, %v1315_v39  ;;  %v2174_v2 = vrot.slane %v2154_v30, 4  ;;  %v2156_v40 = vsel %vm768_vm0, %v2155_v10, %v1321_v19 }
 0x1b7   : > { %v2165_v58 = vperm.slane %v2161_v53, %v6088_v41  ;;  %v2166_v59 = vrot.slane %v1327_v54, 4  ;;  %v1325_v31 = vsel %vm768_vm0, 0.0, %v1324_v9  ;;  %v2160_v50 = vperm.slane %v2156_v40, %v6088_v41 }
 0x1b8   : > { %v6638_v7 = vperm.slane %v2878_v51, %v6088_v41  ;;  %v2901_v40 = vrot.slane %v6616_v6, 4  ;;  %v880_v51 = vrot.slane %v676_v63, 4 }
 0x1b9   : > { %v2167_v39 = vsel %vm768_vm0, %v2166_v59, %v1325_v31  ;;  %v2186_v19 = vrot.slane %v2165_v58, 4  ;;  %v2172_v54 = vrot.slane %v2160_v50, 4  ;;  %v2175_v53 = vsel %vm768_vm0, %v2160_v50, %v2174_v2  ;;  %2717 = vrot.lane.b32.xlu2 %v6634_v60, %s5701_s23  ;;  %2669 = vrot.lane.b32.xlu1 %v6634_v60, %s5702_s14 }
 0x1ba   : > { %v2171_v9 = vperm.slane %v2167_v39, %v6088_v41  ;;  %v2183_v21 = vperm.slane %v2175_v53, %v6110_v8  ;;  %2621 = vrot.lane.b32.xlu0 %v6634_v60, %s5703_s13  ;;  %v8635_v59 = vrot.slane %v6004_v17, 4  ;;  %v6655_v2 = vadd.f32 %v6574_v4, %v516_v16 }
 0x1bb   : > { %v2173_v50 = vsel %vm768_vm0, %v2172_v54, %v2154_v30 }
 0x1bc   : > { %v883_v31 = vsel %vm768_vm0, %v676_v63, %v8635_v59  ;;  %v2184_v39 = vrot.slane %v2171_v9, 4  ;;  %v2187_v49 = vsel %vm768_vm0, %v2171_v9, %v2186_v19  ;;  %v2179_v53 = vperm.slane %v2173_v50, %v6110_v8  ;;  %v6673_v50 = vpop.permute.xlu2 %645 }
 0x1bd   : > { %v891_v43 = vperm.slane %v883_v31, %v6088_v41  ;;  %v2195_v48 = vperm.slane %v2187_v49, %v6110_v8  ;;  %v2202_v10 = vrot.slane %v2183_v21, 4  ;;  %v881_v63 = vsel %vm768_vm0, %v880_v51, %v6004_v17 }
 0x1be   : > { %v2185_v16 = vsel %vm768_vm0, %v2184_v39, %v2165_v58  ;;  %v887_v30 = vperm.slane %v881_v63, %v6088_v41  ;;  %v2198_v9 = vrot.slane %v2179_v53, 4 }
 0x1bf   : > { %v917_v54 = vsel %vm768_vm0, %v916_v42, %v891_v43  ;;  %v918_v59 = vrot.slane %v891_v43, 4  ;;  %v2191_v19 = vperm.slane %v2185_v16, %v6110_v8  ;;  %v2200_v31 = vrot.slane %v2195_v48, 4 }
 0x1c0   : > { %v2203_v49 = vsel %vm768_vm0, %v2195_v48, %v2202_v10  ;;  %v905_v17 = vsel %vm768_vm0, %v904_v0, %v887_v30  ;;  %v906_v51 = vrot.slane %v887_v30, 4  ;;  %v923_v43 = vperm.slane %v917_v54, %v6110_v8  ;;  %v2662_v10 = vpop.permute.xlu0 %2661 }
 0x1c1   : > { %2586 = vst.msk [vmem:[%s6197_s18 + $0x1c8] sm:$0xff] %vm2528_vm1, %v2203_v49  ;;  %v919_v58 = vsel %vm768_vm0, %v6546_v55, %v918_v59  ;;  %v2196_v42 = vrot.slane %v2191_v19, 4  ;;  %v2199_v39 = vsel %vm768_vm0, %v2191_v19, %v2198_v9  ;;  %v2201_v63 = vsel %vm768_vm0, %v2200_v31, %v2183_v21  ;;  %651 = vrot.lane.b32.xlu2 %v6655_v2, %s5703_s13  ;;  %v495_v21 = vpop.f32.mrf.mxu0 }
 0x1c2   : > { %v911_v48 = vperm.slane %v905_v17, %v6110_v8  ;;  %2554 = vst.msk [vmem:[%s6197_s18 + $0xc8] sm:$0xff] %vm2528_vm1, %v2199_v39  ;;  %v2889_v0 = vrot.slane %v6638_v7, 4  ;;  %v907_v16 = vsel %vm768_vm0, %v6585_v56, %v906_v51  ;;  %v927_v55 = vperm.slane %v919_v58, %v6110_v8  ;;  %747 = vrot.lane.b32.xlu1 %v6655_v2, %s5701_s23  ;;  %v601_v56 = vpop.f32.mrf.mxu3 }
 0x1c3   : > { %v932_v30 = vrot.slane %v923_v43, 4  ;;  %v2197_v54 = vsel %vm768_vm0, %v2196_v42, %v2179_v53  ;;  %2570 = vst.msk [vmem:[%s6197_s18 + $0x148] sm:$0xff] %vm2528_vm1, %v2201_v63  ;;  %v915_v19 = vperm.slane %v907_v16, %v6110_v8  ;;  %699 = vrot.lane.b32.xlu0 %v6655_v2, %s5702_s14  ;;  %v2865_v17 = vrot.slane %v2662_v10, 4 }
 0x1c4   : > { %v928_v9 = vrot.slane %v911_v48, 4  ;;  %2538 = vst.msk [vmem:[%s6197_s18 + $0x48] sm:$0xff] %vm2528_vm1, %v2197_v54  ;;  %v934_v49 = vrot.slane %v927_v55, 4  ;;  %v8636_v51 = vrot.slane %v6014_v20, 4  ;;  %v6708_v63 = vadd.f32 %v6574_v4, %v495_v21  ;;  %v6731_v57 = vpop.permute.xlu2 %2631 }
 0x1c5   : > { %v933_v31 = vsel %vm768_vm0, 0.0, %v932_v30  ;;  %v930_v42 = vrot.slane %v915_v19, 4  ;;  %v2866_v55 = vsel %vm768_vm0, %v2865_v17, %v6014_v20  ;;  %v6715_v30 = vadd.f32 %v6631_v11, %v601_v56 }
 0x1c6   : > { %v2868_v53 = vsel %vm768_vm0, %v2662_v10, %v8636_v51  ;;  %v929_v58 = vsel %vm768_vm0, 0.0, %v928_v9  ;;  %v935_v16 = vsel %vm768_vm0, 0.0, %v934_v49  ;;  %v1783_v54 = vsel %vm768_vm0, %v934_v49, %v923_v43 }
 0x1c7   : > { %v2876_v39 = vperm.slane %v2868_v53, %v6088_v41  ;;  %v931_v10 = vsel %vm768_vm0, 0.0, %v930_v42  ;;  %v1772_v9 = vsel %vm768_vm0, %v930_v42, %v911_v48  ;;  %v1787_v19 = vperm.slane %v1783_v54, %v6088_v41  ;;  %v6720_v53 = vpop.permute.xlu1 %2629 }
 0x1c8   : > { %v1788_v51 = vrot.slane %v935_v16, 4  ;;  %v1776_v21 = vperm.slane %v1772_v9, %v6088_v41  ;;  %v1777_v59 = vrot.slane %v931_v10, 4  ;;  %v2872_v43 = vperm.slane %v2866_v55, %v6088_v41 }
 0x1c9   : > { %v2902_v20 = vsel %vm768_vm0, %v2901_v40, %v2876_v39  ;;  %v1808_v49 = vrot.slane %v1787_v19, 4  ;;  %v2903_v17 = vrot.slane %v2876_v39, 4  ;;  %2637 = vrot.lane.b32.xlu2 %v6715_v30, %s5703_s13 }
 0x1ca   : > { %v1789_v56 = vsel %vm768_vm0, %v1788_v51, %v933_v31  ;;  %v2908_v48 = vperm.slane %v2902_v20, %v6110_v8  ;;  %v1778_v42 = vsel %vm768_vm0, %v1777_v59, %v929_v58  ;;  %v1796_v54 = vrot.slane %v1776_v21, 4  ;;  %637 = vrot.lane.b32.xlu1 %v6708_v63, %s5703_s13 }
 0x1cb   : > { %v1793_v16 = vperm.slane %v1789_v56, %v6088_v41  ;;  %v2890_v10 = vsel %vm768_vm0, %v2889_v0, %v2872_v43  ;;  %v1782_v40 = vperm.slane %v1778_v42, %v6088_v41  ;;  %v2891_v31 = vrot.slane %v2872_v43, 4  ;;  %2685 = vrot.lane.b32.xlu0 %v6715_v30, %s5702_s14 }
 0x1cc   : > { %v2896_v39 = vperm.slane %v2890_v10, %v6110_v8  ;;  %v2904_v59 = vsel %vm768_vm0, %v6616_v6, %v2903_v17  ;;  %v2917_v9 = vrot.slane %v2908_v48, 4 }
 0x1cd   : > { %v1806_v58 = vrot.slane %v1793_v16, 4  ;;  %v1809_v0 = vsel %vm768_vm0, %v1793_v16, %v1808_v49  ;;  %v2912_v55 = vperm.slane %v2904_v59, %v6110_v8  ;;  %v1794_v51 = vrot.slane %v1782_v40, 4 }
 0x1ce   : > { %v1797_v20 = vsel %vm768_vm0, %v1782_v40, %v1796_v54  ;;  %v1817_v56 = vperm.slane %v1809_v0, %v6110_v8  ;;  %v2892_v43 = vsel %vm768_vm0, %v6638_v7, %v2891_v31  ;;  %v2913_v10 = vrot.slane %v2896_v39, 4 }
 0x1cf   : > { %v1805_v42 = vperm.slane %v1797_v20, %v6110_v8  ;;  %v1807_v6 = vsel %vm768_vm0, %v1806_v58, %v1787_v19  ;;  %v2900_v17 = vperm.slane %v2892_v43, %v6110_v8  ;;  %v1342_v49 = vrot.slane %v6662_v34, 4  ;;  %v630_v24 = vpop.permute.xlu1 %629 }
 0x1d0   : > { %v1795_v16 = vsel %vm768_vm0, %v1794_v51, %v1776_v21  ;;  %v1813_v59 = vperm.slane %v1807_v6, %v6110_v8  ;;  %v1822_v54 = vrot.slane %v1817_v56, 4  ;;  %v2918_v31 = vsel %vm768_vm0, 0.0, %v2917_v9 }
 0x1d1   : > { %v1801_v40 = vperm.slane %v1795_v16, %v6110_v8  ;;  %v1824_v0 = vrot.slane %v1805_v42, 4  ;;  %v2915_v7 = vrot.slane %v2900_v17, 4  ;;  %v2914_v58 = vsel %vm768_vm0, 0.0, %v2913_v10  ;;  %685 = vrot.lane.b32.xlu2 %v6708_v63, %s5702_s14 }
 0x1d2   : > { %v1818_v20 = vrot.slane %v1813_v59, 4  ;;  %v1823_v19 = vsel %vm768_vm0, %v1822_v54, %v1805_v42  ;;  %v2919_v43 = vrot.slane %v2912_v55, 4  ;;  %v6778_v54 = vpop.permute.xlu2 %631 }
 0x1d3   : > { %v1820_v61 = vrot.slane %v1801_v40, 4  ;;  %v1825_v21 = vsel %vm768_vm0, %v1817_v56, %v1824_v0  ;;  %2563 = vst.msk [vmem:[%s6197_s18 + $0x110] sm:$0xff] %vm2528_vm1, %v1823_v19  ;;  %v2916_v51 = vsel %vm768_vm0, 0.0, %v2915_v7  ;;  %v3757_v6 = vsel %vm768_vm0, %v2915_v7, %v2896_v39  ;;  %v740_v56 = vpop.permute.xlu0 %739  ;;  %733 = vrot.lane.b32.xlu0 %v6708_v63, %s5701_s23 }
 0x1d4   : > { %v1819_v9 = vsel %vm768_vm0, %v1818_v20, %v1801_v40  ;;  %2579 = vst.msk [vmem:[%s6197_s18 + $0x190] sm:$0xff] %vm2528_vm1, %v1825_v21  ;;  %v2920_v55 = vsel %vm768_vm0, 0.0, %v2919_v43  ;;  %v3761_v42 = vperm.slane %v3757_v6, %v6088_v41  ;;  %v3762_v17 = vrot.slane %v2916_v51, 4 }
 0x1d5   : > { %v1821_v10 = vsel %vm768_vm0, %v1813_v59, %v1820_v61  ;;  %2531 = vst.msk [vmem:[%s6197_s18 + $0x10] sm:$0xff] %vm2528_vm1, %v1819_v9  ;;  %v3768_v39 = vsel %vm768_vm0, %v2919_v43, %v2908_v48  ;;  %v3773_v16 = vrot.slane %v2920_v55, 4  ;;  %v8637_v40 = vrot.slane %v6541_v46, 4 }
 0x1d6   : > { %2547 = vst.msk [vmem:[%s6197_s18 + $0x90] sm:$0xff] %vm2528_vm1, %v1821_v10  ;;  %v3763_v7 = vsel %vm768_vm0, %v3762_v17, %v2914_v58  ;;  %v3772_v20 = vperm.slane %v3768_v39, %v6088_v41  ;;  %v3781_v19 = vrot.slane %v3761_v42, 4  ;;  %v950_v21 = vrot.slane %v630_v24, 4 }
 0x1d7   : > { %v949_v0 = vsel %vm768_vm0, %v8637_v40, %v630_v24  ;;  %v3767_v59 = vperm.slane %v3763_v7, %v6088_v41  ;;  %v3774_v48 = vsel %vm768_vm0, %v3773_v16, %v2918_v31  ;;  %v1340_v43 = vrot.slane %v740_v56, 4 }
 0x1d8   : > { %v3778_v6 = vperm.slane %v3774_v48, %v6088_v41  ;;  %v3793_v9 = vrot.slane %v3772_v20, 4  ;;  %v951_v55 = vsel %vm768_vm0, %v6541_v46, %v950_v21  ;;  %v6796_v24 = vperm.slane %v949_v0, %v6088_v41 }
 0x1d9   : > { %v3779_v58 = vrot.slane %v3767_v59, 4  ;;  %v3782_v17 = vsel %vm768_vm0, %v3767_v59, %v3781_v19  ;;  %v1343_v10 = vsel %vm768_vm0, %v740_v56, %v1342_v49  ;;  %v1341_v40 = vsel %vm768_vm0, %v1340_v43, %v6662_v34 }
 0x1da   : > { %v3790_v39 = vperm.slane %v3782_v17, %v6110_v8  ;;  %v3791_v31 = vrot.slane %v3778_v6, 4  ;;  %v3794_v16 = vsel %vm768_vm0, %v3778_v6, %v3793_v9  ;;  %v6806_v21 = vperm.slane %v951_v55, %v6088_v41 }
 0x1db   : > { %v3780_v7 = vsel %vm768_vm0, %v3779_v58, %v3761_v42  ;;  %v3802_v46 = vperm.slane %v3794_v16, %v6110_v8  ;;  %v1347_v0 = vperm.slane %v1341_v40, %v6088_v41  ;;  %v1351_v59 = vperm.slane %v1343_v10, %v6088_v41 }
 0x1dc   : > { %v3786_v49 = vperm.slane %v3780_v7, %v6110_v8  ;;  %v3792_v56 = vsel %vm768_vm0, %v3791_v31, %v3772_v20  ;;  %v3809_v19 = vrot.slane %v3790_v39, 4  ;;  %v8638_v43 = vrot.slane %v6384_v1, 4  ;;  %v580_v20 = vpop.f32.mrf.mxu1 }
 0x1dd   : > { %v3798_v48 = vperm.slane %v3792_v56, %v6110_v8  ;;  %v3807_v34 = vrot.slane %v3802_v46, 4  ;;  %v1352_v42 = vrot.slane %v1347_v0, 4  ;;  %v1364_v17 = vrot.slane %v1351_v59, 4 }
 0x1de   : > { %v1355_v6 = vsel %vm768_vm0, %v1347_v0, %v8638_v43  ;;  %v3805_v9 = vrot.slane %v3786_v49, 4  ;;  %v3810_v55 = vsel %vm768_vm0, %v3802_v46, %v3809_v19  ;;  %v8639_v40 = vrot.slane %v6387_v44, 4  ;;  %v680_v0 = vpop.permute.xlu2 %679 }
 0x1df   : > { %v1363_v58 = vperm.slane %v1355_v6, %v6110_v8  ;;  %v3803_v31 = vrot.slane %v3798_v48, 4  ;;  %v3808_v10 = vsel %vm768_vm0, %v3807_v34, %v3790_v39  ;;  %4563 = vst.msk [vmem:[%s6281_s24 + $0x190] sm:$0xff] %vm2528_vm1, %v3810_v55  ;;  %v1353_v16 = vsel %vm768_vm0, %v1352_v42, %v6384_v1 }
 0x1e0   : > { %v1367_v7 = vsel %vm768_vm0, %v1351_v59, %v8639_v40  ;;  %v3806_v46 = vsel %vm768_vm0, %v3798_v48, %v3805_v9  ;;  %4547 = vst.msk [vmem:[%s6281_s24 + $0x110] sm:$0xff] %vm2528_vm1, %v3808_v10  ;;  %v1359_v56 = vperm.slane %v1353_v16, %v6110_v8  ;;  %v1365_v19 = vsel %vm768_vm0, %v1364_v17, %v6387_v44 }
 0x1e1   : > { %v1375_v39 = vperm.slane %v1367_v7, %v6110_v8  ;;  %v3804_v34 = vsel %vm768_vm0, %v3803_v31, %v3786_v49  ;;  %4531 = vst.msk [vmem:[%s6281_s24 + $0x90] sm:$0xff] %vm2528_vm1, %v3806_v46  ;;  %v1371_v1 = vperm.slane %v1365_v19, %v6110_v8  ;;  %v1378_v42 = vrot.slane %v1363_v58, 4 }
 0x1e2   : > { %v6838_v59 = vadd.f32 %v6631_v11, %v580_v20  ;;  %4515 = vst.msk [vmem:[%s6281_s24 + $0x10] sm:$0xff] %vm2528_vm1, %v3804_v34  ;;  %v1376_v48 = vrot.slane %v1359_v56, 4  ;;  %v994_v6 = vrot.slane %v6082_v38, 4  ;;  %v992_v9 = vrot.slane %v680_v0, 4 }
 0x1e3   : > { %v1382_v43 = vrot.slane %v1375_v39, 4  ;;  %v1379_v44 = vsel %vm768_vm0, 0.0, %v1378_v42  ;;  %v1380_v55 = vrot.slane %v1371_v1, 4  ;;  %v2204_v49 = vsel %vm768_vm0, %v1378_v42, %v1359_v56  ;;  %v678_v56 = vpop.permute.xlu1 %677 }
 0x1e4   : > { %2623 = vrot.lane.b32.xlu1 %v6838_v59, %s5703_s13  ;;  %v938_v58 = vrot.slane %v6042_v27, 4  ;;  %2671 = vrot.lane.b32.xlu2 %v6838_v59, %s5702_s14  ;;  %v1377_v17 = vsel %vm768_vm0, 0.0, %v1376_v48  ;;  %v2208_v31 = vperm.slane %v2204_v49, %v6088_v41  ;;  %v2209_v10 = vrot.slane %v1379_v44, 4 }
 0x1e5   : > { %v1383_v20 = vsel %vm768_vm0, 0.0, %v1382_v43  ;;  %v1381_v16 = vsel %vm768_vm0, 0.0, %v1380_v55  ;;  %v2215_v40 = vsel %vm768_vm0, %v1382_v43, %v1371_v1  ;;  %v993_v46 = vsel %vm768_vm0, %v992_v9, %v6082_v38 }
 0x1e6   : > { %v2220_v7 = vrot.slane %v1383_v20, 4  ;;  %v2210_v19 = vsel %vm768_vm0, %v2209_v10, %v1377_v17  ;;  %v2219_v39 = vperm.slane %v2215_v40, %v6088_v41  ;;  %v2228_v34 = vrot.slane %v2208_v31, 4 }
 0x1e7   : > { %v995_v42 = vsel %vm768_vm0, %v680_v0, %v994_v6  ;;  %v960_v48 = vrot.slane %v6796_v24, 4  ;;  %v972_v44 = vrot.slane %v6806_v21, 4  ;;  %v2214_v55 = vperm.slane %v2210_v19, %v6088_v41  ;;  %v2616_v6 = vpop.permute.xlu0 %2615 }
 0x1e8   : > { %v2221_v1 = vsel %vm768_vm0, %v2220_v7, %v1381_v16  ;;  %v2240_v49 = vrot.slane %v2219_v39, 4  ;;  %v936_v38 = vrot.slane %v678_v56, 4  ;;  %v939_v9 = vsel %vm768_vm0, %v678_v56, %v938_v58 }
 0x1e9   : > { %v2225_v43 = vperm.slane %v2221_v1, %v6088_v41  ;;  %v2226_v17 = vrot.slane %v2214_v55, 4  ;;  %v2229_v20 = vsel %vm768_vm0, %v2214_v55, %v2228_v34  ;;  %v6868_v10 = vperm.slane %v993_v46, %v6088_v41 }
 0x1ea   : > { %v6871_v0 = vperm.slane %v995_v42, %v6088_v41  ;;  %v2237_v40 = vperm.slane %v2229_v20, %v6110_v8  ;;  %v937_v7 = vsel %vm768_vm0, %v936_v38, %v6042_v27  ;;  %v947_v46 = vperm.slane %v939_v9, %v6088_v41 }
 0x1eb   : > { %v2238_v19 = vrot.slane %v2225_v43, 4  ;;  %v2241_v16 = vsel %vm768_vm0, %v2225_v43, %v2240_v49  ;;  %v2227_v58 = vsel %vm768_vm0, %v2226_v17, %v2208_v31  ;;  %v943_v34 = vperm.slane %v937_v7, %v6088_v41 }
 0x1ec   : > { %v2249_v56 = vperm.slane %v2241_v16, %v6110_v8  ;;  %v2233_v42 = vperm.slane %v2227_v58, %v6110_v8  ;;  %v2256_v1 = vrot.slane %v2237_v40, 4  ;;  %v8640_v20 = vrot.slane %v6620_v52, 4 }
 0x1ed   : > { %v2239_v55 = vsel %vm768_vm0, %v2238_v19, %v2219_v39  ;;  %v961_v49 = vsel %vm768_vm0, %v960_v48, %v943_v34  ;;  %v962_v38 = vrot.slane %v943_v34, 4  ;;  %v973_v39 = vsel %vm768_vm0, %v972_v44, %v947_v46  ;;  %v519_v44 = vpop.f32.mrf.mxu2 }
 0x1ee   : > { %v2934_v43 = vsel %vm768_vm0, %v8640_v20, %v2616_v6  ;;  %v2245_v27 = vperm.slane %v2239_v55, %v6110_v8  ;;  %v2254_v31 = vrot.slane %v2249_v56, 4  ;;  %v2252_v17 = vrot.slane %v2233_v42, 4 }
 0x1ef   : > { %v2257_v9 = vsel %vm768_vm0, %v2249_v56, %v2256_v1  ;;  %v967_v16 = vperm.slane %v961_v49, %v6110_v8  ;;  %v963_v58 = vsel %vm768_vm0, %v6796_v24, %v962_v38  ;;  %v974_v55 = vrot.slane %v947_v46, 4 }
 0x1f0   : > { %v2250_v19 = vrot.slane %v2245_v27, 4  ;;  %v2255_v7 = vsel %vm768_vm0, %v2254_v31, %v2237_v40  ;;  %2587 = vst.msk [vmem:[%s6197_s18 + $0x1d0] sm:$0xff] %vm2528_vm1, %v2257_v9  ;;  %v2253_v48 = vsel %vm768_vm0, %v2245_v27, %v2252_v17  ;;  %v971_v56 = vperm.slane %v963_v58, %v6110_v8 }
 0x1f1   : > { %2571 = vst.msk [vmem:[%s6197_s18 + $0x150] sm:$0xff] %vm2528_vm1, %v2255_v7  ;;  %v979_v34 = vperm.slane %v973_v39, %v6110_v8  ;;  %v984_v1 = vrot.slane %v967_v16, 4  ;;  %v975_v40 = vsel %vm768_vm0, %v6806_v21, %v974_v55  ;;  %v2935_v31 = vrot.slane %v2616_v6, 4 }
 0x1f2   : > { %v2251_v20 = vsel %vm768_vm0, %v2250_v19, %v2233_v42  ;;  %2555 = vst.msk [vmem:[%s6197_s18 + $0xd0] sm:$0xff] %vm2528_vm1, %v2253_v48  ;;  %v6907_v24 = vperm.slane %v2934_v43, %v6088_v41  ;;  %v1006_v46 = vrot.slane %v6778_v54, 4  ;;  %v1018_v27 = vrot.slane %v6868_v10, 4  ;;  %v2666_v43 = vpop.permute.xlu2 %2665 }
 0x1f3   : > { %2539 = vst.msk [vmem:[%s6197_s18 + $0x50] sm:$0xff] %vm2528_vm1, %v2251_v20  ;;  %v983_v49 = vperm.slane %v975_v40, %v6110_v8  ;;  %v986_v38 = vrot.slane %v971_v56, 4  ;;  %v985_v17 = vsel %vm768_vm0, 0.0, %v984_v1  ;;  %v2936_v21 = vsel %vm768_vm0, %v6620_v52, %v2935_v31 }
 0x1f4   : > { %v6919_v6 = vadd.f32 %v6574_v4, %v519_v44  ;;  %v988_v39 = vrot.slane %v979_v34, 4  ;;  %v2944_v48 = vperm.slane %v2936_v21, %v6088_v41  ;;  %v2945_v56 = vrot.slane %v6907_v24, 4  ;;  %v2664_v44 = vpop.permute.xlu1 %2663 }
 0x1f5   : > { %v987_v9 = vsel %vm768_vm0, 0.0, %v986_v38  ;;  %v990_v19 = vrot.slane %v983_v49, 4  ;;  %v1826_v7 = vsel %vm768_vm0, %v986_v38, %v967_v16  ;;  %v2979_v1 = vrot.slane %v6102_v62, 4 }
 0x1f6   : > { %v1830_v58 = vperm.slane %v1826_v7, %v6088_v41  ;;  %v1831_v55 = vrot.slane %v987_v9, 4  ;;  %701 = vrot.lane.b32.xlu1 %v6919_v6, %s5702_s14  ;;  %653 = vrot.lane.b32.xlu0 %v6919_v6, %s5703_s13  ;;  %v2977_v16 = vrot.slane %v2666_v43, 4  ;;  %v989_v38 = vsel %vm768_vm0, 0.0, %v988_v39 }
 0x1f7   : > { %v991_v4 = vsel %vm768_vm0, 0.0, %v990_v19  ;;  %v1837_v52 = vsel %vm768_vm0, %v990_v19, %v979_v34  ;;  %749 = vrot.lane.b32.xlu2 %v6919_v6, %s5701_s23  ;;  %v2980_v9 = vsel %vm768_vm0, %v2666_v43, %v2979_v1  ;;  %v2923_v34 = vrot.slane %v6051_v29, 4 }
 0x1f8   : > { %v1832_v20 = vsel %vm768_vm0, %v1831_v55, %v985_v17  ;;  %v1841_v40 = vperm.slane %v1837_v52, %v6088_v41  ;;  %v1842_v31 = vrot.slane %v991_v4, 4  ;;  %v1850_v49 = vrot.slane %v1830_v58, 4 }
 0x1f9   : > { %v1836_v21 = vperm.slane %v1832_v20, %v6088_v41  ;;  %v2957_v51 = vrot.slane %v2944_v48, 4  ;;  %v2921_v61 = vrot.slane %v2664_v44, 4  ;;  %v2978_v4 = vsel %vm768_vm0, %v2977_v16, %v6102_v62 }
 0x1fa   : > { %v1843_v19 = vsel %vm768_vm0, %v1842_v31, %v989_v38  ;;  %v1862_v7 = vrot.slane %v1841_v40, 4  ;;  %v6948_v52 = vperm.slane %v2980_v9, %v6088_v41  ;;  %v2924_v1 = vsel %vm768_vm0, %v2664_v44, %v2923_v34 }
 0x1fb   : > { %v1847_v42 = vperm.slane %v1843_v19, %v6088_v41  ;;  %v1848_v17 = vrot.slane %v1836_v21, 4  ;;  %v1851_v55 = vsel %vm768_vm0, %v1836_v21, %v1850_v49  ;;  %v2922_v43 = vsel %vm768_vm0, %v2921_v61, %v6051_v29 }
 0x1fc   : > { %v1859_v39 = vperm.slane %v1851_v55, %v6110_v8  ;;  %v2928_v49 = vperm.slane %v2922_v43, %v6088_v41  ;;  %v2932_v9 = vperm.slane %v2924_v1, %v6088_v41 }
 0x1fd   : > { %v1849_v20 = vsel %vm768_vm0, %v1848_v17, %v1830_v58  ;;  %v1860_v31 = vrot.slane %v1847_v42, 4  ;;  %v1863_v38 = vsel %vm768_vm0, %v1847_v42, %v1862_v7  ;;  %v1386_v58 = vrot.slane %v6060_v32, 4  ;;  %v694_v17 = vpop.permute.xlu0 %693 }
 0x1fe   : > { %v1855_v62 = vperm.slane %v1849_v20, %v6110_v8  ;;  %v1871_v16 = vperm.slane %v1863_v38, %v6110_v8  ;;  %v1878_v21 = vrot.slane %v1859_v39, 4  ;;  %v2946_v29 = vsel %vm768_vm0, %v2945_v56, %v2928_v49 }
 0x1ff   : > { %v1861_v19 = vsel %vm768_vm0, %v1860_v31, %v1841_v40  ;;  %v2947_v61 = vrot.slane %v2928_v49, 4  ;;  %2723 = vrot.lane.b32.xlu2 %v5994_v14, %s5701_s23  ;;  %v2952_v40 = vperm.slane %v2946_v29, %v6110_v8  ;;  %v2958_v55 = vsel %vm768_vm0, %v2957_v51, %v2932_v9 }
 0x200   : > { %v1867_v42 = vperm.slane %v1861_v19, %v6110_v8  ;;  %v1874_v44 = vrot.slane %v1855_v62, 4  ;;  %v1876_v34 = vrot.slane %v1871_v16, 4  ;;  %v1879_v7 = vsel %vm768_vm0, %v1871_v16, %v1878_v21 }
 0x201   : > { %2580 = vst.msk [vmem:[%s6197_s18 + $0x198] sm:$0xff] %vm2528_vm1, %v1879_v7  ;;  %v2948_v56 = vsel %vm768_vm0, %v6907_v24, %v2947_v61  ;;  %v2959_v43 = vrot.slane %v2932_v9, 4  ;;  %v2964_v49 = vperm.slane %v2958_v55, %v6110_v8  ;;  %v2969_v24 = vrot.slane %v2952_v40, 4  ;;  %v742_v55 = vpop.permute.xlu1 %741 }
 0x202   : > { %v1872_v14 = vrot.slane %v1867_v42, 4  ;;  %v1875_v1 = vsel %vm768_vm0, %v1867_v42, %v1874_v44  ;;  %v1877_v20 = vsel %vm768_vm0, %v1876_v34, %v1859_v39  ;;  %v2956_v31 = vperm.slane %v2948_v56, %v6110_v8  ;;  %v604_v42 = vpop.f32.mrf.mxu3 }
 0x203   : > { %2548 = vst.msk [vmem:[%s6197_s18 + $0x98] sm:$0xff] %vm2528_vm1, %v1875_v1  ;;  %v2960_v38 = vsel %vm768_vm0, %v2944_v48, %v2959_v43  ;;  %v1384_v16 = vrot.slane %v694_v17, 4  ;;  %v1387_v19 = vsel %vm768_vm0, %v694_v17, %v1386_v58  ;;  %v6987_v39 = vperm.slane %v2978_v4, %v6088_v41 }
 0x204   : > { %v1873_v21 = vsel %vm768_vm0, %v1872_v14, %v1855_v62  ;;  %2564 = vst.msk [vmem:[%s6197_s18 + $0x118] sm:$0xff] %vm2528_vm1, %v1877_v20  ;;  %v2968_v51 = vperm.slane %v2960_v38, %v6110_v8  ;;  %v2971_v9 = vrot.slane %v2956_v31, 4  ;;  %v2973_v29 = vrot.slane %v2964_v49, 4 }
 0x205   : > { %2532 = vst.msk [vmem:[%s6197_s18 + $0x18] sm:$0xff] %vm2528_vm1, %v1873_v21  ;;  %v1385_v48 = vsel %vm768_vm0, %v1384_v16, %v6060_v32  ;;  %v1395_v61 = vperm.slane %v1387_v19, %v6088_v41  ;;  %v2970_v58 = vsel %vm768_vm0, 0.0, %v2969_v24  ;;  %v8641_v21 = vrot.slane %v6673_v50, 4 }
 0x206   : > { %v2972_v62 = vsel %vm768_vm0, 0.0, %v2971_v9  ;;  %v2975_v44 = vrot.slane %v2968_v51, 4  ;;  %v3811_v34 = vsel %vm768_vm0, %v2971_v9, %v2952_v40  ;;  %v1391_v7 = vperm.slane %v1385_v48, %v6088_v41 }
 0x207   : > { %v2974_v17 = vsel %vm768_vm0, 0.0, %v2973_v29  ;;  %v3815_v4 = vperm.slane %v3811_v34, %v6088_v41  ;;  %v3816_v56 = vrot.slane %v2972_v62, 4  ;;  %2729 = vrot.lane.b32.xlu2 %v6276_v33, %s5701_s23  ;;  %v1422_v14 = vrot.slane %v1395_v61, 4 }
 0x208   : > { %v2976_v32 = vsel %vm768_vm0, 0.0, %v2975_v44  ;;  %v3822_v43 = vsel %vm768_vm0, %v2975_v44, %v2964_v49  ;;  %v7003_v40 = vadd.f32 %v6631_v11, %v604_v42  ;;  %v1410_v16 = vrot.slane %v1391_v7, 4 }
 0x209   : > { %v3817_v1 = vsel %vm768_vm0, %v3816_v56, %v2970_v58  ;;  %v3826_v20 = vperm.slane %v3822_v43, %v6088_v41  ;;  %v3827_v31 = vrot.slane %v2976_v32, 4  ;;  %v3835_v38 = vrot.slane %v3815_v4, 4 }
 0x20a   : > { %v3821_v24 = vperm.slane %v3817_v1, %v6088_v41  ;;  %2687 = vrot.lane.b32.xlu1 %v7003_v40, %s5702_s14  ;;  %2639 = vrot.lane.b32.xlu0 %v7003_v40, %s5703_s13  ;;  %v1396_v49 = vrot.slane %v742_v55, 4  ;;  %v1399_v11 = vsel %vm768_vm0, %v742_v55, %v8641_v21  ;;  %v3371_v29 = vrot.slane %v6071_v35, 4  ;;  %v2680_v55 = vpop.permute.xlu0 %2679 }
 0x20b   : > { %v3828_v51 = vsel %vm768_vm0, %v3827_v31, %v2974_v17  ;;  %v3847_v9 = vrot.slane %v3826_v20, 4  ;;  %v1407_v19 = vperm.slane %v1399_v11, %v6088_v41  ;;  %v7027_v31 = vpop.permute.xlu2 %743 }
 0x20c   : > { %v3832_v48 = vperm.slane %v3828_v51, %v6088_v41  ;;  %v3833_v42 = vrot.slane %v3821_v24, 4  ;;  %v3836_v62 = vsel %vm768_vm0, %v3821_v24, %v3835_v38  ;;  %v1397_v44 = vsel %vm768_vm0, %v1396_v49, %v6673_v50 }
 0x20d   : > { %v3844_v34 = vperm.slane %v3836_v62, %v6110_v8  ;;  %v1403_v58 = vperm.slane %v1397_v44, %v6088_v41  ;;  %v1420_v56 = vrot.slane %v1407_v19, 4  ;;  %v1423_v17 = vsel %vm768_vm0, %v1407_v19, %v1422_v14 }
 0x20e   : > { %v3834_v32 = vsel %vm768_vm0, %v3833_v42, %v3815_v4  ;;  %v3845_v43 = vrot.slane %v3832_v48, 4  ;;  %v3848_v1 = vsel %vm768_vm0, %v3832_v48, %v3847_v9  ;;  %v1431_v38 = vperm.slane %v1423_v17, %v6110_v8 }
 0x20f   : > { %v3840_v50 = vperm.slane %v3834_v32, %v6110_v8  ;;  %v3856_v24 = vperm.slane %v3848_v1, %v6110_v8  ;;  %v3863_v49 = vrot.slane %v3844_v34, 4  ;;  %v1408_v21 = vrot.slane %v1403_v58, 4  ;;  %2735 = vrot.lane.b32.xlu2 %v7003_v40, %s5701_s23 }
 0x210   : > { %v3846_v14 = vsel %vm768_vm0, %v3845_v43, %v3826_v20  ;;  %v1411_v4 = vsel %vm768_vm0, %v1403_v58, %v1410_v16  ;;  %v1421_v11 = vsel %vm768_vm0, %v1420_v56, %v1395_v61  ;;  %v1438_v51 = vrot.slane %v1431_v38, 4 }
 0x211   : > { %v3852_v9 = vperm.slane %v3846_v14, %v6110_v8  ;;  %v3859_v19 = vrot.slane %v3840_v50, 4  ;;  %v3861_v48 = vrot.slane %v3856_v24, 4  ;;  %v3864_v42 = vsel %vm768_vm0, %v3856_v24, %v3863_v49 }
 0x212   : > { %4564 = vst.msk [vmem:[%s6281_s24 + $0x198] sm:$0xff] %vm2528_vm1, %v3864_v42  ;;  %v1409_v62 = vsel %vm768_vm0, %v1408_v21, %v1391_v7  ;;  %v1419_v44 = vperm.slane %v1411_v4, %v6110_v8  ;;  %v1427_v20 = vperm.slane %v1421_v11, %v6110_v8  ;;  %v1439_v16 = vsel %vm768_vm0, 0.0, %v1438_v51  ;;  %2721 = vrot.lane.b32.xlu1 %v5970_v5, %s5701_s23 }
 0x213   : > { %v3857_v61 = vrot.slane %v3852_v9, 4  ;;  %v3860_v58 = vsel %vm768_vm0, %v3852_v9, %v3859_v19  ;;  %v3862_v56 = vsel %vm768_vm0, %v3861_v48, %v3844_v34  ;;  %v1415_v17 = vperm.slane %v1409_v62, %v6110_v8  ;;  %2719 = vrot.lane.b32.xlu0 %v6838_v59, %s5701_s23  ;;  %v7068_v19 = vpop.permute.xlu1 %2617  ;;  %v728_v48 = vpop.permute.xlu0 %727 }
 0x214   : > { %4532 = vst.msk [vmem:[%s6281_s24 + $0x98] sm:$0xff] %vm2528_vm1, %v3860_v58  ;;  %v1434_v7 = vrot.slane %v1419_v44, 4  ;;  %v1436_v32 = vrot.slane %v1427_v20, 4  ;;  %v2269_v43 = vsel %vm768_vm0, %v1438_v51, %v1427_v20  ;;  %v2274_v1 = vrot.slane %v1439_v16, 4  ;;  %v7074_v16 = vpop.permute.xlu2 %633 }
 0x215   : > { %v3858_v5 = vsel %vm768_vm0, %v3857_v61, %v3840_v50  ;;  %4548 = vst.msk [vmem:[%s6281_s24 + $0x118] sm:$0xff] %vm2528_vm1, %v3862_v56  ;;  %v1432_v38 = vrot.slane %v1415_v17, 4  ;;  %v2273_v24 = vperm.slane %v2269_v43, %v6088_v41  ;;  %v3369_v34 = vrot.slane %v2680_v55, 4 }
 0x216   : > { %4516 = vst.msk [vmem:[%s6281_s24 + $0x18] sm:$0xff] %vm2528_vm1, %v3858_v5  ;;  %v1435_v49 = vsel %vm768_vm0, 0.0, %v1434_v7  ;;  %v1437_v21 = vsel %vm768_vm0, 0.0, %v1436_v32  ;;  %v2258_v14 = vsel %vm768_vm0, %v1434_v7, %v1415_v17  ;;  %v3372_v4 = vsel %vm768_vm0, %v2680_v55, %v3371_v29 }
 0x217   : > { %v1433_v11 = vsel %vm768_vm0, 0.0, %v1432_v38  ;;  %v2262_v50 = vperm.slane %v2258_v14, %v6088_v41  ;;  %v2263_v51 = vrot.slane %v1435_v49, 4  ;;  %v2275_v9 = vsel %vm768_vm0, %v2274_v1, %v1437_v21 }
 0x218   : > { %v3015_v42 = vrot.slane %v6948_v52, 4  ;;  %v2279_v62 = vperm.slane %v2275_v9, %v6088_v41  ;;  %v2294_v44 = vrot.slane %v2273_v24, 4  ;;  %v3370_v20 = vsel %vm768_vm0, %v3369_v34, %v6071_v35 }
 0x219   : > { %v3003_v29 = vrot.slane %v6987_v39, 4  ;;  %v1452_v55 = vrot.slane %v7027_v31, 4  ;;  %v2264_v61 = vsel %vm768_vm0, %v2263_v51, %v1433_v11  ;;  %v2282_v58 = vrot.slane %v2262_v50, 4 }
 0x21a   : > { %v2268_v56 = vperm.slane %v2264_v61, %v6088_v41  ;;  %v2292_v17 = vrot.slane %v2279_v62, 4  ;;  %v2295_v7 = vsel %vm768_vm0, %v2279_v62, %v2294_v44  ;;  %v7082_v32 = vperm.slane %v3372_v4, %v6088_v41  ;;  %2727 = vrot.lane.b32.xlu1 %v6071_v35, %s5701_s23 }
 0x21b   : > { %v2303_v43 = vperm.slane %v2295_v7, %v6110_v8  ;;  %v7088_v1 = vperm.slane %v3370_v20, %v6088_v41  ;;  %v1062_v5 = vrot.slane %v7074_v16, 4  ;;  %v1004_v38 = vrot.slane %v728_v48, 4  ;;  %2725 = vrot.lane.b32.xlu0 %v6033_v25, %s5701_s23 }
 0x21c   : > { %v2280_v34 = vrot.slane %v2268_v56, 4  ;;  %v2283_v49 = vsel %vm768_vm0, %v2268_v56, %v2282_v58  ;;  %v2293_v21 = vsel %vm768_vm0, %v2292_v17, %v2273_v24  ;;  %v1007_v35 = vsel %vm768_vm0, %v728_v48, %v1006_v46 }
 0x21d   : > { %v2291_v14 = vperm.slane %v2283_v49, %v6110_v8  ;;  %v2299_v4 = vperm.slane %v2293_v21, %v6110_v8  ;;  %v2308_v11 = vrot.slane %v2303_v43, 4  ;;  %v1005_v51 = vsel %vm768_vm0, %v1004_v38, %v6778_v54  ;;  %v696_v49 = vpop.permute.xlu1 %695  ;;  %v2714_v21 = vpop.permute.xlu0 %2713 }
 0x21e   : > { %v2281_v25 = vsel %vm768_vm0, %v2280_v34, %v2262_v50  ;;  %v1011_v62 = vperm.slane %v1005_v51, %v6088_v41  ;;  %v1015_v24 = vperm.slane %v1007_v35, %v6088_v41  ;;  %v8642_v58 = vrot.slane %v6871_v0, 4 }
 0x21f   : > { %v2287_v44 = vperm.slane %v2281_v25, %v6110_v8  ;;  %v2304_v46 = vrot.slane %v2299_v4, 4  ;;  %v2309_v48 = vsel %vm768_vm0, %v2308_v11, %v2291_v14  ;;  %v2310_v20 = vrot.slane %v2291_v14, 4 }
 0x220   : > { %2572 = vst.msk [vmem:[%s6197_s18 + $0x158] sm:$0xff] %vm2528_vm1, %v2309_v48  ;;  %v1016_v61 = vrot.slane %v1011_v62, 4  ;;  %v1019_v54 = vsel %vm768_vm0, %v1011_v62, %v1018_v27  ;;  %v1028_v50 = vrot.slane %v1015_v24, 4  ;;  %v1031_v56 = vsel %vm768_vm0, %v1015_v24, %v8642_v58 }
 0x221   : > { %v2305_v17 = vsel %vm768_vm0, %v2304_v46, %v2287_v44  ;;  %v2306_v7 = vrot.slane %v2287_v44, 4  ;;  %v2311_v38 = vsel %vm768_vm0, %v2303_v43, %v2310_v20  ;;  %v1027_v34 = vperm.slane %v1019_v54, %v6110_v8 }
 0x222   : > { %2540 = vst.msk [vmem:[%s6197_s18 + $0x58] sm:$0xff] %vm2528_vm1, %v2305_v17  ;;  %v1017_v27 = vsel %vm768_vm0, %v1016_v61, %v6868_v10  ;;  %v1029_v35 = vsel %vm768_vm0, %v1028_v50, %v6871_v0  ;;  %v1039_v14 = vperm.slane %v1031_v56, %v6110_v8  ;;  %v1442_v11 = vrot.slane %v6136_v47, 4  ;;  %2733 = vrot.lane.b32.xlu1 %v6715_v30, %s5701_s23  ;;  %v7141_v61 = vpop.permute.xlu2 %2619 }
 0x223   : > { %v2307_v43 = vsel %vm768_vm0, %v2299_v4, %v2306_v7  ;;  %2588 = vst.msk [vmem:[%s6197_s18 + $0x1d8] sm:$0xff] %vm2528_vm1, %v2311_v38  ;;  %v1023_v51 = vperm.slane %v1017_v27, %v6110_v8  ;;  %v1035_v25 = vperm.slane %v1029_v35, %v6110_v8  ;;  %v1042_v62 = vrot.slane %v1027_v34, 4  ;;  %2731 = vrot.lane.b32.xlu0 %v6489_v12, %s5701_s23 }
 0x224   : > { %2556 = vst.msk [vmem:[%s6197_s18 + $0xd8] sm:$0xff] %vm2528_vm1, %v2307_v43  ;;  %v1046_v10 = vrot.slane %v1039_v14, 4  ;;  %v1440_v0 = vrot.slane %v696_v49, 4  ;;  %v1443_v24 = vsel %vm768_vm0, %v696_v49, %v1442_v11  ;;  %v2989_v44 = vrot.slane %v2714_v21, 4 }
 0x225   : > { %v1040_v46 = vrot.slane %v1023_v51, 4  ;;  %v1043_v4 = vsel %vm768_vm0, 0.0, %v1042_v62  ;;  %v1044_v48 = vrot.slane %v1035_v25, 4  ;;  %v1880_v20 = vsel %vm768_vm0, %v1042_v62, %v1023_v51 }
 0x226   : > { %v1047_v54 = vsel %vm768_vm0, 0.0, %v1046_v10  ;;  %v1884_v50 = vperm.slane %v1880_v20, %v6088_v41  ;;  %v1885_v58 = vrot.slane %v1043_v4, 4  ;;  %v1891_v56 = vsel %vm768_vm0, %v1046_v10, %v1035_v25 }
 0x227   : > { %v1041_v17 = vsel %vm768_vm0, 0.0, %v1040_v46  ;;  %v1045_v7 = vsel %vm768_vm0, 0.0, %v1044_v48  ;;  %v1895_v38 = vperm.slane %v1891_v56, %v6088_v41  ;;  %v1896_v34 = vrot.slane %v1047_v54, 4 }
 0x228   : > { %v2991_v49 = vrot.slane %v7068_v19, 4  ;;  %v1886_v27 = vsel %vm768_vm0, %v1885_v58, %v1041_v17  ;;  %v1904_v35 = vrot.slane %v1884_v50, 4  ;;  %v1441_v14 = vsel %vm768_vm0, %v1440_v0, %v6136_v47 }
 0x229   : > { %v1890_v43 = vperm.slane %v1886_v27, %v6088_v41  ;;  %v1897_v51 = vsel %vm768_vm0, %v1896_v34, %v1045_v7  ;;  %v1916_v25 = vrot.slane %v1895_v38, 4  ;;  %v7158_v10 = vperm.slane %v1443_v24, %v6088_v41 }
 0x22a   : > { %v1901_v62 = vperm.slane %v1897_v51, %v6088_v41  ;;  %v2990_v46 = vsel %vm768_vm0, %v2989_v44, %v7068_v19  ;;  %v2992_v4 = vsel %vm768_vm0, %v2714_v21, %v2991_v49  ;;  %v7165_v0 = vperm.slane %v1441_v14, %v6088_v41  ;;  %v698_v51 = vpop.permute.xlu2 %697 }
 0x22b   : > { %v1902_v48 = vrot.slane %v1890_v43, 4  ;;  %v1905_v47 = vsel %vm768_vm0, %v1890_v43, %v1904_v35  ;;  %v2996_v20 = vperm.slane %v2990_v46, %v6088_v41  ;;  %v3000_v24 = vperm.slane %v2992_v4, %v6088_v41  ;;  %v2682_v46 = vpop.permute.xlu1 %2681 }
 0x22c   : > { %v1913_v54 = vperm.slane %v1905_v47, %v6110_v8  ;;  %v1914_v58 = vrot.slane %v1901_v62, 4  ;;  %v1917_v56 = vsel %vm768_vm0, %v1901_v62, %v1916_v25 }
 0x22d   : > { %v1903_v17 = vsel %vm768_vm0, %v1902_v48, %v1884_v50  ;;  %v1925_v19 = vperm.slane %v1917_v56, %v6110_v8  ;;  %v3001_v21 = vrot.slane %v2996_v20, 4  ;;  %v3004_v44 = vsel %vm768_vm0, %v2996_v20, %v3003_v29 }
 0x22e   : > { %v1909_v7 = vperm.slane %v1903_v17, %v6110_v8  ;;  %v1915_v34 = vsel %vm768_vm0, %v1914_v58, %v1895_v38  ;;  %v1932_v49 = vrot.slane %v1913_v54, 4  ;;  %v3012_v27 = vperm.slane %v3004_v44, %v6110_v8 }
 0x22f   : > { %v1921_v35 = vperm.slane %v1915_v34, %v6110_v8  ;;  %v1930_v14 = vrot.slane %v1925_v19, 4  ;;  %v3002_v50 = vsel %vm768_vm0, %v3001_v21, %v6987_v39  ;;  %v3013_v43 = vrot.slane %v3000_v24, 4 }
 0x230   : > { %v1928_v25 = vrot.slane %v1909_v7, 4  ;;  %v1933_v29 = vsel %vm768_vm0, %v1925_v19, %v1932_v49  ;;  %v3008_v62 = vperm.slane %v3002_v50, %v6110_v8  ;;  %v3016_v38 = vsel %vm768_vm0, %v3000_v24, %v3015_v42 }
 0x231   : > { %v1926_v4 = vrot.slane %v1921_v35, 4  ;;  %v1931_v48 = vsel %vm768_vm0, %v1930_v14, %v1913_v54  ;;  %2581 = vst.msk [vmem:[%s6197_s18 + $0x1a0] sm:$0xff] %vm2528_vm1, %v1933_v29  ;;  %v3014_v39 = vsel %vm768_vm0, %v3013_v43, %v6948_v52  ;;  %v3024_v47 = vperm.slane %v3016_v38, %v6110_v8  ;;  %v648_v14 = vpop.permute.xlu0 %647 }
 0x232   : > { %v1929_v20 = vsel %vm768_vm0, %v1921_v35, %v1928_v25  ;;  %2565 = vst.msk [vmem:[%s6197_s18 + $0x120] sm:$0xff] %vm2528_vm1, %v1931_v48  ;;  %v3020_v58 = vperm.slane %v3014_v39, %v6110_v8  ;;  %v3025_v56 = vrot.slane %v3008_v62, 4  ;;  %v3027_v42 = vrot.slane %v3012_v27, 4 }
 0x233   : > { %v1927_v24 = vsel %vm768_vm0, %v1926_v4, %v1909_v7  ;;  %2549 = vst.msk [vmem:[%s6197_s18 + $0xa0] sm:$0xff] %vm2528_vm1, %v1929_v20  ;;  %v3031_v54 = vrot.slane %v3024_v47, 4  ;;  %v1498_v17 = vrot.slane %v6411_v23, 4  ;;  %v1496_v19 = vrot.slane %v698_v51, 4 }
 0x234   : > { %2533 = vst.msk [vmem:[%s6197_s18 + $0x20] sm:$0xff] %vm2528_vm1, %v1927_v24  ;;  %v3026_v52 = vsel %vm768_vm0, 0.0, %v3025_v56  ;;  %v3028_v21 = vsel %vm768_vm0, 0.0, %v3027_v42  ;;  %v3029_v44 = vrot.slane %v3020_v58, 4  ;;  %v3865_v34 = vsel %vm768_vm0, %v3027_v42, %v3008_v62 }
 0x235   : > { %v3032_v49 = vsel %vm768_vm0, 0.0, %v3031_v54  ;;  %v3869_v27 = vperm.slane %v3865_v34, %v6088_v41  ;;  %v3870_v7 = vrot.slane %v3028_v21, 4  ;;  %v3876_v35 = vsel %vm768_vm0, %v3031_v54, %v3020_v58  ;;  %v7224_v54 = vpop.permute.xlu2 %2683  ;;  %v7231_v21 = vpop.permute.xlu1 %729 }
 0x236   : > { %v3030_v50 = vsel %vm768_vm0, 0.0, %v3029_v44  ;;  %v3880_v43 = vperm.slane %v3876_v35, %v6088_v41  ;;  %v3881_v25 = vrot.slane %v3032_v49, 4  ;;  %v1497_v29 = vsel %vm768_vm0, %v1496_v19, %v6411_v23 }
 0x237   : > { %v3047_v38 = vrot.slane %v7141_v61, 4  ;;  %v3871_v62 = vsel %vm768_vm0, %v3870_v7, %v3026_v52  ;;  %v3889_v4 = vrot.slane %v3869_v27, 4  ;;  %v1499_v48 = vsel %vm768_vm0, %v698_v51, %v1498_v17 }
 0x238   : > { %v1478_v39 = vrot.slane %v7158_v10, 4  ;;  %v3875_v47 = vperm.slane %v3871_v62, %v6088_v41  ;;  %v3882_v20 = vsel %vm768_vm0, %v3881_v25, %v3030_v50  ;;  %v3901_v58 = vrot.slane %v3880_v43, 4 }
 0x239   : > { %v1466_v56 = vrot.slane %v7165_v0, 4  ;;  %v3886_v42 = vperm.slane %v3882_v20, %v6088_v41  ;;  %v7222_v23 = vperm.slane %v1497_v29, %v6088_v41  ;;  %v3425_v24 = vrot.slane %v2682_v46, 4 }
 0x23a   : > { %v3887_v19 = vrot.slane %v3875_v47, 4  ;;  %v3890_v51 = vsel %vm768_vm0, %v3875_v47, %v3889_v4  ;;  %v7228_v17 = vperm.slane %v1499_v48, %v6088_v41  ;;  %v3427_v52 = vrot.slane %v6276_v33, 4 }
 0x23b   : > { %v3898_v44 = vperm.slane %v3890_v51, %v6110_v8  ;;  %v3899_v34 = vrot.slane %v3886_v42, 4  ;;  %v3902_v49 = vsel %vm768_vm0, %v3886_v42, %v3901_v58  ;;  %v3426_v7 = vsel %vm768_vm0, %v3425_v24, %v6276_v33  ;;  %v7255_v24 = vpop.permute.xlu0 %2633 }
 0x23c   : > { %v3888_v35 = vsel %vm768_vm0, %v3887_v19, %v3869_v27  ;;  %v3910_v50 = vperm.slane %v3902_v49, %v6110_v8  ;;  %v3428_v25 = vsel %vm768_vm0, %v2682_v46, %v3427_v52  ;;  %v1453_v29 = vsel %vm768_vm0, %v1452_v55, %v648_v14 }
 0x23d   : > { %v3894_v62 = vperm.slane %v3888_v35, %v6110_v8  ;;  %v3900_v4 = vsel %vm768_vm0, %v3899_v34, %v3880_v43  ;;  %v3917_v48 = vrot.slane %v3898_v44, 4  ;;  %v1522_v47 = vrot.slane %v7222_v23, 4 }
 0x23e   : > { %v3906_v33 = vperm.slane %v3900_v4, %v6110_v8  ;;  %v3915_v27 = vrot.slane %v3910_v50, 4  ;;  %v7248_v20 = vperm.slane %v3426_v7, %v6088_v41  ;;  %v1454_v46 = vrot.slane %v648_v14, 4 }
 0x23f   : > { %v3913_v58 = vrot.slane %v3894_v62, 4  ;;  %v3918_v55 = vsel %vm768_vm0, %v3910_v50, %v3917_v48  ;;  %v7252_v42 = vperm.slane %v3428_v25, %v6088_v41  ;;  %v1459_v43 = vperm.slane %v1453_v29, %v6088_v41 }
 0x240   : > { %v3911_v19 = vrot.slane %v3906_v33, 4  ;;  %v3916_v51 = vsel %vm768_vm0, %v3915_v27, %v3898_v44  ;;  %4565 = vst.msk [vmem:[%s6281_s24 + $0x1a0] sm:$0xff] %vm2528_vm1, %v3918_v55  ;;  %v1455_v14 = vsel %vm768_vm0, %v7027_v31, %v1454_v46  ;;  %v3483_v52 = vrot.slane %v6489_v12, 4  ;;  %v2716_v55 = vpop.permute.xlu1 %2715 }
 0x241   : > { %v3914_v34 = vsel %vm768_vm0, %v3906_v33, %v3913_v58  ;;  %4549 = vst.msk [vmem:[%s6281_s24 + $0x120] sm:$0xff] %vm2528_vm1, %v3916_v51  ;;  %v1463_v49 = vperm.slane %v1455_v14, %v6088_v41  ;;  %v1464_v7 = vrot.slane %v1459_v43, 4  ;;  %v1467_v35 = vsel %vm768_vm0, %v1459_v43, %v1466_v56 }
 0x242   : > { %v3912_v50 = vsel %vm768_vm0, %v3911_v19, %v3894_v62  ;;  %4533 = vst.msk [vmem:[%s6281_s24 + $0xa0] sm:$0xff] %vm2528_vm1, %v3914_v34  ;;  %v1534_v44 = vrot.slane %v7228_v17, 4  ;;  %v1475_v25 = vperm.slane %v1467_v35, %v6110_v8  ;;  %v3484_v31 = vsel %vm768_vm0, %v7224_v54, %v3483_v52  ;;  %v7281_v62 = vpop.permute.xlu2 %731 }
 0x243   : > { %4517 = vst.msk [vmem:[%s6281_s24 + $0x20] sm:$0xff] %vm2528_vm1, %v3912_v50  ;;  %v1465_v29 = vsel %vm768_vm0, %v1464_v7, %v7165_v0  ;;  %v1476_v4 = vrot.slane %v1463_v49, 4  ;;  %v1479_v48 = vsel %vm768_vm0, %v1463_v49, %v1478_v39  ;;  %v3481_v56 = vrot.slane %v7224_v54, 4 }
 0x244   : > { %v1471_v27 = vperm.slane %v1465_v29, %v6110_v8  ;;  %v1487_v46 = vperm.slane %v1479_v48, %v6110_v8  ;;  %v1490_v58 = vrot.slane %v1475_v25, 4  ;;  %v7290_v19 = vperm.slane %v3484_v31, %v6088_v41 }
 0x245   : > { %v1477_v0 = vsel %vm768_vm0, %v1476_v4, %v7158_v10  ;;  %v1060_v39 = vrot.slane %v7231_v21, 4  ;;  %v3482_v7 = vsel %vm768_vm0, %v3481_v56, %v6489_v12  ;;  %v1063_v12 = vsel %vm768_vm0, %v7231_v21, %v1062_v5  ;;  %v682_v56 = vpop.permute.xlu0 %681 }
 0x246   : > { %v1483_v54 = vperm.slane %v1477_v0, %v6110_v8  ;;  %v1488_v51 = vrot.slane %v1471_v27, 4  ;;  %v1491_v14 = vsel %vm768_vm0, 0.0, %v1490_v58  ;;  %v1494_v52 = vrot.slane %v1487_v46, 4 }
 0x247   : > { %v2312_v34 = vsel %vm768_vm0, %v1490_v58, %v1471_v27  ;;  %v2317_v49 = vrot.slane %v1491_v14, 4  ;;  %v1061_v10 = vsel %vm768_vm0, %v1060_v39, %v7074_v16  ;;  %v1071_v16 = vperm.slane %v1063_v12, %v6088_v41 }
 0x248   : > { %v1489_v35 = vsel %vm768_vm0, 0.0, %v1488_v51  ;;  %v1492_v50 = vrot.slane %v1483_v54, 4  ;;  %v1495_v25 = vsel %vm768_vm0, 0.0, %v1494_v52  ;;  %v2316_v31 = vperm.slane %v2312_v34, %v6088_v41 }
 0x249   : > { %v2318_v29 = vsel %vm768_vm0, %v2317_v49, %v1489_v35  ;;  %v2323_v4 = vsel %vm768_vm0, %v1494_v52, %v1483_v54  ;;  %v2328_v48 = vrot.slane %v1495_v25, 4  ;;  %v7314_v51 = vperm.slane %v3482_v7, %v6088_v41 }
 0x24a   : > { %v1493_v27 = vsel %vm768_vm0, 0.0, %v1492_v50  ;;  %v2322_v46 = vperm.slane %v2318_v29, %v6088_v41  ;;  %v2327_v58 = vperm.slane %v2323_v4, %v6088_v41  ;;  %v2336_v0 = vrot.slane %v2316_v31, 4  ;;  %v7325_v7 = vpop.permute.xlu2 %2717 }
 0x24b   : > { %v2329_v39 = vsel %vm768_vm0, %v2328_v48, %v1493_v27  ;;  %v7317_v54 = vperm.slane %v1061_v10, %v6088_v41  ;;  %v1084_v35 = vrot.slane %v1071_v16, 4  ;;  %v3045_v4 = vrot.slane %v2716_v55, 4  ;;  %v7329_v48 = vpop.permute.xlu1 %649 }
 0x24c   : > { %v2333_v5 = vperm.slane %v2329_v39, %v6088_v41  ;;  %v2334_v21 = vrot.slane %v2322_v46, 4  ;;  %v2337_v14 = vsel %vm768_vm0, %v2322_v46, %v2336_v0  ;;  %v2348_v52 = vrot.slane %v2327_v58, 4 }
 0x24d   : > { %v2345_v34 = vperm.slane %v2337_v14, %v6110_v8  ;;  %v1072_v49 = vrot.slane %v7317_v54, 4  ;;  %v3048_v0 = vsel %vm768_vm0, %v2716_v55, %v3047_v38  ;;  %v2668_v9 = vpop.permute.xlu0 %2667 }
 0x24e   : > { %v2335_v10 = vsel %vm768_vm0, %v2334_v21, %v2316_v31  ;;  %v2346_v25 = vrot.slane %v2333_v5, 4  ;;  %v2349_v29 = vsel %vm768_vm0, %v2333_v5, %v2348_v52  ;;  %v3046_v31 = vsel %vm768_vm0, %v3045_v4, %v7141_v61 }
 0x24f   : > { %v2341_v12 = vperm.slane %v2335_v10, %v6110_v8  ;;  %v2357_v27 = vperm.slane %v2349_v29, %v6110_v8  ;;  %v2364_v46 = vrot.slane %v2345_v34, 4  ;;  %v7340_v21 = vperm.slane %v3048_v0, %v6088_v41 }
 0x250   : > { %v2347_v39 = vsel %vm768_vm0, %v2346_v25, %v2327_v58  ;;  %v1050_v5 = vrot.slane %v6317_v36, 4  ;;  %v3052_v55 = vperm.slane %v3046_v31, %v6088_v41  ;;  %v1048_v61 = vrot.slane %v682_v56, 4 }
 0x251   : > { %v2353_v14 = vperm.slane %v2347_v39, %v6110_v8  ;;  %v2360_v52 = vrot.slane %v2341_v12, 4  ;;  %v2362_v10 = vrot.slane %v2357_v27, 4  ;;  %v2365_v29 = vsel %vm768_vm0, %v2357_v27, %v2364_v46 }
 0x252   : > { %2589 = vst.msk [vmem:[%s6197_s18 + $0x1e0] sm:$0xff] %vm2528_vm1, %v2365_v29  ;;  %v1051_v58 = vsel %vm768_vm0, %v682_v56, %v1050_v5  ;;  %v3057_v27 = vrot.slane %v3052_v55, 4  ;;  %v3069_v46 = vrot.slane %v7340_v21, 4  ;;  %v1049_v31 = vsel %vm768_vm0, %v1048_v61, %v6317_v36 }
 0x253   : > { %v2358_v25 = vrot.slane %v2353_v14, 4  ;;  %v2361_v4 = vsel %vm768_vm0, %v2353_v14, %v2360_v52  ;;  %v2363_v0 = vsel %vm768_vm0, %v2362_v10, %v2345_v34  ;;  %v1059_v39 = vperm.slane %v1051_v58, %v6088_v41 }
 0x254   : > { %2557 = vst.msk [vmem:[%s6197_s18 + $0xe0] sm:$0xff] %vm2528_vm1, %v2361_v4  ;;  %v1055_v5 = vperm.slane %v1049_v31, %v6088_v41  ;;  %v1510_v10 = vrot.slane %v7329_v48, 4  ;;  %v3035_v58 = vrot.slane %v6355_v15, 4  ;;  %v3033_v36 = vrot.slane %v2668_v9, 4 }
 0x255   : > { %v2359_v56 = vsel %vm768_vm0, %v2358_v25, %v2341_v12  ;;  %2573 = vst.msk [vmem:[%s6197_s18 + $0x160] sm:$0xff] %vm2528_vm1, %v2363_v0  ;;  %v1085_v34 = vsel %vm768_vm0, %v1084_v35, %v1059_v39  ;;  %v1086_v14 = vrot.slane %v1059_v39, 4  ;;  %v7371_v25 = vpop.permute.xlu2 %651  ;;  %v1106_v0 = vrot.slane %v6577_v13, 4 }
 0x256   : > { %2541 = vst.msk [vmem:[%s6197_s18 + $0x60] sm:$0xff] %vm2528_vm1, %v2359_v56  ;;  %v1091_v52 = vperm.slane %v1085_v34, %v6110_v8  ;;  %v1073_v61 = vsel %vm768_vm0, %v1072_v49, %v1055_v5  ;;  %v1074_v4 = vrot.slane %v1055_v5, 4  ;;  %v3034_v56 = vsel %vm768_vm0, %v3033_v36, %v6355_v15  ;;  %v7378_v34 = vpop.permute.xlu1 %2635 }
 0x257   : > { %v1087_v12 = vsel %vm768_vm0, %v1071_v16, %v1086_v14  ;;  %v1079_v35 = vperm.slane %v1073_v61, %v6110_v8  ;;  %v3036_v5 = vsel %vm768_vm0, %v2668_v9, %v3035_v58  ;;  %v3040_v16 = vperm.slane %v3034_v56, %v6088_v41 }
 0x258   : > { %v1095_v39 = vperm.slane %v1087_v12, %v6110_v8  ;;  %v1100_v31 = vrot.slane %v1091_v52, 4  ;;  %v1075_v49 = vsel %vm768_vm0, %v7317_v54, %v1074_v4  ;;  %v3044_v33 = vperm.slane %v3036_v5, %v6088_v41 }
 0x259   : > { %v1083_v11 = vperm.slane %v1075_v49, %v6110_v8  ;;  %v1096_v61 = vrot.slane %v1079_v35, 4  ;;  %v3058_v15 = vsel %vm768_vm0, %v3057_v27, %v3040_v16  ;;  %v3059_v36 = vrot.slane %v3040_v16, 4 }
 0x25a   : > { %v1101_v12 = vsel %vm768_vm0, 0.0, %v1100_v31  ;;  %v1102_v43 = vrot.slane %v1095_v39, 4  ;;  %v3064_v39 = vperm.slane %v3058_v15, %v6110_v8 }
 0x25b   : > { %v1097_v54 = vsel %vm768_vm0, 0.0, %v1096_v61  ;;  %v1098_v9 = vrot.slane %v1083_v11, 4  ;;  %v3060_v31 = vsel %vm768_vm0, %v3052_v55, %v3059_v36  ;;  %v3070_v61 = vsel %vm768_vm0, %v3069_v46, %v3044_v33  ;;  %v746_v11 = vpop.permute.xlu0 %745 }
 0x25c   : > { %v1103_v58 = vsel %vm768_vm0, 0.0, %v1102_v43  ;;  %v1945_v4 = vsel %vm768_vm0, %v1102_v43, %v1091_v52  ;;  %v3068_v16 = vperm.slane %v3060_v31, %v6110_v8  ;;  %v3071_v55 = vrot.slane %v3044_v33, 4 }
 0x25d   : > { %v1949_v56 = vperm.slane %v1945_v4, %v6088_v41  ;;  %v1950_v49 = vrot.slane %v1103_v58, 4  ;;  %v1099_v5 = vsel %vm768_vm0, 0.0, %v1098_v9  ;;  %v1934_v27 = vsel %vm768_vm0, %v1098_v9, %v1079_v35 }
 0x25e   : > { %v1938_v50 = vperm.slane %v1934_v27, %v6088_v41  ;;  %v1939_v14 = vrot.slane %v1099_v5, 4  ;;  %v3076_v15 = vperm.slane %v3070_v61, %v6110_v8  ;;  %v3081_v36 = vrot.slane %v3064_v39, 4 }
 0x25f   : > { %v1951_v43 = vsel %vm768_vm0, %v1950_v49, %v1101_v12  ;;  %v1970_v52 = vrot.slane %v1949_v56, 4  ;;  %v3083_v9 = vrot.slane %v3068_v16, 4  ;;  %v1508_v31 = vrot.slane %v746_v11, 4 }
 0x260   : > { %v1955_v58 = vperm.slane %v1951_v43, %v6088_v41  ;;  %v1940_v4 = vsel %vm768_vm0, %v1939_v14, %v1097_v54  ;;  %v1958_v35 = vrot.slane %v1938_v50, 4  ;;  %v3072_v12 = vsel %vm768_vm0, %v7340_v21, %v3071_v55 }
 0x261   : > { %v1944_v46 = vperm.slane %v1940_v4, %v6088_v41  ;;  %v3080_v33 = vperm.slane %v3072_v12, %v6110_v8  ;;  %v3082_v5 = vsel %vm768_vm0, 0.0, %v3081_v36  ;;  %v3084_v61 = vsel %vm768_vm0, 0.0, %v3083_v9 }
 0x262   : > { %v1968_v29 = vrot.slane %v1955_v58, 4  ;;  %v1971_v27 = vsel %vm768_vm0, %v1955_v58, %v1970_v52  ;;  %v3085_v43 = vrot.slane %v3076_v15, 4  ;;  %v3919_v36 = vsel %vm768_vm0, %v3083_v9, %v3064_v39 }
 0x263   : > { %v1979_v49 = vperm.slane %v1971_v27, %v6110_v8  ;;  %v1956_v14 = vrot.slane %v1944_v46, 4  ;;  %v1959_v54 = vsel %vm768_vm0, %v1944_v46, %v1958_v35  ;;  %v3087_v55 = vrot.slane %v3080_v33, 4 }
 0x264   : > { %v1969_v16 = vsel %vm768_vm0, %v1968_v29, %v1949_v56  ;;  %v1967_v52 = vperm.slane %v1959_v54, %v6110_v8  ;;  %v3086_v27 = vsel %vm768_vm0, 0.0, %v3085_v43  ;;  %v3924_v12 = vrot.slane %v3084_v61, 4 }
 0x265   : > { %v1975_v58 = vperm.slane %v1969_v16, %v6110_v8  ;;  %v1984_v21 = vrot.slane %v1979_v49, 4  ;;  %v1957_v4 = vsel %vm768_vm0, %v1956_v14, %v1938_v50  ;;  %v3088_v46 = vsel %vm768_vm0, 0.0, %v3087_v55 }
 0x266   : > { %v1963_v38 = vperm.slane %v1957_v4, %v6110_v8  ;;  %v1986_v56 = vrot.slane %v1967_v52, 4  ;;  %v3923_v33 = vperm.slane %v3919_v36, %v6088_v41  ;;  %v3925_v50 = vsel %vm768_vm0, %v3924_v12, %v3082_v5 }
 0x267   : > { %v1980_v35 = vrot.slane %v1975_v58, 4  ;;  %v1985_v29 = vsel %vm768_vm0, %v1984_v21, %v1967_v52  ;;  %v3930_v14 = vsel %vm768_vm0, %v3087_v55, %v3076_v15  ;;  %v3929_v54 = vperm.slane %v3925_v50, %v6088_v41 }
 0x268   : > { %2566 = vst.msk [vmem:[%s6197_s18 + $0x128] sm:$0xff] %vm2528_vm1, %v1985_v29  ;;  %v1982_v9 = vrot.slane %v1963_v38, 4  ;;  %v1987_v61 = vsel %vm768_vm0, %v1979_v49, %v1986_v56  ;;  %v3934_v16 = vperm.slane %v3930_v14, %v6088_v41  ;;  %v3935_v43 = vrot.slane %v3088_v46, 4  ;;  %v7458_v56 = vpop.permute.xlu2 %2637 }
 0x269   : > { %v1981_v39 = vsel %vm768_vm0, %v1980_v35, %v1963_v38  ;;  %v3943_v52 = vrot.slane %v3923_v33, 4  ;;  %v1509_v21 = vsel %vm768_vm0, %v1508_v31, %v7329_v48  ;;  %2582 = vst.msk [vmem:[%s6197_s18 + $0x1a8] sm:$0xff] %vm2528_vm1, %v1987_v61  ;;  %v3941_v15 = vrot.slane %v3929_v54, 4 }
 0x26a   : > { %2534 = vst.msk [vmem:[%s6197_s18 + $0x28] sm:$0xff] %vm2528_vm1, %v1981_v39  ;;  %v1983_v5 = vsel %vm768_vm0, %v1975_v58, %v1982_v9  ;;  %v1511_v38 = vsel %vm768_vm0, %v746_v11, %v1510_v10  ;;  %v1515_v49 = vperm.slane %v1509_v21, %v6088_v41  ;;  %v3936_v55 = vsel %vm768_vm0, %v3935_v43, %v3086_v27 }
 0x26b   : > { %2550 = vst.msk [vmem:[%s6197_s18 + $0xa8] sm:$0xff] %vm2528_vm1, %v1983_v5  ;;  %v3944_v4 = vsel %vm768_vm0, %v3929_v54, %v3943_v52  ;;  %v3955_v36 = vrot.slane %v3934_v16, 4  ;;  %v1519_v31 = vperm.slane %v1511_v38, %v6088_v41  ;;  %v3940_v58 = vperm.slane %v3936_v55, %v6088_v41  ;;  %v684_v54 = vpop.permute.xlu1 %683 }
 0x26c   : > { %v3942_v12 = vsel %vm768_vm0, %v3941_v15, %v3923_v33  ;;  %v3952_v35 = vperm.slane %v3944_v4, %v6110_v8  ;;  %v1520_v48 = vrot.slane %v1515_v49, 4  ;;  %v1523_v11 = vsel %vm768_vm0, %v1515_v49, %v1522_v47 }
 0x26d   : > { %v3948_v10 = vperm.slane %v3942_v12, %v6110_v8  ;;  %v1532_v29 = vrot.slane %v1519_v31, 4  ;;  %v1535_v27 = vsel %vm768_vm0, %v1519_v31, %v1534_v44  ;;  %v3953_v46 = vrot.slane %v3940_v58, 4 }
 0x26e   : > { %v3956_v50 = vsel %vm768_vm0, %v3940_v58, %v3955_v36  ;;  %v3971_v33 = vrot.slane %v3952_v35, 4  ;;  %v1521_v14 = vsel %vm768_vm0, %v1520_v48, %v7222_v23  ;;  %v1531_v61 = vperm.slane %v1523_v11, %v6110_v8 }
 0x26f   : > { %v3964_v39 = vperm.slane %v3956_v50, %v6110_v8  ;;  %v3967_v9 = vrot.slane %v3948_v10, 4  ;;  %v1527_v47 = vperm.slane %v1521_v14, %v6110_v8  ;;  %v3954_v44 = vsel %vm768_vm0, %v3953_v46, %v3934_v16 }
 0x270   : > { %v1533_v43 = vsel %vm768_vm0, %v1532_v29, %v7228_v17  ;;  %v1543_v52 = vperm.slane %v1535_v27, %v6110_v8  ;;  %v3551_v21 = vrot.slane %v7458_v56, 4  ;;  %v3960_v23 = vperm.slane %v3954_v44, %v6110_v8 }
 0x271   : > { %v3969_v5 = vrot.slane %v3964_v39, 4  ;;  %v3972_v15 = vsel %vm768_vm0, %v3964_v39, %v3971_v33  ;;  %v1539_v38 = vperm.slane %v1533_v43, %v6110_v8  ;;  %v1544_v49 = vrot.slane %v1527_v47, 4  ;;  %v636_v33 = vpop.permute.xlu0 %635 }
 0x272   : > { %4566 = vst.msk [vmem:[%s6281_s24 + $0x1a8] sm:$0xff] %vm2528_vm1, %v3972_v15  ;;  %v1546_v16 = vrot.slane %v1531_v61, 4  ;;  %v1550_v55 = vrot.slane %v1543_v52, 4  ;;  %v1104_v4 = vrot.slane %v684_v54, 4  ;;  %v3965_v17 = vrot.slane %v3960_v23, 4 }
 0x273   : > { %v3968_v36 = vsel %vm768_vm0, %v3960_v23, %v3967_v9  ;;  %v3970_v31 = vsel %vm768_vm0, %v3969_v5, %v3952_v35  ;;  %v1548_v58 = vrot.slane %v1539_v38, 4  ;;  %v1545_v12 = vsel %vm768_vm0, 0.0, %v1544_v49 }
 0x274   : > { %4534 = vst.msk [vmem:[%s6281_s24 + $0xa8] sm:$0xff] %vm2528_vm1, %v3968_v36  ;;  %v1547_v48 = vsel %vm768_vm0, 0.0, %v1546_v16  ;;  %v1551_v11 = vsel %vm768_vm0, 0.0, %v1550_v55  ;;  %v2366_v29 = vsel %vm768_vm0, %v1546_v16, %v1527_v47  ;;  %v3966_v27 = vsel %vm768_vm0, %v3965_v17, %v3948_v10 }
 0x275   : > { %4550 = vst.msk [vmem:[%s6281_s24 + $0x128] sm:$0xff] %vm2528_vm1, %v3970_v31  ;;  %v1549_v46 = vsel %vm768_vm0, 0.0, %v1548_v58  ;;  %v2370_v50 = vperm.slane %v2366_v29, %v6088_v41  ;;  %v2371_v35 = vrot.slane %v1547_v48, 4  ;;  %v2377_v14 = vsel %vm768_vm0, %v1550_v55, %v1539_v38 }
 0x276   : > { %4518 = vst.msk [vmem:[%s6281_s24 + $0x28] sm:$0xff] %vm2528_vm1, %v3966_v27  ;;  %v2382_v39 = vrot.slane %v1551_v11, 4  ;;  %v1105_v9 = vsel %vm768_vm0, %v1104_v4, %v6577_v13  ;;  %v1107_v10 = vsel %vm768_vm0, %v684_v54, %v1106_v0  ;;  %v2381_v61 = vperm.slane %v2377_v14, %v6088_v41 }
 0x277   : > { %v2372_v47 = vsel %vm768_vm0, %v2371_v35, %v1545_v12  ;;  %v2390_v44 = vrot.slane %v2370_v50, 4  ;;  %v1111_v43 = vperm.slane %v1105_v9, %v6088_v41  ;;  %v1115_v5 = vperm.slane %v1107_v10, %v6088_v41 }
 0x278   : > { %v2376_v52 = vperm.slane %v2372_v47, %v6088_v41  ;;  %v2383_v23 = vsel %vm768_vm0, %v2382_v39, %v1549_v46  ;;  %v8643_v15 = vrot.slane %v7281_v62, 4  ;;  %v2402_v0 = vrot.slane %v2381_v61, 4 }
 0x279   : > { %v2387_v13 = vperm.slane %v2383_v23, %v6088_v41  ;;  %v1130_v54 = vrot.slane %v1111_v43, 4  ;;  %v1118_v49 = vrot.slane %v636_v33, 4  ;;  %v1142_v4 = vrot.slane %v1115_v5, 4 }
 0x27a   : > { %v1117_v38 = vsel %vm768_vm0, %v8643_v15, %v636_v33  ;;  %v2388_v16 = vrot.slane %v2376_v52, 4  ;;  %v2391_v55 = vsel %vm768_vm0, %v2376_v52, %v2390_v44 }
 0x27b   : > { %v1123_v17 = vperm.slane %v1117_v38, %v6088_v41  ;;  %v2399_v36 = vperm.slane %v2391_v55, %v6110_v8  ;;  %v2400_v31 = vrot.slane %v2387_v13, 4  ;;  %v2403_v58 = vsel %vm768_vm0, %v2387_v13, %v2402_v0 }
 0x27c   : > { %v1119_v12 = vsel %vm768_vm0, %v7281_v62, %v1118_v49  ;;  %v2389_v48 = vsel %vm768_vm0, %v2388_v16, %v2370_v50  ;;  %v2411_v11 = vperm.slane %v2403_v58, %v6110_v8  ;;  %v686_v49 = vpop.permute.xlu2 %685 }
 0x27d   : > { %v1127_v29 = vperm.slane %v1119_v12, %v6088_v41  ;;  %v1128_v27 = vrot.slane %v1123_v17, 4  ;;  %v2395_v46 = vperm.slane %v2389_v48, %v6110_v8  ;;  %v2401_v35 = vsel %vm768_vm0, %v2400_v31, %v2381_v61 }
 0x27e   : > { %v2418_v33 = vrot.slane %v2399_v36, 4  ;;  %v1131_v14 = vsel %vm768_vm0, %v1123_v17, %v1130_v54  ;;  %v2407_v39 = vperm.slane %v2401_v35, %v6110_v8  ;;  %v2416_v9 = vrot.slane %v2411_v11, 4 }
 0x27f   : > { %v1129_v62 = vsel %vm768_vm0, %v1128_v27, %v1111_v43  ;;  %v1139_v50 = vperm.slane %v1131_v14, %v6110_v8  ;;  %v2414_v10 = vrot.slane %v2395_v46, 4  ;;  %v1140_v52 = vrot.slane %v1127_v29, 4  ;;  %v2670_v27 = vpop.permute.xlu1 %2669 }
 0x280   : > { %v2419_v47 = vsel %vm768_vm0, %v2411_v11, %v2418_v33  ;;  %v1135_v44 = vperm.slane %v1129_v62, %v6110_v8  ;;  %v2412_v23 = vrot.slane %v2407_v39, 4  ;;  %v2417_v61 = vsel %vm768_vm0, %v2416_v9, %v2399_v36 }
 0x281   : > { %2590 = vst.msk [vmem:[%s6197_s18 + $0x1e8] sm:$0xff] %vm2528_vm1, %v2419_v47  ;;  %v1143_v15 = vsel %vm768_vm0, %v1127_v29, %v1142_v4  ;;  %v1154_v38 = vrot.slane %v1139_v50, 4  ;;  %v2415_v43 = vsel %vm768_vm0, %v2407_v39, %v2414_v10  ;;  %v1141_v13 = vsel %vm768_vm0, %v1140_v52, %v1115_v5 }
 0x282   : > { %2574 = vst.msk [vmem:[%s6197_s18 + $0x168] sm:$0xff] %vm2528_vm1, %v2417_v61  ;;  %v1151_v0 = vperm.slane %v1143_v15, %v6110_v8  ;;  %v1152_v54 = vrot.slane %v1135_v44, 4  ;;  %v2413_v16 = vsel %vm768_vm0, %v2412_v23, %v2395_v46  ;;  %v1147_v55 = vperm.slane %v1141_v13, %v6110_v8  ;;  %v2622_v23 = vpop.permute.xlu0 %2621 }
 0x283   : > { %2558 = vst.msk [vmem:[%s6197_s18 + $0xe8] sm:$0xff] %vm2528_vm1, %v2415_v43  ;;  %v1155_v17 = vsel %vm768_vm0, 0.0, %v1154_v38  ;;  %v1988_v4 = vsel %vm768_vm0, %v1154_v38, %v1135_v44  ;;  %v1162_v48 = vrot.slane %v6708_v63, 4  ;;  %v1160_v11 = vrot.slane %v686_v49, 4 }
 0x284   : > { %2542 = vst.msk [vmem:[%s6197_s18 + $0x68] sm:$0xff] %vm2528_vm1, %v2413_v16  ;;  %v1153_v36 = vsel %vm768_vm0, 0.0, %v1152_v54  ;;  %v1158_v31 = vrot.slane %v1151_v0, 4  ;;  %v1992_v5 = vperm.slane %v1988_v4, %v6088_v41  ;;  %v1993_v58 = vrot.slane %v1155_v17, 4 }
 0x285   : > { %v1156_v12 = vrot.slane %v1147_v55, 4  ;;  %v3091_v29 = vrot.slane %v6634_v60, 4  ;;  %v1161_v10 = vsel %vm768_vm0, %v1160_v11, %v6708_v63  ;;  %v1163_v47 = vsel %vm768_vm0, %v686_v49, %v1162_v48 }
 0x286   : > { %v1159_v46 = vsel %vm768_vm0, 0.0, %v1158_v31  ;;  %v1994_v35 = vsel %vm768_vm0, %v1993_v58, %v1153_v36  ;;  %v1999_v33 = vsel %vm768_vm0, %v1158_v31, %v1147_v55  ;;  %v2012_v14 = vrot.slane %v1992_v5, 4 }
 0x287   : > { %v1157_v39 = vsel %vm768_vm0, 0.0, %v1156_v12  ;;  %v1998_v9 = vperm.slane %v1994_v35, %v6088_v41  ;;  %v2003_v62 = vperm.slane %v1999_v33, %v6088_v41  ;;  %v2004_v50 = vrot.slane %v1159_v46, 4 }
 0x288   : > { %v3089_v44 = vrot.slane %v2670_v27, 4  ;;  %v3092_v52 = vsel %vm768_vm0, %v2670_v27, %v3091_v29  ;;  %v7560_v54 = vperm.slane %v1161_v10, %v6088_v41  ;;  %v7563_v63 = vperm.slane %v1163_v47, %v6088_v41  ;;  %v2672_v29 = vpop.permute.xlu2 %2671 }
 0x289   : > { %v2005_v61 = vsel %vm768_vm0, %v2004_v50, %v1157_v39  ;;  %v2010_v15 = vrot.slane %v1998_v9, 4  ;;  %v2013_v38 = vsel %vm768_vm0, %v1998_v9, %v2012_v14  ;;  %v2024_v43 = vrot.slane %v2003_v62, 4 }
 0x28a   : > { %v2009_v13 = vperm.slane %v2005_v61, %v6088_v41  ;;  %v2021_v0 = vperm.slane %v2013_v38, %v6110_v8  ;;  %v3090_v16 = vsel %vm768_vm0, %v3089_v44, %v6634_v60  ;;  %v3100_v55 = vperm.slane %v3092_v52, %v6088_v41 }
 0x28b   : > { %v2011_v49 = vsel %vm768_vm0, %v2010_v15, %v1992_v5  ;;  %v8644_v17 = vrot.slane %v7325_v7, 4  ;;  %v1186_v5 = vrot.slane %v7560_v54, 4  ;;  %v1198_v11 = vrot.slane %v7563_v63, 4 }
 0x28c   : > { %v2017_v36 = vperm.slane %v2011_v49, %v6110_v8  ;;  %v2022_v31 = vrot.slane %v2009_v13, 4  ;;  %v2025_v58 = vsel %vm768_vm0, %v2009_v13, %v2024_v43  ;;  %v2040_v12 = vrot.slane %v2021_v0, 4  ;;  %v748_v49 = vpop.permute.xlu1 %747 }
 0x28d   : > { %v3102_v4 = vsel %vm768_vm0, %v8644_v17, %v2622_v23  ;;  %v2033_v48 = vperm.slane %v2025_v58, %v6110_v8  ;;  %v3096_v60 = vperm.slane %v3090_v16, %v6088_v41  ;;  %v3127_v35 = vrot.slane %v3100_v55, 4 }
 0x28e   : > { %v2023_v27 = vsel %vm768_vm0, %v2022_v31, %v2003_v62  ;;  %v2036_v46 = vrot.slane %v2017_v36, 4  ;;  %v3103_v33 = vrot.slane %v2622_v23, 4  ;;  %v3108_v47 = vperm.slane %v3102_v4, %v6088_v41 }
 0x28f   : > { %v2029_v14 = vperm.slane %v2023_v27, %v6110_v8  ;;  %v2038_v39 = vrot.slane %v2033_v48, 4  ;;  %v2041_v9 = vsel %vm768_vm0, %v2033_v48, %v2040_v12  ;;  %v3115_v50 = vrot.slane %v3096_v60, 4 }
 0x290   : > { %2583 = vst.msk [vmem:[%s6197_s18 + $0x1b0] sm:$0xff] %vm2528_vm1, %v2041_v9  ;;  %v3104_v10 = vsel %vm768_vm0, %v7325_v7, %v3103_v33  ;;  %v3147_v62 = vrot.slane %v6838_v59, 4  ;;  %v3145_v44 = vrot.slane %v2672_v29, 4  ;;  %v3113_v38 = vrot.slane %v3108_v47, 4 }
 0x291   : > { %v2034_v52 = vrot.slane %v2029_v14, 4  ;;  %v2037_v23 = vsel %vm768_vm0, %v2029_v14, %v2036_v46  ;;  %v2039_v61 = vsel %vm768_vm0, %v2038_v39, %v2021_v0  ;;  %v3112_v15 = vperm.slane %v3104_v10, %v6088_v41 }
 0x292   : > { %2551 = vst.msk [vmem:[%s6197_s18 + $0xb0] sm:$0xff] %vm2528_vm1, %v2037_v23  ;;  %v3116_v43 = vsel %vm768_vm0, %v3108_v47, %v3115_v50  ;;  %v3146_v7 = vsel %vm768_vm0, %v3145_v44, %v6838_v59  ;;  %v3148_v13 = vsel %vm768_vm0, %v2672_v29, %v3147_v62  ;;  %v3114_v31 = vsel %vm768_vm0, %v3113_v38, %v3096_v60  ;;  %v700_v38 = vpop.permute.xlu0 %699 }
 0x293   : > { %v2035_v16 = vsel %vm768_vm0, %v2034_v52, %v2017_v36  ;;  %2567 = vst.msk [vmem:[%s6197_s18 + $0x130] sm:$0xff] %vm2528_vm1, %v2039_v61  ;;  %v3124_v17 = vperm.slane %v3116_v43, %v6110_v8  ;;  %v3125_v0 = vrot.slane %v3112_v15, 4  ;;  %v3128_v4 = vsel %vm768_vm0, %v3112_v15, %v3127_v35 }
 0x294   : > { %2535 = vst.msk [vmem:[%s6197_s18 + $0x30] sm:$0xff] %vm2528_vm1, %v2035_v16  ;;  %v3136_v58 = vperm.slane %v3128_v4, %v6110_v8  ;;  %v7606_v59 = vperm.slane %v3146_v7, %v6088_v41  ;;  %v7609_v12 = vperm.slane %v3148_v13, %v6088_v41  ;;  %v3120_v36 = vperm.slane %v3114_v31, %v6110_v8 }
 0x295   : > { %v3126_v48 = vsel %vm768_vm0, %v3125_v0, %v3100_v55  ;;  %v3139_v29 = vrot.slane %v3124_v17, 4  ;;  %v1564_v27 = vrot.slane %v748_v49, 4  ;;  %v8645_v61 = vrot.slane %v7371_v25, 4  ;;  %v7630_v17 = vpop.permute.xlu2 %749 }
 0x296   : > { %v3132_v46 = vperm.slane %v3126_v48, %v6110_v8  ;;  %v3143_v35 = vrot.slane %v3136_v58, 4  ;;  %v3171_v33 = vrot.slane %v7606_v59, 4  ;;  %v3183_v60 = vrot.slane %v7609_v12, 4 }
 0x297   : > { %v3137_v14 = vrot.slane %v3120_v36, 4  ;;  %v3140_v39 = vsel %vm768_vm0, 0.0, %v3139_v29  ;;  %v3973_v9 = vsel %vm768_vm0, %v3139_v29, %v3120_v36  ;;  %v1565_v50 = vsel %vm768_vm0, %v1564_v27, %v7371_v25 }
 0x298   : > { %v3141_v10 = vrot.slane %v3132_v46, 4  ;;  %v3144_v55 = vsel %vm768_vm0, 0.0, %v3143_v35  ;;  %v3977_v47 = vperm.slane %v3973_v9, %v6088_v41  ;;  %v3978_v62 = vrot.slane %v3140_v39, 4 }
 0x299   : > { %v3138_v44 = vsel %vm768_vm0, 0.0, %v3137_v14  ;;  %v3984_v52 = vsel %vm768_vm0, %v3143_v35, %v3132_v46  ;;  %v3989_v23 = vrot.slane %v3144_v55, 4  ;;  %v1567_v15 = vsel %vm768_vm0, %v748_v49, %v8645_v61 }
 0x29a   : > { %v3142_v43 = vsel %vm768_vm0, 0.0, %v3141_v10  ;;  %v3979_v7 = vsel %vm768_vm0, %v3978_v62, %v3138_v44  ;;  %v3988_v13 = vperm.slane %v3984_v52, %v6088_v41  ;;  %v3997_v16 = vrot.slane %v3977_v47, 4 }
 0x29b   : > { %v3983_v0 = vperm.slane %v3979_v7, %v6088_v41  ;;  %v3990_v4 = vsel %vm768_vm0, %v3989_v23, %v3142_v43  ;;  %v1571_v31 = vperm.slane %v1565_v50, %v6088_v41  ;;  %v1575_v25 = vperm.slane %v1567_v15, %v6088_v41 }
 0x29c   : > { %v3994_v49 = vperm.slane %v3990_v4, %v6088_v41  ;;  %v4009_v58 = vrot.slane %v3988_v13, 4  ;;  %v1554_v36 = vrot.slane %v6655_v2, 4  ;;  %v1552_v48 = vrot.slane %v700_v38, 4 }
 0x29d   : > { %v3995_v29 = vrot.slane %v3983_v0, 4  ;;  %v3998_v27 = vsel %vm768_vm0, %v3983_v0, %v3997_v16  ;;  %v1576_v46 = vrot.slane %v1571_v31, 4  ;;  %v1588_v35 = vrot.slane %v1575_v25, 4  ;;  %v7652_v16 = vpop.permute.xlu1 %637 }
 0x29e   : > { %v4006_v14 = vperm.slane %v3998_v27, %v6110_v8  ;;  %v4007_v39 = vrot.slane %v3994_v49, 4  ;;  %v4010_v9 = vsel %vm768_vm0, %v3994_v49, %v4009_v58  ;;  %v1553_v50 = vsel %vm768_vm0, %v1552_v48, %v6655_v2 }
 0x29f   : > { %v3996_v10 = vsel %vm768_vm0, %v3995_v29, %v3977_v47  ;;  %v4018_v55 = vperm.slane %v4010_v9, %v6110_v8  ;;  %v1555_v62 = vsel %vm768_vm0, %v700_v38, %v1554_v36  ;;  %v1559_v44 = vperm.slane %v1553_v50, %v6088_v41  ;;  %v2686_v9 = vpop.permute.xlu0 %2685 }
 0x2a0   : > { %v4002_v52 = vperm.slane %v3996_v10, %v6110_v8  ;;  %v4008_v23 = vsel %vm768_vm0, %v4007_v39, %v3988_v13  ;;  %v4025_v61 = vrot.slane %v4006_v14, 4  ;;  %v1563_v15 = vperm.slane %v1555_v62, %v6088_v41 }
 0x2a1   : > { %v4014_v43 = vperm.slane %v4008_v23, %v6110_v8  ;;  %v4023_v2 = vrot.slane %v4018_v55, 4  ;;  %v1577_v47 = vsel %vm768_vm0, %v1576_v46, %v1559_v44  ;;  %v1578_v7 = vrot.slane %v1559_v44, 4 }
 0x2a2   : > { %v4021_v38 = vrot.slane %v4002_v52, 4  ;;  %v4026_v0 = vsel %vm768_vm0, %v4018_v55, %v4025_v61  ;;  %v1583_v4 = vperm.slane %v1577_v47, %v6110_v8  ;;  %v1589_v13 = vsel %vm768_vm0, %v1588_v35, %v1563_v15  ;;  %v2724_v35 = vpop.permute.xlu2 %2723 }
 0x2a3   : > { %v4019_v49 = vrot.slane %v4014_v43, 4  ;;  %v4024_v58 = vsel %vm768_vm0, %v4023_v2, %v4006_v14  ;;  %4567 = vst.msk [vmem:[%s6281_s24 + $0x1b0] sm:$0xff] %vm2528_vm1, %v4026_v0  ;;  %v1579_v36 = vsel %vm768_vm0, %v1571_v31, %v1578_v7  ;;  %v1590_v48 = vrot.slane %v1563_v15, 4 }
 0x2a4   : > { %v4022_v29 = vsel %vm768_vm0, %v4014_v43, %v4021_v38  ;;  %4551 = vst.msk [vmem:[%s6281_s24 + $0x130] sm:$0xff] %vm2528_vm1, %v4024_v58  ;;  %v1587_v27 = vperm.slane %v1579_v36, %v6110_v8  ;;  %v1595_v46 = vperm.slane %v1589_v13, %v6110_v8  ;;  %v1600_v39 = vrot.slane %v1583_v4, 4 }
 0x2a5   : > { %v4020_v50 = vsel %vm768_vm0, %v4019_v49, %v4002_v52  ;;  %4535 = vst.msk [vmem:[%s6281_s24 + $0xb0] sm:$0xff] %vm2528_vm1, %v4022_v29  ;;  %v1591_v14 = vsel %vm768_vm0, %v1575_v25, %v1590_v48  ;;  %v1620_v31 = vrot.slane %v7630_v17, 4  ;;  %v1174_v10 = vrot.slane %v7652_v16, 4 }
 0x2a6   : > { %4519 = vst.msk [vmem:[%s6281_s24 + $0x30] sm:$0xff] %vm2528_vm1, %v4020_v50  ;;  %v1599_v55 = vperm.slane %v1591_v14, %v6110_v8  ;;  %v1601_v62 = vsel %vm768_vm0, 0.0, %v1600_v39  ;;  %v1602_v44 = vrot.slane %v1587_v27, 4  ;;  %v1604_v23 = vrot.slane %v1595_v46, 4  ;;  %v7697_v14 = vpop.permute.xlu1 %2623 }
 0x2a7   : > { %v3539_v61 = vrot.slane %v6715_v30, 4  ;;  %v3537_v15 = vrot.slane %v2686_v9, 4  ;;  %v3269_v52 = vrot.slane %v2724_v35, 4  ;;  %v8646_v43 = vrot.slane %v6561_v28, 4 }
 0x2a8   : > { %v1603_v2 = vsel %vm768_vm0, 0.0, %v1602_v44  ;;  %v1605_v47 = vsel %vm768_vm0, 0.0, %v1604_v23  ;;  %v1606_v7 = vrot.slane %v1599_v55, 4  ;;  %v2420_v38 = vsel %vm768_vm0, %v1602_v44, %v1583_v4 }
 0x2a9   : > { %v3272_v25 = vsel %vm768_vm0, %v2724_v35, %v8646_v43  ;;  %v2424_v0 = vperm.slane %v2420_v38, %v6088_v41  ;;  %v2425_v13 = vrot.slane %v1603_v2, 4  ;;  %v3538_v49 = vsel %vm768_vm0, %v3537_v15, %v6715_v30 }
 0x2aa   : > { %v3540_v58 = vsel %vm768_vm0, %v2686_v9, %v3539_v61  ;;  %v1607_v36 = vsel %vm768_vm0, 0.0, %v1606_v7  ;;  %v2431_v48 = vsel %vm768_vm0, %v1606_v7, %v1595_v46  ;;  %v7690_v29 = vperm.slane %v3538_v49, %v6088_v41 }
 0x2ab   : > { %v7693_v27 = vperm.slane %v3540_v58, %v6088_v41  ;;  %v2426_v4 = vsel %vm768_vm0, %v2425_v13, %v1601_v62  ;;  %v2435_v39 = vperm.slane %v2431_v48, %v6088_v41  ;;  %v2436_v35 = vrot.slane %v1607_v36, 4 }
 0x2ac   : > { %v2444_v50 = vrot.slane %v2424_v0, 4  ;;  %v2430_v30 = vperm.slane %v2426_v4, %v6088_v41  ;;  %v3563_v9 = vrot.slane %v7690_v29, 4  ;;  %v3270_v55 = vsel %vm768_vm0, %v3269_v52, %v6561_v28 }
 0x2ad   : > { %v3575_v46 = vrot.slane %v7693_v27, 4  ;;  %v2437_v44 = vsel %vm768_vm0, %v2436_v35, %v1605_v47  ;;  %v2456_v23 = vrot.slane %v2435_v39, 4  ;;  %v3276_v62 = vperm.slane %v3270_v55, %v6088_v41 }
 0x2ae   : > { %v3280_v61 = vperm.slane %v3272_v25, %v6088_v41  ;;  %v2441_v15 = vperm.slane %v2437_v44, %v6088_v41  ;;  %v2442_v43 = vrot.slane %v2430_v30, 4  ;;  %v2445_v2 = vsel %vm768_vm0, %v2430_v30, %v2444_v50 }
 0x2af   : > { %v3159_v7 = vrot.slane %v7697_v14, 4  ;;  %v2453_v38 = vperm.slane %v2445_v2, %v6110_v8  ;;  %v3281_v13 = vrot.slane %v3276_v62, 4  ;;  %v8647_v49 = vrot.slane %v6404_v22, 4 }
 0x2b0   : > { %v3293_v52 = vrot.slane %v3280_v61, 4  ;;  %v2443_v47 = vsel %vm768_vm0, %v2442_v43, %v2424_v0  ;;  %v2454_v58 = vrot.slane %v2441_v15, 4  ;;  %v2457_v25 = vsel %vm768_vm0, %v2441_v15, %v2456_v23 }
 0x2b1   : > { %v3284_v28 = vsel %vm768_vm0, %v3276_v62, %v8647_v49  ;;  %v2449_v48 = vperm.slane %v2443_v47, %v6110_v8  ;;  %v2465_v4 = vperm.slane %v2457_v25, %v6110_v8  ;;  %v2472_v35 = vrot.slane %v2453_v38, 4  ;;  %v734_v62 = vpop.permute.xlu0 %733 }
 0x2b2   : > { %v3292_v36 = vperm.slane %v3284_v28, %v6110_v8  ;;  %v3282_v50 = vsel %vm768_vm0, %v3281_v13, %v6404_v22  ;;  %v2455_v30 = vsel %vm768_vm0, %v2454_v58, %v2435_v39  ;;  %v3294_v0 = vsel %vm768_vm0, %v3293_v52, %v6423_v26 }
 0x2b3   : > { %v3288_v55 = vperm.slane %v3282_v50, %v6110_v8  ;;  %v8648_v44 = vrot.slane %v6423_v26, 4  ;;  %v2461_v15 = vperm.slane %v2455_v30, %v6110_v8  ;;  %v2468_v43 = vrot.slane %v2449_v48, 4 }
 0x2b4   : > { %v2470_v2 = vrot.slane %v2465_v4, 4  ;;  %v2473_v49 = vsel %vm768_vm0, %v2465_v4, %v2472_v35  ;;  %v3300_v22 = vperm.slane %v3294_v0, %v6110_v8  ;;  %v3307_v26 = vrot.slane %v3292_v36, 4 }
 0x2b5   : > { %v3296_v23 = vsel %vm768_vm0, %v3280_v61, %v8648_v44  ;;  %2591 = vst.msk [vmem:[%s6197_s18 + $0x1f0] sm:$0xff] %vm2528_vm1, %v2473_v49  ;;  %v3305_v13 = vrot.slane %v3288_v55, 4  ;;  %v2466_v28 = vrot.slane %v2461_v15, 4  ;;  %v2469_v61 = vsel %vm768_vm0, %v2461_v15, %v2468_v43  ;;  %v2730_v43 = vpop.permute.xlu2 %2729 }
 0x2b6   : > { %v3304_v39 = vperm.slane %v3296_v23, %v6110_v8  ;;  %v2471_v52 = vsel %vm768_vm0, %v2470_v2, %v2453_v38  ;;  %v1172_v47 = vrot.slane %v734_v62, 4  ;;  %2559 = vst.msk [vmem:[%s6197_s18 + $0xf0] sm:$0xff] %vm2528_vm1, %v2469_v61  ;;  %v3308_v25 = vsel %vm768_vm0, 0.0, %v3307_v26 }
 0x2b7   : > { %v3306_v58 = vsel %vm768_vm0, 0.0, %v3305_v13  ;;  %v3309_v4 = vrot.slane %v3300_v22, 4  ;;  %v2467_v50 = vsel %vm768_vm0, %v2466_v28, %v2449_v48  ;;  %2575 = vst.msk [vmem:[%s6197_s18 + $0x170] sm:$0xff] %vm2528_vm1, %v2471_v52  ;;  %v4135_v36 = vsel %vm768_vm0, %v3307_v26, %v3288_v55 }
 0x2b8   : > { %v3311_v35 = vrot.slane %v3304_v39, 4  ;;  %v4140_v30 = vrot.slane %v3308_v25, 4  ;;  %v1173_v0 = vsel %vm768_vm0, %v1172_v47, %v7652_v16  ;;  %2543 = vst.msk [vmem:[%s6197_s18 + $0x70] sm:$0xff] %vm2528_vm1, %v2467_v50  ;;  %v4139_v23 = vperm.slane %v4135_v36, %v6088_v41 }
 0x2b9   : > { %v3310_v38 = vsel %vm768_vm0, 0.0, %v3309_v4  ;;  %v1175_v49 = vsel %vm768_vm0, %v734_v62, %v1174_v10  ;;  %v1179_v26 = vperm.slane %v1173_v0, %v6088_v41  ;;  %v3437_v52 = vrot.slane %v2730_v43, 4 }
 0x2ba   : > { %v3312_v44 = vsel %vm768_vm0, 0.0, %v3311_v35  ;;  %v4146_v15 = vsel %vm768_vm0, %v3311_v35, %v3300_v22  ;;  %v4141_v48 = vsel %vm768_vm0, %v4140_v30, %v3306_v58  ;;  %v4159_v13 = vrot.slane %v4139_v23, 4 }
 0x2bb   : > { %v4150_v2 = vperm.slane %v4146_v15, %v6088_v41  ;;  %v4151_v55 = vrot.slane %v3312_v44, 4  ;;  %v4145_v39 = vperm.slane %v4141_v48, %v6088_v41  ;;  %v1183_v28 = vperm.slane %v1175_v49, %v6088_v41 }
 0x2bc   : > { %v8649_v47 = vrot.slane %v7255_v24, 4  ;;  %v1184_v62 = vrot.slane %v1179_v26, 4  ;;  %v1187_v35 = vsel %vm768_vm0, %v1179_v26, %v1186_v5 }
 0x2bd   : > { %v4152_v61 = vsel %vm768_vm0, %v4151_v55, %v3310_v38  ;;  %v4171_v22 = vrot.slane %v4150_v2, 4  ;;  %v4157_v16 = vrot.slane %v4145_v39, 4  ;;  %v4160_v10 = vsel %vm768_vm0, %v4145_v39, %v4159_v13 }
 0x2be   : > { %v3440_v58 = vsel %vm768_vm0, %v2730_v43, %v8649_v47  ;;  %v4156_v25 = vperm.slane %v4152_v61, %v6088_v41  ;;  %v4168_v4 = vperm.slane %v4160_v10, %v6110_v8  ;;  %v1196_v50 = vrot.slane %v1183_v28, 4 }
 0x2bf   : > { %v1199_v36 = vsel %vm768_vm0, %v1183_v28, %v1198_v11  ;;  %v4158_v30 = vsel %vm768_vm0, %v4157_v16, %v4139_v23  ;;  %v1185_v44 = vsel %vm768_vm0, %v1184_v62, %v7560_v54  ;;  %v1195_v11 = vperm.slane %v1187_v35, %v6110_v8 }
 0x2c0   : > { %v4169_v0 = vrot.slane %v4156_v25, 4  ;;  %v4172_v38 = vsel %vm768_vm0, %v4156_v25, %v4171_v22  ;;  %v4164_v15 = vperm.slane %v4158_v30, %v6110_v8  ;;  %v4187_v48 = vrot.slane %v4168_v4, 4 }
 0x2c1   : > { %v4180_v43 = vperm.slane %v4172_v38, %v6110_v8  ;;  %v1191_v5 = vperm.slane %v1185_v44, %v6110_v8  ;;  %v1197_v23 = vsel %vm768_vm0, %v1196_v50, %v7563_v63  ;;  %v1207_v49 = vperm.slane %v1199_v36, %v6110_v8 }
 0x2c2   : > { %v4170_v55 = vsel %vm768_vm0, %v4169_v0, %v4150_v2  ;;  %v4183_v54 = vrot.slane %v4164_v15, 4  ;;  %v1203_v28 = vperm.slane %v1197_v23, %v6110_v8  ;;  %v1210_v61 = vrot.slane %v1195_v11, 4 }
 0x2c3   : > { %v4176_v39 = vperm.slane %v4170_v55, %v6110_v8  ;;  %v4185_v13 = vrot.slane %v4180_v43, 4  ;;  %v4188_v26 = vsel %vm768_vm0, %v4180_v43, %v4187_v48  ;;  %v1208_v2 = vrot.slane %v1191_v5, 4 }
 0x2c4   : > { %4570 = vst.msk [vmem:[%s6281_s24 + $0x1c8] sm:$0xff] %vm2528_vm1, %v4188_v26  ;;  %v1214_v22 = vrot.slane %v1207_v49, 4  ;;  %v3438_v16 = vsel %vm768_vm0, %v3437_v52, %v7255_v24  ;;  %v1211_v62 = vsel %vm768_vm0, 0.0, %v1210_v61  ;;  %v1212_v35 = vrot.slane %v1203_v28, 4 }
 0x2c5   : > { %v4181_v47 = vrot.slane %v4176_v39, 4  ;;  %v4184_v63 = vsel %vm768_vm0, %v4176_v39, %v4183_v54  ;;  %v4186_v25 = vsel %vm768_vm0, %v4185_v13, %v4168_v4  ;;  %v1209_v10 = vsel %vm768_vm0, 0.0, %v1208_v2 }
 0x2c6   : > { %4538 = vst.msk [vmem:[%s6281_s24 + $0xc8] sm:$0xff] %vm2528_vm1, %v4184_v63  ;;  %v1215_v50 = vsel %vm768_vm0, 0.0, %v1214_v22  ;;  %v2042_v30 = vsel %vm768_vm0, %v1210_v61, %v1191_v5  ;;  %v2047_v0 = vrot.slane %v1211_v62, 4  ;;  %v2053_v4 = vsel %vm768_vm0, %v1214_v22, %v1203_v28 }
 0x2c7   : > { %v4182_v36 = vsel %vm768_vm0, %v4181_v47, %v4164_v15  ;;  %4554 = vst.msk [vmem:[%s6281_s24 + $0x148] sm:$0xff] %vm2528_vm1, %v4186_v25  ;;  %v1213_v24 = vsel %vm768_vm0, 0.0, %v1212_v35  ;;  %v2046_v52 = vperm.slane %v2042_v30, %v6088_v41  ;;  %v2057_v38 = vperm.slane %v2053_v4, %v6088_v41 }
 0x2c8   : > { %4522 = vst.msk [vmem:[%s6281_s24 + $0x48] sm:$0xff] %vm2528_vm1, %v4182_v36  ;;  %v2058_v44 = vrot.slane %v1215_v50, 4  ;;  %v2048_v43 = vsel %vm768_vm0, %v2047_v0, %v1209_v10  ;;  %v3444_v15 = vperm.slane %v3438_v16, %v6088_v41  ;;  %v3448_v48 = vperm.slane %v3440_v58, %v6088_v41 }
 0x2c9   : > { %v1610_v5 = vrot.slane %v6919_v6, 4  ;;  %v2052_v55 = vperm.slane %v2048_v43, %v6088_v41  ;;  %v2066_v23 = vrot.slane %v2046_v52, 4  ;;  %v2078_v49 = vrot.slane %v2057_v38, 4 }
 0x2ca   : > { %v2059_v11 = vsel %vm768_vm0, %v2058_v44, %v1213_v24  ;;  %v3449_v54 = vrot.slane %v3444_v15, 4  ;;  %v8650_v13 = vrot.slane %v7248_v20, 4  ;;  %v3461_v28 = vrot.slane %v3448_v48, 4 }
 0x2cb   : > { %v2063_v39 = vperm.slane %v2059_v11, %v6088_v41  ;;  %v2064_v2 = vrot.slane %v2052_v55, 4  ;;  %v2067_v61 = vsel %vm768_vm0, %v2052_v55, %v2066_v23  ;;  %v8651_v22 = vrot.slane %v7252_v42, 4 }
 0x2cc   : > { %v3452_v26 = vsel %vm768_vm0, %v3444_v15, %v8650_v13  ;;  %v2075_v63 = vperm.slane %v2067_v61, %v6110_v8  ;;  %v3450_v10 = vsel %vm768_vm0, %v3449_v54, %v7248_v20  ;;  %v3462_v36 = vsel %vm768_vm0, %v3461_v28, %v7252_v42 }
 0x2cd   : > { %v3460_v58 = vperm.slane %v3452_v26, %v6110_v8  ;;  %v3464_v47 = vsel %vm768_vm0, %v3448_v48, %v8651_v22  ;;  %v2076_v25 = vrot.slane %v2063_v39, 4  ;;  %v2079_v16 = vsel %vm768_vm0, %v2063_v39, %v2078_v49  ;;  %v702_v39 = vpop.permute.xlu1 %701 }
 0x2ce   : > { %v2065_v62 = vsel %vm768_vm0, %v2064_v2, %v2046_v52  ;;  %v2087_v35 = vperm.slane %v2079_v16, %v6110_v8  ;;  %v3456_v50 = vperm.slane %v3450_v10, %v6110_v8  ;;  %v2094_v4 = vrot.slane %v2075_v63, 4 }
 0x2cf   : > { %v2071_v30 = vperm.slane %v2065_v62, %v6110_v8  ;;  %v2077_v0 = vsel %vm768_vm0, %v2076_v25, %v2057_v38  ;;  %v3468_v24 = vperm.slane %v3462_v36, %v6110_v8  ;;  %v3472_v52 = vperm.slane %v3464_v47, %v6110_v8  ;;  %v654_v47 = vpop.permute.xlu0 %653 }
 0x2d0   : > { %v2083_v20 = vperm.slane %v2077_v0, %v6110_v8  ;;  %v2092_v44 = vrot.slane %v2087_v35, 4  ;;  %v3473_v43 = vrot.slane %v3456_v50, 4  ;;  %v2095_v48 = vsel %vm768_vm0, %v2087_v35, %v2094_v4 }
 0x2d1   : > { %v2090_v15 = vrot.slane %v2071_v30, 4  ;;  %v3475_v55 = vrot.slane %v3460_v58, 4  ;;  %v3477_v42 = vrot.slane %v3468_v24, 4  ;;  %2584 = vst.msk [vmem:[%s6197_s18 + $0x1b8] sm:$0xff] %vm2528_vm1, %v2095_v48  ;;  %v3479_v49 = vrot.slane %v3472_v52, 4 }
 0x2d2   : > { %v2088_v11 = vrot.slane %v2083_v20, 4  ;;  %v2093_v23 = vsel %vm768_vm0, %v2092_v44, %v2075_v63  ;;  %v3474_v38 = vsel %vm768_vm0, 0.0, %v3473_v43  ;;  %v1608_v16 = vrot.slane %v702_v39, 4 }
 0x2d3   : > { %v2091_v54 = vsel %vm768_vm0, %v2083_v20, %v2090_v15  ;;  %2568 = vst.msk [vmem:[%s6197_s18 + $0x138] sm:$0xff] %vm2528_vm1, %v2093_v23  ;;  %v3476_v13 = vsel %vm768_vm0, 0.0, %v3475_v55  ;;  %v3478_v26 = vsel %vm768_vm0, 0.0, %v3477_v42  ;;  %v4297_v28 = vsel %vm768_vm0, %v3475_v55, %v3456_v50 }
 0x2d4   : > { %v2089_v2 = vsel %vm768_vm0, %v2088_v11, %v2071_v30  ;;  %2552 = vst.msk [vmem:[%s6197_s18 + $0xb8] sm:$0xff] %vm2528_vm1, %v2091_v54  ;;  %v3480_v61 = vsel %vm768_vm0, 0.0, %v3479_v49  ;;  %v4301_v58 = vperm.slane %v4297_v28, %v6088_v41  ;;  %v4302_v22 = vrot.slane %v3476_v13, 4 }
 0x2d5   : > { %2536 = vst.msk [vmem:[%s6197_s18 + $0x38] sm:$0xff] %vm2528_vm1, %v2089_v2  ;;  %v4308_v63 = vsel %vm768_vm0, %v3479_v49, %v3468_v24  ;;  %v4313_v25 = vrot.slane %v3480_v61, 4  ;;  %v1611_v10 = vsel %vm768_vm0, %v702_v39, %v1610_v5  ;;  %v1609_v4 = vsel %vm768_vm0, %v1608_v16, %v6919_v6 }
 0x2d6   : > { %v4303_v62 = vsel %vm768_vm0, %v4302_v22, %v3474_v38  ;;  %v4312_v35 = vperm.slane %v4308_v63, %v6088_v41  ;;  %v4321_v50 = vrot.slane %v4301_v58, 4  ;;  %v1619_v36 = vperm.slane %v1611_v10, %v6088_v41  ;;  %v2736_v10 = vpop.permute.xlu2 %2735 }
 0x2d7   : > { %v4307_v30 = vperm.slane %v4303_v62, %v6088_v41  ;;  %v4314_v0 = vsel %vm768_vm0, %v4313_v25, %v3478_v26  ;;  %v1621_v24 = vsel %vm768_vm0, %v1620_v31, %v654_v47  ;;  %v1615_v44 = vperm.slane %v1609_v4, %v6088_v41 }
 0x2d8   : > { %v4318_v5 = vperm.slane %v4314_v0, %v6088_v41  ;;  %v4333_v20 = vrot.slane %v4312_v35, 4  ;;  %v1646_v52 = vrot.slane %v1619_v36, 4  ;;  %v1622_v48 = vrot.slane %v654_v47, 4  ;;  %v2688_v47 = vpop.permute.xlu1 %2687 }
 0x2d9   : > { %v4319_v43 = vrot.slane %v4307_v30, 4  ;;  %v4322_v15 = vsel %vm768_vm0, %v4307_v30, %v4321_v50  ;;  %v1627_v55 = vperm.slane %v1621_v24, %v6088_v41  ;;  %v1634_v23 = vrot.slane %v1615_v44, 4 }
 0x2da   : > { %v4330_v42 = vperm.slane %v4322_v15, %v6110_v8  ;;  %v4331_v11 = vrot.slane %v4318_v5, 4  ;;  %v4334_v6 = vsel %vm768_vm0, %v4318_v5, %v4333_v20  ;;  %v1623_v49 = vsel %vm768_vm0, %v7630_v17, %v1622_v48 }
 0x2db   : > { %v4320_v31 = vsel %vm768_vm0, %v4319_v43, %v4301_v58  ;;  %v4342_v38 = vperm.slane %v4334_v6, %v6110_v8  ;;  %v1632_v39 = vrot.slane %v1627_v55, 4  ;;  %v1631_v28 = vperm.slane %v1623_v49, %v6088_v41 }
 0x2dc   : > { %v4326_v54 = vperm.slane %v4320_v31, %v6110_v8  ;;  %v4332_v13 = vsel %vm768_vm0, %v4331_v11, %v4312_v35  ;;  %v4349_v26 = vrot.slane %v4330_v42, 4  ;;  %v1635_v22 = vsel %vm768_vm0, %v1627_v55, %v1634_v23 }
 0x2dd   : > { %v4338_v2 = vperm.slane %v4332_v13, %v6110_v8  ;;  %v4347_v61 = vrot.slane %v4342_v38, 4  ;;  %v1633_v58 = vsel %vm768_vm0, %v1632_v39, %v1615_v44  ;;  %v1643_v16 = vperm.slane %v1635_v22, %v6110_v8 }
 0x2de   : > { %v4345_v63 = vrot.slane %v4326_v54, 4  ;;  %v4350_v17 = vsel %vm768_vm0, %v4342_v38, %v4349_v26  ;;  %v1639_v25 = vperm.slane %v1633_v58, %v6110_v8  ;;  %v1644_v50 = vrot.slane %v1631_v28, 4 }
 0x2df   : > { %v4343_v62 = vrot.slane %v4338_v2, 4  ;;  %v4348_v35 = vsel %vm768_vm0, %v4347_v61, %v4330_v42  ;;  %4573 = vst.msk [vmem:[%s6281_s24 + $0x1e0] sm:$0xff] %vm2528_vm1, %v4350_v17  ;;  %v1647_v30 = vsel %vm768_vm0, %v1631_v28, %v1646_v52  ;;  %v1658_v5 = vrot.slane %v1643_v16, 4 }
 0x2e0   : > { %v4346_v0 = vsel %vm768_vm0, %v4338_v2, %v4345_v63  ;;  %4557 = vst.msk [vmem:[%s6281_s24 + $0x160] sm:$0xff] %vm2528_vm1, %v4348_v35  ;;  %v1655_v4 = vperm.slane %v1647_v30, %v6110_v8  ;;  %v1656_v24 = vrot.slane %v1639_v25, 4  ;;  %v1645_v44 = vsel %vm768_vm0, %v1644_v50, %v1619_v36 }
 0x2e1   : > { %v4344_v20 = vsel %vm768_vm0, %v4343_v62, %v4326_v54  ;;  %4541 = vst.msk [vmem:[%s6281_s24 + $0xe0] sm:$0xff] %vm2528_vm1, %v4346_v0  ;;  %v3605_v43 = vrot.slane %v2736_v10, 4  ;;  %v3595_v15 = vrot.slane %v7003_v40, 4  ;;  %v1651_v52 = vperm.slane %v1645_v44, %v6110_v8  ;;  %v2722_v62 = vpop.permute.xlu1 %2721 }
 0x2e2   : > { %4525 = vst.msk [vmem:[%s6281_s24 + $0x60] sm:$0xff] %vm2528_vm1, %v4344_v20  ;;  %v1657_v48 = vsel %vm768_vm0, 0.0, %v1656_v24  ;;  %v1659_v55 = vsel %vm768_vm0, 0.0, %v1658_v5  ;;  %v1662_v42 = vrot.slane %v1655_v4, 4  ;;  %v2474_v11 = vsel %vm768_vm0, %v1658_v5, %v1639_v25 }
 0x2e3   : > { %v2479_v6 = vrot.slane %v1659_v55, 4  ;;  %v3593_v23 = vrot.slane %v2688_v47, 4  ;;  %v3596_v31 = vsel %vm768_vm0, %v2688_v47, %v3595_v15  ;;  %v1660_v38 = vrot.slane %v1651_v52, 4  ;;  %v2640_v47 = vpop.permute.xlu0 %2639 }
 0x2e4   : > { %v1663_v36 = vsel %vm768_vm0, 0.0, %v1662_v42  ;;  %v2478_v49 = vperm.slane %v2474_v11, %v6088_v41  ;;  %v2485_v39 = vsel %vm768_vm0, %v1662_v42, %v1651_v52  ;;  %v3604_v25 = vperm.slane %v3596_v31, %v6088_v41 }
 0x2e5   : > { %v2480_v54 = vsel %vm768_vm0, %v2479_v6, %v1657_v48  ;;  %v2489_v13 = vperm.slane %v2485_v39, %v6088_v41  ;;  %v2490_v26 = vrot.slane %v1663_v36, 4  ;;  %v3594_v28 = vsel %vm768_vm0, %v3593_v23, %v7003_v40 }
 0x2e6   : > { %v1661_v2 = vsel %vm768_vm0, 0.0, %v1660_v38  ;;  %v2484_v61 = vperm.slane %v2480_v54, %v6088_v41  ;;  %v2498_v58 = vrot.slane %v2478_v49, 4  ;;  %v3600_v22 = vperm.slane %v3594_v28, %v6088_v41 }
 0x2e7   : > { %v2491_v63 = vsel %vm768_vm0, %v2490_v26, %v1661_v2  ;;  %v2510_v17 = vrot.slane %v2489_v13, 4  ;;  %v3606_v16 = vsel %vm768_vm0, %v3605_v43, %v2640_v47  ;;  %v3631_v4 = vrot.slane %v3604_v25, 4 }
 0x2e8   : > { %v2495_v35 = vperm.slane %v2491_v63, %v6088_v41  ;;  %v2496_v50 = vrot.slane %v2484_v61, 4  ;;  %v2499_v40 = vsel %vm768_vm0, %v2484_v61, %v2498_v58  ;;  %v3619_v30 = vrot.slane %v3600_v22, 4 }
 0x2e9   : > { %v2507_v0 = vperm.slane %v2499_v40, %v6110_v8  ;;  %v3607_v24 = vrot.slane %v2640_v47, 4  ;;  %v3612_v5 = vperm.slane %v3606_v16, %v6088_v41  ;;  %v3213_v43 = vrot.slane %v2722_v62, 4 }
 0x2ea   : > { %v2497_v20 = vsel %vm768_vm0, %v2496_v50, %v2478_v49  ;;  %v2508_v44 = vrot.slane %v2495_v35, 4  ;;  %v2511_v15 = vsel %vm768_vm0, %v2495_v35, %v2510_v17  ;;  %v8652_v40 = vrot.slane %v6093_v45, 4 }
 0x2eb   : > { %v2503_v52 = vperm.slane %v2497_v20, %v6110_v8  ;;  %v2519_v48 = vperm.slane %v2511_v15, %v6110_v8  ;;  %v2526_v55 = vrot.slane %v2507_v0, 4  ;;  %v3608_v42 = vsel %vm768_vm0, %v2736_v10, %v3607_v24 }
 0x2ec   : > { %v2509_v11 = vsel %vm768_vm0, %v2508_v44, %v2489_v13  ;;  %v3616_v6 = vperm.slane %v3608_v42, %v6088_v41  ;;  %v3617_v23 = vrot.slane %v3612_v5, 4  ;;  %v3620_v31 = vsel %vm768_vm0, %v3612_v5, %v3619_v30 }
 0x2ed   : > { %v2515_v38 = vperm.slane %v2509_v11, %v6110_v8  ;;  %v2522_v36 = vrot.slane %v2503_v52, 4  ;;  %v2524_v49 = vrot.slane %v2519_v48, 4  ;;  %v2527_v39 = vsel %vm768_vm0, %v2519_v48, %v2526_v55 }
 0x2ee   : > { %2592 = vst.msk [vmem:[%s6197_s18 + $0x1f8] sm:$0xff] %vm2528_vm1, %v2527_v39  ;;  %v3618_v54 = vsel %vm768_vm0, %v3617_v23, %v3600_v22  ;;  %v3628_v10 = vperm.slane %v3620_v31, %v6110_v8  ;;  %v3629_v13 = vrot.slane %v3616_v6, 4  ;;  %v3632_v26 = vsel %vm768_vm0, %v3616_v6, %v3631_v4 }
 0x2ef   : > { %v2520_v28 = vrot.slane %v2515_v38, 4  ;;  %v2523_v2 = vsel %vm768_vm0, %v2515_v38, %v2522_v36  ;;  %v2525_v61 = vsel %vm768_vm0, %v2524_v49, %v2507_v0  ;;  %v3624_v58 = vperm.slane %v3618_v54, %v6110_v8 }
 0x2f0   : > { %2560 = vst.msk [vmem:[%s6197_s18 + $0xf8] sm:$0xff] %vm2528_vm1, %v2523_v2  ;;  %v3630_v47 = vsel %vm768_vm0, %v3629_v13, %v3604_v25  ;;  %v3640_v63 = vperm.slane %v3632_v26, %v6110_v8  ;;  %v3643_v22 = vrot.slane %v3628_v10, 4  ;;  %v3214_v17 = vsel %vm768_vm0, %v3213_v43, %v6093_v45 }
 0x2f1   : > { %v2521_v16 = vsel %vm768_vm0, %v2520_v28, %v2503_v52  ;;  %2576 = vst.msk [vmem:[%s6197_s18 + $0x178] sm:$0xff] %vm2528_vm1, %v2525_v61  ;;  %v3636_v35 = vperm.slane %v3630_v47, %v6110_v8  ;;  %v3641_v50 = vrot.slane %v3624_v58, 4  ;;  %v3216_v30 = vsel %vm768_vm0, %v2722_v62, %v8652_v40 }
 0x2f2   : > { %2544 = vst.msk [vmem:[%s6197_s18 + $0x78] sm:$0xff] %vm2528_vm1, %v2521_v16  ;;  %v3644_v25 = vsel %vm768_vm0, 0.0, %v3643_v22  ;;  %v3647_v0 = vrot.slane %v3640_v63, 4  ;;  %v4459_v4 = vsel %vm768_vm0, %v3643_v22, %v3624_v58  ;;  %v3220_v24 = vperm.slane %v3214_v17, %v6088_v41 }
 0x2f3   : > { %v3642_v5 = vsel %vm768_vm0, 0.0, %v3641_v50  ;;  %v3645_v20 = vrot.slane %v3636_v35, 4  ;;  %v4463_v44 = vperm.slane %v4459_v4, %v6088_v41  ;;  %v4464_v15 = vrot.slane %v3644_v25, 4 }
 0x2f4   : > { %v3648_v43 = vsel %vm768_vm0, 0.0, %v3647_v0  ;;  %v4470_v45 = vsel %vm768_vm0, %v3647_v0, %v3636_v35  ;;  %v3224_v62 = vperm.slane %v3216_v30, %v6088_v41  ;;  %v3225_v52 = vrot.slane %v3220_v24, 4 }
 0x2f5   : > { %v3646_v48 = vsel %vm768_vm0, 0.0, %v3645_v20  ;;  %v4465_v55 = vsel %vm768_vm0, %v4464_v15, %v3642_v5  ;;  %v4474_v42 = vperm.slane %v4470_v45, %v6088_v41  ;;  %v4475_v11 = vrot.slane %v3648_v43, 4 }
 0x2f6   : > { %v4469_v6 = vperm.slane %v4465_v55, %v6088_v41  ;;  %v4483_v23 = vrot.slane %v4463_v44, 4  ;;  %v3226_v31 = vsel %vm768_vm0, %v3225_v52, %v6326_v3  ;;  %v8653_v38 = vrot.slane %v6326_v3, 4 }
 0x2f7   : > { %v4476_v49 = vsel %vm768_vm0, %v4475_v11, %v3646_v48  ;;  %v4495_v39 = vrot.slane %v4474_v42, 4  ;;  %v3232_v54 = vperm.slane %v3226_v31, %v6110_v8  ;;  %v3237_v2 = vrot.slane %v3224_v62, 4 }
 0x2f8   : > { %v3228_v36 = vsel %vm768_vm0, %v3220_v24, %v8653_v38  ;;  %v4480_v13 = vperm.slane %v4476_v49, %v6088_v41  ;;  %v4481_v26 = vrot.slane %v4469_v6, 4  ;;  %v4484_v28 = vsel %vm768_vm0, %v4469_v6, %v4483_v23  ;;  %v2720_v6 = vpop.permute.xlu0 %2719  ;;  %v2728_v23 = vpop.permute.xlu1 %2727 }
 0x2f9   : > { %v3236_v10 = vperm.slane %v3228_v36, %v6110_v8  ;;  %v4492_v61 = vperm.slane %v4484_v28, %v6110_v8  ;;  %v8654_v58 = vrot.slane %v6329_v18, 4  ;;  %v3249_v47 = vrot.slane %v3232_v54, 4 }
 0x2fa   : > { %v4482_v22 = vsel %vm768_vm0, %v4481_v26, %v4463_v44  ;;  %v4493_v17 = vrot.slane %v4480_v13, 4  ;;  %v4496_v16 = vsel %vm768_vm0, %v4480_v13, %v4495_v39  ;;  %v3238_v35 = vsel %vm768_vm0, %v3237_v2, %v6329_v18 }
 0x2fb   : > { %v3240_v3 = vsel %vm768_vm0, %v3224_v62, %v8654_v58  ;;  %v3251_v63 = vrot.slane %v3236_v10, 4  ;;  %v4488_v50 = vperm.slane %v4482_v22, %v6110_v8  ;;  %v4504_v40 = vperm.slane %v4496_v16, %v6110_v8 }
 0x2fc   : > { %v4511_v30 = vrot.slane %v4492_v61, 4  ;;  %v3244_v25 = vperm.slane %v3238_v35, %v6110_v8  ;;  %v4494_v0 = vsel %vm768_vm0, %v4493_v17, %v4474_v42  ;;  %v3248_v4 = vperm.slane %v3240_v3, %v6110_v8 }
 0x2fd   : > { %v3250_v24 = vsel %vm768_vm0, 0.0, %v3249_v47  ;;  %v3252_v5 = vsel %vm768_vm0, 0.0, %v3251_v63  ;;  %v4500_v20 = vperm.slane %v4494_v0, %v6110_v8  ;;  %v4507_v44 = vrot.slane %v4488_v50, 4 }
 0x2fe   : > { %v4509_v18 = vrot.slane %v4504_v40, 4  ;;  %v4512_v15 = vsel %vm768_vm0, %v4504_v40, %v4511_v30  ;;  %v3253_v43 = vrot.slane %v3244_v25, 4  ;;  %v3255_v45 = vrot.slane %v3248_v4, 4 }
 0x2ff   : > { %4576 = vst.msk [vmem:[%s6281_s24 + $0x1f8] sm:$0xff] %vm2528_vm1, %v4512_v15  ;;  %v4081_v62 = vsel %vm768_vm0, %v3251_v63, %v3232_v54  ;;  %v4086_v52 = vrot.slane %v3252_v5, 4  ;;  %v4505_v48 = vrot.slane %v4500_v20, 4  ;;  %v4508_v55 = vsel %vm768_vm0, %v4500_v20, %v4507_v44 }
 0x300   : > { %v4510_v42 = vsel %vm768_vm0, %v4509_v18, %v4492_v61  ;;  %v4085_v11 = vperm.slane %v4081_v62, %v6088_v41  ;;  %4544 = vst.msk [vmem:[%s6281_s24 + $0xf8] sm:$0xff] %vm2528_vm1, %v4508_v55  ;;  %v3254_v31 = vsel %vm768_vm0, 0.0, %v3253_v43  ;;  %v3256_v38 = vsel %vm768_vm0, 0.0, %v3255_v45 }
 0x301   : > { %v4087_v36 = vsel %vm768_vm0, %v4086_v52, %v3250_v24  ;;  %v4092_v49 = vsel %vm768_vm0, %v3255_v45, %v3244_v25  ;;  %v4506_v39 = vsel %vm768_vm0, %v4505_v48, %v4488_v50  ;;  %4560 = vst.msk [vmem:[%s6281_s24 + $0x178] sm:$0xff] %vm2528_vm1, %v4510_v42  ;;  %v4097_v13 = vrot.slane %v3256_v38, 4 }
 0x302   : > { %v4091_v54 = vperm.slane %v4087_v36, %v6088_v41  ;;  %v4096_v10 = vperm.slane %v4092_v49, %v6088_v41  ;;  %4528 = vst.msk [vmem:[%s6281_s24 + $0x78] sm:$0xff] %vm2528_vm1, %v4506_v39  ;;  %v4105_v26 = vrot.slane %v4085_v11, 4  ;;  %v3157_v28 = vrot.slane %v2720_v6, 4 }
 0x303   : > { %v3160_v2 = vsel %vm768_vm0, %v2720_v6, %v3159_v7  ;;  %v3381_v61 = vrot.slane %v2728_v23, 4  ;;  %v4098_v58 = vsel %vm768_vm0, %v4097_v13, %v3254_v31  ;;  %v8655_v38 = vrot.slane %v6731_v57, 4 }
 0x304   : > { %v4103_v3 = vrot.slane %v4091_v54, 4  ;;  %v4117_v47 = vrot.slane %v4096_v10, 4  ;;  %v3168_v63 = vperm.slane %v3160_v2, %v6088_v41  ;;  %v4102_v22 = vperm.slane %v4098_v58, %v6088_v41 }
 0x305   : > { %v4106_v17 = vsel %vm768_vm0, %v4091_v54, %v4105_v26  ;;  %v3158_v16 = vsel %vm768_vm0, %v3157_v28, %v7697_v14  ;;  %v3382_v35 = vsel %vm768_vm0, %v3381_v61, %v6731_v57 }
 0x306   : > { %v4104_v50 = vsel %vm768_vm0, %v4103_v3, %v4085_v11  ;;  %v4114_v7 = vperm.slane %v4106_v17, %v6110_v8  ;;  %v3164_v40 = vperm.slane %v3158_v16, %v6088_v41  ;;  %v3181_v30 = vrot.slane %v3168_v63, 4 }
 0x307   : > { %v4110_v25 = vperm.slane %v4104_v50, %v6110_v8  ;;  %v4115_v0 = vrot.slane %v4102_v22, 4  ;;  %v4118_v4 = vsel %vm768_vm0, %v4102_v22, %v4117_v47  ;;  %v3184_v14 = vsel %vm768_vm0, %v3168_v63, %v3183_v60 }
 0x308   : > { %v4126_v24 = vperm.slane %v4118_v4, %v6110_v8  ;;  %v4133_v5 = vrot.slane %v4114_v7, 4  ;;  %v3169_v20 = vrot.slane %v3164_v40, 4  ;;  %v3172_v44 = vsel %vm768_vm0, %v3164_v40, %v3171_v33 }
 0x309   : > { %v4116_v18 = vsel %vm768_vm0, %v4115_v0, %v4096_v10  ;;  %v4129_v15 = vrot.slane %v4110_v25, 4  ;;  %v3180_v43 = vperm.slane %v3172_v44, %v6110_v8  ;;  %v3182_v45 = vsel %vm768_vm0, %v3181_v30, %v7609_v12 }
 0x30a   : > { %v4122_v62 = vperm.slane %v4116_v18, %v6110_v8  ;;  %v4131_v60 = vrot.slane %v4126_v24, 4  ;;  %v4134_v52 = vsel %vm768_vm0, %v4126_v24, %v4133_v5  ;;  %v3170_v48 = vsel %vm768_vm0, %v3169_v20, %v7606_v59 }
 0x30b   : > { %4569 = vst.msk [vmem:[%s6281_s24 + $0x1c0] sm:$0xff] %vm2528_vm1, %v4134_v52  ;;  %v3176_v33 = vperm.slane %v3170_v48, %v6110_v8  ;;  %v3188_v55 = vperm.slane %v3182_v45, %v6110_v8  ;;  %v3192_v42 = vperm.slane %v3184_v14, %v6110_v8  ;;  %v3195_v11 = vrot.slane %v3180_v43, 4 }
 0x30c   : > { %v4127_v12 = vrot.slane %v4122_v62, 4  ;;  %v4130_v6 = vsel %vm768_vm0, %v4122_v62, %v4129_v15  ;;  %v4132_v31 = vsel %vm768_vm0, %v4131_v60, %v4114_v7  ;;  %v3384_v59 = vsel %vm768_vm0, %v2728_v23, %v8655_v38 }
 0x30d   : > { %4537 = vst.msk [vmem:[%s6281_s24 + $0xc0] sm:$0xff] %vm2528_vm1, %v4130_v6  ;;  %v3193_v36 = vrot.slane %v3176_v33, 4  ;;  %v3196_v49 = vsel %vm768_vm0, 0.0, %v3195_v11  ;;  %v3197_v39 = vrot.slane %v3188_v55, 4  ;;  %v3199_v54 = vrot.slane %v3192_v42, 4 }
 0x30e   : > { %v4128_v10 = vsel %vm768_vm0, %v4127_v12, %v4110_v25  ;;  %4553 = vst.msk [vmem:[%s6281_s24 + $0x140] sm:$0xff] %vm2528_vm1, %v4132_v31  ;;  %v4027_v13 = vsel %vm768_vm0, %v3195_v11, %v3176_v33  ;;  %v4032_v26 = vrot.slane %v3196_v49, 4  ;;  %v3388_v28 = vperm.slane %v3382_v35, %v6088_v41 }
 0x30f   : > { %4521 = vst.msk [vmem:[%s6281_s24 + $0x40] sm:$0xff] %vm2528_vm1, %v4128_v10  ;;  %v3194_v57 = vsel %vm768_vm0, 0.0, %v3193_v36  ;;  %v3198_v23 = vsel %vm768_vm0, 0.0, %v3197_v39  ;;  %v3200_v2 = vsel %vm768_vm0, 0.0, %v3199_v54  ;;  %v4031_v61 = vperm.slane %v4027_v13, %v6088_v41 }
 0x310   : > { %v4033_v58 = vsel %vm768_vm0, %v4032_v26, %v3194_v57  ;;  %v4038_v3 = vsel %vm768_vm0, %v3199_v54, %v3188_v55  ;;  %v4043_v47 = vrot.slane %v3200_v2, 4  ;;  %v3392_v63 = vperm.slane %v3384_v59, %v6088_v41  ;;  %v2726_v54 = vpop.permute.xlu0 %2725 }
 0x311   : > { %v4037_v22 = vperm.slane %v4033_v58, %v6088_v41  ;;  %v4042_v17 = vperm.slane %v4038_v3, %v6088_v41  ;;  %v4051_v16 = vrot.slane %v4031_v61, 4  ;;  %v3393_v35 = vrot.slane %v3388_v28, 4 }
 0x312   : > { %v4044_v50 = vsel %vm768_vm0, %v4043_v47, %v3198_v23  ;;  %v8656_v7 = vrot.slane %v7088_v1, 4  ;;  %v3405_v30 = vrot.slane %v3392_v63, 4  ;;  %v8657_v25 = vrot.slane %v7082_v32, 4 }
 0x313   : > { %v4048_v4 = vperm.slane %v4044_v50, %v6088_v41  ;;  %v4049_v14 = vrot.slane %v4037_v22, 4  ;;  %v4052_v24 = vsel %vm768_vm0, %v4037_v22, %v4051_v16  ;;  %v4063_v5 = vrot.slane %v4042_v17, 4  ;;  %v2734_v22 = vpop.permute.xlu1 %2733 }
 0x314   : > { %v3396_v40 = vsel %vm768_vm0, %v3388_v28, %v8656_v7  ;;  %v3408_v0 = vsel %vm768_vm0, %v3392_v63, %v8657_v25  ;;  %v4060_v20 = vperm.slane %v4052_v24, %v6110_v8  ;;  %v3394_v44 = vsel %vm768_vm0, %v3393_v35, %v7088_v1 }
 0x315   : > { %v3404_v18 = vperm.slane %v3396_v40, %v6110_v8  ;;  %v3406_v15 = vsel %vm768_vm0, %v3405_v30, %v7082_v32  ;;  %v4050_v43 = vsel %vm768_vm0, %v4049_v14, %v4031_v61  ;;  %v4061_v45 = vrot.slane %v4048_v4, 4 }
 0x316   : > { %v4064_v62 = vsel %vm768_vm0, %v4048_v4, %v4063_v5  ;;  %v3400_v60 = vperm.slane %v3394_v44, %v6110_v8  ;;  %v4056_v52 = vperm.slane %v4050_v43, %v6110_v8  ;;  %v4079_v33 = vrot.slane %v4060_v20, 4 }
 0x317   : > { %v4072_v48 = vperm.slane %v4064_v62, %v6110_v8  ;;  %v3412_v1 = vperm.slane %v3406_v15, %v6110_v8  ;;  %v4062_v55 = vsel %vm768_vm0, %v4061_v45, %v4042_v17  ;;  %v3416_v42 = vperm.slane %v3408_v0, %v6110_v8 }
 0x318   : > { %v3417_v32 = vrot.slane %v3400_v60, 4  ;;  %v3419_v11 = vrot.slane %v3404_v18, 4  ;;  %v4068_v12 = vperm.slane %v4062_v55, %v6110_v8  ;;  %v4075_v6 = vrot.slane %v4056_v52, 4 }
 0x319   : > { %v4077_v31 = vrot.slane %v4072_v48, 4  ;;  %v4080_v38 = vsel %vm768_vm0, %v4072_v48, %v4079_v33  ;;  %v3421_v49 = vrot.slane %v3412_v1, 4  ;;  %v3423_v39 = vrot.slane %v3416_v42, 4  ;;  %v8660_v33 = vld [vmem:[#allocation20_spill] sm:$0xff] }
 0x31a   : > { %4568 = vst.msk [vmem:[%s6281_s24 + $0x1b8] sm:$0xff] %vm2528_vm1, %v4080_v38  ;;  %v3418_v59 = vsel %vm768_vm0, 0.0, %v3417_v32  ;;  %v3420_v36 = vsel %vm768_vm0, 0.0, %v3419_v11  ;;  %v4073_v10 = vrot.slane %v4068_v12, 4  ;;  %v4076_v13 = vsel %vm768_vm0, %v4068_v12, %v4075_v6 }
 0x31b   : > { %v4078_v26 = vsel %vm768_vm0, %v4077_v31, %v4060_v20  ;;  %v4243_v28 = vsel %vm768_vm0, %v3419_v11, %v3400_v60  ;;  %4536 = vst.msk [vmem:[%s6281_s24 + $0xb8] sm:$0xff] %vm2528_vm1, %v4076_v13  ;;  %v3422_v57 = vsel %vm768_vm0, 0.0, %v3421_v49  ;;  %v3424_v23 = vsel %vm768_vm0, 0.0, %v3423_v39 }
 0x31c   : > { %v4247_v2 = vperm.slane %v4243_v28, %v6088_v41  ;;  %v4248_v61 = vrot.slane %v3420_v36, 4  ;;  %v4074_v58 = vsel %vm768_vm0, %v4073_v10, %v4056_v52  ;;  %4552 = vst.msk [vmem:[%s6281_s24 + $0x138] sm:$0xff] %vm2528_vm1, %v4078_v26  ;;  %v4254_v3 = vsel %vm768_vm0, %v3423_v39, %v3412_v1 }
 0x31d   : > { %v4259_v47 = vrot.slane %v3424_v23, 4  ;;  %v3325_v63 = vrot.slane %v2726_v54, 4  ;;  %4520 = vst.msk [vmem:[%s6281_s24 + $0x38] sm:$0xff] %vm2528_vm1, %v4074_v58  ;;  %v4258_v16 = vperm.slane %v4254_v3, %v6088_v41  ;;  %v8658_v50 = vrot.slane %v6720_v53, 4 }
 0x31e   : > { %v4249_v17 = vsel %vm768_vm0, %v4248_v61, %v3418_v59  ;;  %v4267_v35 = vrot.slane %v4247_v2, 4  ;;  %v3549_v5 = vrot.slane %v2734_v22, 4  ;;  %v8659_v15 = vrot.slane %v6451_v37, 4 }
 0x31f   : > { %v3328_v7 = vsel %vm768_vm0, %v2726_v54, %v8658_v50  ;;  %v4253_v40 = vperm.slane %v4249_v17, %v6088_v41  ;;  %v4260_v30 = vsel %vm768_vm0, %v4259_v47, %v3422_v57  ;;  %v3326_v25 = vsel %vm768_vm0, %v3325_v63, %v6720_v53 }
 0x320   : > { %v3336_v0 = vperm.slane %v3328_v7, %v6088_v41  ;;  %v4264_v4 = vperm.slane %v4260_v30, %v6088_v41  ;;  %v4279_v14 = vrot.slane %v4258_v16, 4  ;;  %v3332_v24 = vperm.slane %v3326_v25, %v6088_v41 }
 0x321   : > { %v4265_v20 = vrot.slane %v4253_v40, 4  ;;  %v4268_v44 = vsel %vm768_vm0, %v4253_v40, %v4267_v35  ;;  %v8661_v1 = vrot.slane %v8660_v33, 4  ;;  %v3550_v61 = vsel %vm768_vm0, %v3549_v5, %v7458_v56 }
 0x322   : > { %v3349_v18 = vrot.slane %v3336_v0, 4  ;;  %v3352_v43 = vsel %vm768_vm0, %v3336_v0, %v8659_v15  ;;  %v4276_v45 = vperm.slane %v4268_v44, %v6110_v8  ;;  %v4277_v62 = vrot.slane %v4264_v4, 4 }
 0x323   : > { %v4280_v53 = vsel %vm768_vm0, %v4264_v4, %v4279_v14  ;;  %v3337_v60 = vrot.slane %v3332_v24, 4  ;;  %v4266_v52 = vsel %vm768_vm0, %v4265_v20, %v4247_v2  ;;  %v3340_v55 = vsel %vm768_vm0, %v3332_v24, %v8661_v1 }
 0x324   : > { %v4288_v48 = vperm.slane %v4280_v53, %v6110_v8  ;;  %v3350_v42 = vsel %vm768_vm0, %v3349_v18, %v6451_v37  ;;  %v4272_v32 = vperm.slane %v4266_v52, %v6110_v8  ;;  %v4278_v11 = vsel %vm768_vm0, %v4277_v62, %v4258_v16 }
 0x325   : > { %v4295_v12 = vrot.slane %v4276_v45, 4  ;;  %v3338_v6 = vsel %vm768_vm0, %v3337_v60, %v8660_v33  ;;  %v4284_v31 = vperm.slane %v4278_v11, %v6110_v8  ;;  %v3348_v36 = vperm.slane %v3340_v55, %v6110_v8 }
 0x326   : > { %v4293_v38 = vrot.slane %v4288_v48, 4  ;;  %v3344_v59 = vperm.slane %v3338_v6, %v6110_v8  ;;  %v4291_v49 = vrot.slane %v4272_v32, 4  ;;  %v3356_v39 = vperm.slane %v3350_v42, %v6110_v8 }
 0x327   : > { %v4296_v37 = vsel %vm768_vm0, %v4288_v48, %v4295_v12  ;;  %v3360_v54 = vperm.slane %v3352_v43, %v6110_v8  ;;  %v4289_v10 = vrot.slane %v4284_v31, 4  ;;  %v3363_v28 = vrot.slane %v3348_v36, 4 }
 0x328   : > { %v4294_v13 = vsel %vm768_vm0, %v4293_v38, %v4276_v45  ;;  %4572 = vst.msk [vmem:[%s6281_s24 + $0x1d8] sm:$0xff] %vm2528_vm1, %v4296_v37  ;;  %v3361_v26 = vrot.slane %v3344_v59, 4  ;;  %v4292_v57 = vsel %vm768_vm0, %v4284_v31, %v4291_v49  ;;  %v3365_v23 = vrot.slane %v3356_v39, 4 }
 0x329   : > { %4556 = vst.msk [vmem:[%s6281_s24 + $0x158] sm:$0xff] %vm2528_vm1, %v4294_v13  ;;  %v3367_v2 = vrot.slane %v3360_v54, 4  ;;  %v4290_v58 = vsel %vm768_vm0, %v4289_v10, %v4272_v32  ;;  %v3364_v47 = vsel %vm768_vm0, 0.0, %v3363_v28  ;;  %v4189_v63 = vsel %vm768_vm0, %v3363_v28, %v3344_v59  ;;  %v2732_v13 = vpop.permute.xlu0 %2731 }
 0x32a   : > { %4540 = vst.msk [vmem:[%s6281_s24 + $0xd8] sm:$0xff] %vm2528_vm1, %v4292_v57  ;;  %v3362_v3 = vsel %vm768_vm0, 0.0, %v3361_v26  ;;  %v3366_v17 = vsel %vm768_vm0, 0.0, %v3365_v23  ;;  %v4193_v35 = vperm.slane %v4189_v63, %v6088_v41  ;;  %v4194_v50 = vrot.slane %v3364_v47, 4 }
 0x32b   : > { %4524 = vst.msk [vmem:[%s6281_s24 + $0x58] sm:$0xff] %vm2528_vm1, %v4290_v58  ;;  %v3368_v16 = vsel %vm768_vm0, 0.0, %v3367_v2  ;;  %v4200_v7 = vsel %vm768_vm0, %v3367_v2, %v3356_v39  ;;  %v3552_v30 = vsel %vm768_vm0, %v2734_v22, %v3551_v21  ;;  %v3556_v25 = vperm.slane %v3550_v61, %v6088_v41 }
 0x32c   : > { %v4205_v40 = vrot.slane %v3368_v16, 4  ;;  %v4195_v0 = vsel %vm768_vm0, %v4194_v50, %v3362_v3  ;;  %v4204_v4 = vperm.slane %v4200_v7, %v6088_v41  ;;  %v4213_v14 = vrot.slane %v4193_v35, 4 }
 0x32d   : > { %v3560_v24 = vperm.slane %v3552_v30, %v6088_v41  ;;  %v4199_v5 = vperm.slane %v4195_v0, %v6088_v41  ;;  %v3561_v44 = vrot.slane %v3556_v25, 4  ;;  %v3564_v56 = vsel %vm768_vm0, %v3556_v25, %v3563_v9 }
 0x32e   : > { %v4206_v20 = vsel %vm768_vm0, %v4205_v40, %v3366_v17  ;;  %v4225_v22 = vrot.slane %v4204_v4, 4  ;;  %v3572_v18 = vperm.slane %v3564_v56, %v6110_v8  ;;  %v3493_v17 = vrot.slane %v2732_v13, 4 }
 0x32f   : > { %v4210_v21 = vperm.slane %v4206_v20, %v6088_v41  ;;  %v3573_v15 = vrot.slane %v3560_v24, 4  ;;  %v4211_v43 = vrot.slane %v4199_v5, 4  ;;  %v4214_v45 = vsel %vm768_vm0, %v4199_v5, %v4213_v14 }
 0x330   : > { %v3562_v62 = vsel %vm768_vm0, %v3561_v44, %v7690_v29  ;;  %v3576_v53 = vsel %vm768_vm0, %v3560_v24, %v3575_v46  ;;  %v4222_v60 = vperm.slane %v4214_v45, %v6110_v8  ;;  %v3587_v38 = vrot.slane %v3572_v18, 4 }
 0x331   : > { %v4223_v52 = vrot.slane %v4210_v21, 4  ;;  %v4226_v9 = vsel %vm768_vm0, %v4210_v21, %v4225_v22  ;;  %v3568_v48 = vperm.slane %v3562_v62, %v6110_v8  ;;  %v4212_v33 = vsel %vm768_vm0, %v4211_v43, %v4193_v35 }
 0x332   : > { %v4234_v1 = vperm.slane %v4226_v9, %v6110_v8  ;;  %v3574_v55 = vsel %vm768_vm0, %v3573_v15, %v7693_v27  ;;  %v3584_v29 = vperm.slane %v3576_v53, %v6110_v8  ;;  %v4218_v42 = vperm.slane %v4212_v33, %v6110_v8 }
 0x333   : > { %v4224_v46 = vsel %vm768_vm0, %v4223_v52, %v4204_v4  ;;  %v4241_v32 = vrot.slane %v4222_v60, 4  ;;  %v3580_v11 = vperm.slane %v3574_v55, %v6110_v8  ;;  %v3585_v31 = vrot.slane %v3568_v48, 4 }
 0x334   : > { %v4230_v12 = vperm.slane %v4224_v46, %v6110_v8  ;;  %v4239_v6 = vrot.slane %v4234_v1, 4  ;;  %v4237_v59 = vrot.slane %v4218_v42, 4  ;;  %v3591_v49 = vrot.slane %v3584_v29, 4 }
 0x335   : > { %v4242_v27 = vsel %vm768_vm0, %v4234_v1, %v4241_v32  ;;  %v3589_v36 = vrot.slane %v3580_v11, 4  ;;  %v3586_v54 = vsel %vm768_vm0, 0.0, %v3585_v31  ;;  %v3588_v10 = vsel %vm768_vm0, 0.0, %v3587_v38 }
 0x336   : > { %v4235_v37 = vrot.slane %v4230_v12, 4  ;;  %v4240_v39 = vsel %vm768_vm0, %v4239_v6, %v4222_v60  ;;  %4571 = vst.msk [vmem:[%s6281_s24 + $0x1d0] sm:$0xff] %vm2528_vm1, %v4242_v27  ;;  %v4238_v26 = vsel %vm768_vm0, %v4230_v12, %v4237_v59  ;;  %v3592_v57 = vsel %vm768_vm0, 0.0, %v3591_v49 }
 0x337   : > { %4555 = vst.msk [vmem:[%s6281_s24 + $0x150] sm:$0xff] %vm2528_vm1, %v4240_v39  ;;  %v3590_v28 = vsel %vm768_vm0, 0.0, %v3589_v36  ;;  %v4405_v23 = vsel %vm768_vm0, %v3587_v38, %v3568_v48  ;;  %v4410_v58 = vrot.slane %v3588_v10, 4  ;;  %v4416_v3 = vsel %vm768_vm0, %v3591_v49, %v3580_v11 }
 0x338   : > { %v4236_v2 = vsel %vm768_vm0, %v4235_v37, %v4218_v42  ;;  %4539 = vst.msk [vmem:[%s6281_s24 + $0xd0] sm:$0xff] %vm2528_vm1, %v4238_v26  ;;  %v4409_v61 = vperm.slane %v4405_v23, %v6088_v41  ;;  %v4420_v47 = vperm.slane %v4416_v3, %v6088_v41  ;;  %v4421_v63 = vrot.slane %v3592_v57, 4 }
 0x339   : > { %4523 = vst.msk [vmem:[%s6281_s24 + $0x50] sm:$0xff] %vm2528_vm1, %v4236_v2  ;;  %v8662_v16 = vrot.slane %v7378_v34, 4  ;;  %v3519_v50 = vrot.slane %v7290_v19, 4  ;;  %v4411_v7 = vsel %vm768_vm0, %v4410_v58, %v3586_v54  ;;  %v3494_v14 = vsel %vm768_vm0, %v3493_v17, %v7378_v34 }
 0x33a   : > { %v4429_v40 = vrot.slane %v4409_v61, 4  ;;  %v4415_v25 = vperm.slane %v4411_v7, %v6088_v41  ;;  %v4422_v0 = vsel %vm768_vm0, %v4421_v63, %v3590_v28  ;;  %v4441_v4 = vrot.slane %v4420_v47, 4 }
 0x33b   : > { %v3496_v35 = vsel %vm768_vm0, %v2732_v13, %v8662_v16  ;;  %v4426_v24 = vperm.slane %v4422_v0, %v6088_v41  ;;  %v3500_v5 = vperm.slane %v3494_v14, %v6088_v41  ;;  %v3507_v56 = vrot.slane %v7314_v51, 4 }
 0x33c   : > { %v3504_v30 = vperm.slane %v3496_v35, %v6088_v41  ;;  %v4427_v21 = vrot.slane %v4415_v25, 4  ;;  %v4430_v22 = vsel %vm768_vm0, %v4415_v25, %v4429_v40 }
 0x33d   : > { %v4438_v15 = vperm.slane %v4430_v22, %v6110_v8  ;;  %v4439_v43 = vrot.slane %v4426_v24, 4  ;;  %v4442_v45 = vsel %vm768_vm0, %v4426_v24, %v4441_v4  ;;  %v3505_v34 = vrot.slane %v3500_v5, 4  ;;  %v4749_v22 = vld [vmem:[%s6197_s18 + $0x8] sm:$0xff] (%p5831_p13) }
 0x33e   : > { %v3517_v20 = vrot.slane %v3504_v30, 4  ;;  %v3520_v44 = vsel %vm768_vm0, %v3504_v30, %v3519_v50  ;;  %v4428_v62 = vsel %vm768_vm0, %v4427_v21, %v4409_v61  ;;  %v4450_v53 = vperm.slane %v4442_v45, %v6110_v8  ;;  %4750 = vst [vmem:[%s8309_s9 + $0x8] sm:$0xff] (%p5831_p13), %v4749_v22  ;;  %v4757_v45 = vld [vmem:[%s6197_s18 + $0x28] sm:$0xff] (%p5831_p13) }
 0x33f   : > { %v3528_v18 = vperm.slane %v3520_v44, %v6110_v8  ;;  %v3508_v60 = vsel %vm768_vm0, %v3500_v5, %v3507_v56  ;;  %v4434_v9 = vperm.slane %v4428_v62, %v6110_v8  ;;  %v4440_v48 = vsel %vm768_vm0, %v4439_v43, %v4420_v47  ;;  %v4755_v43 = vld [vmem:[%s6197_s18 + $0x20] sm:$0xff] (%p5831_p13)  ;;  %v4761_v62 = vld [vmem:[%s6197_s18 + $0x38] sm:$0xff] (%p5831_p13)  ;;  %4758 = vst [vmem:[%s8309_s9 + $0x28] sm:$0xff] (%p5831_p13), %v4757_v45 }
 0x340   : > { %v3518_v52 = vsel %vm768_vm0, %v3517_v20, %v7290_v19  ;;  %v4457_v33 = vrot.slane %v4438_v15, 4  ;;  %v3506_v1 = vsel %vm768_vm0, %v3505_v34, %v7314_v51  ;;  %v4446_v55 = vperm.slane %v4440_v48, %v6110_v8  ;;  %v4759_v34 = vld [vmem:[%s6197_s18 + $0x30] sm:$0xff] (%p5831_p13)  ;;  %4756 = vst [vmem:[%s8309_s9 + $0x20] sm:$0xff] (%p5831_p13), %v4755_v43  ;;  %v4771_v48 = vld [vmem:[%s6197_s18 + $0x60] sm:$0xff] (%p5831_p13) }
 0x341   : > { %v4455_v29 = vrot.slane %v4450_v53, 4  ;;  %v3512_v42 = vperm.slane %v3506_v1, %v6110_v8  ;;  %v3516_v46 = vperm.slane %v3508_v60, %v6110_v8  ;;  %v4453_v32 = vrot.slane %v4434_v9, 4  ;;  %4760 = vst [vmem:[%s8309_s9 + $0x30] sm:$0xff] (%p5831_p13), %v4759_v34  ;;  %v4765_v60 = vld [vmem:[%s6197_s18 + $0x48] sm:$0xff] (%p5831_p13)  ;;  %v4775_v1 = vld [vmem:[%s6197_s18 + $0x70] sm:$0xff] (%p5831_p13) }
 0x342   : > { %v4458_v19 = vsel %vm768_vm0, %v4450_v53, %v4457_v33  ;;  %v3524_v11 = vperm.slane %v3518_v52, %v6110_v8  ;;  %v3535_v12 = vrot.slane %v3528_v18, 4  ;;  %v4451_v6 = vrot.slane %v4446_v55, 4  ;;  %v4751_v18 = vld [vmem:[%s6197_s18 + $0x10] sm:$0xff] (%p5831_p13)  ;;  %v4763_v53 = vld [vmem:[%s6197_s18 + $0x40] sm:$0xff] (%p5831_p13)  ;;  %4762 = vst [vmem:[%s8309_s9 + $0x38] sm:$0xff] (%p5831_p13), %v4761_v62  ;;  %v4773_v33 = vld [vmem:[%s6197_s18 + $0x68] sm:$0xff] (%p5831_p13) }
 0x343   : > { %v4456_v31 = vsel %vm768_vm0, %v4455_v29, %v4438_v15  ;;  %4575 = vst.msk [vmem:[%s6281_s24 + $0x1f0] sm:$0xff] %vm2528_vm1, %v4458_v19  ;;  %v3529_v51 = vrot.slane %v3512_v42, 4  ;;  %v3531_v38 = vrot.slane %v3516_v46, 4  ;;  %v4454_v59 = vsel %vm768_vm0, %v4446_v55, %v4453_v32  ;;  %v4753_v15 = vld [vmem:[%s6197_s18 + $0x18] sm:$0xff] (%p5831_p13)  ;;  %v4767_v52 = vld [vmem:[%s6197_s18 + $0x50] sm:$0xff] (%p5831_p13)  ;;  %v4779_v29 = vld [vmem:[%s6197_s18 + $0x80] sm:$0xff] (%p5831_p13) }
 0x344   : > { %4559 = vst.msk [vmem:[%s6281_s24 + $0x170] sm:$0xff] %vm2528_vm1, %v4456_v31  ;;  %v3533_v27 = vrot.slane %v3524_v11, 4  ;;  %v3536_v36 = vsel %vm768_vm0, 0.0, %v3535_v12  ;;  %v4362_v49 = vsel %vm768_vm0, %v3535_v12, %v3524_v11  ;;  %v4452_v37 = vsel %vm768_vm0, %v4451_v6, %v4434_v9  ;;  %v4769_v9 = vld [vmem:[%s6197_s18 + $0x58] sm:$0xff] (%p5831_p13)  ;;  %v4783_v46 = vld [vmem:[%s6197_s18 + $0x90] sm:$0xff] (%p5831_p13)  ;;  %v4787_v19 = vld [vmem:[%s6197_s18 + $0xa0] sm:$0xff] (%p5831_p13) }
 0x345   : > { %4543 = vst.msk [vmem:[%s6281_s24 + $0xf0] sm:$0xff] %vm2528_vm1, %v4454_v59  ;;  %v3530_v39 = vsel %vm768_vm0, 0.0, %v3529_v51  ;;  %v3532_v54 = vsel %vm768_vm0, 0.0, %v3531_v38  ;;  %v4351_v10 = vsel %vm768_vm0, %v3531_v38, %v3512_v42  ;;  %v4366_v57 = vperm.slane %v4362_v49, %v6088_v41  ;;  %v4777_v55 = vld [vmem:[%s6197_s18 + $0x78] sm:$0xff] (%p5831_p13)  ;;  %v4781_v42 = vld [vmem:[%s6197_s18 + $0x88] sm:$0xff] (%p5831_p13)  ;;  %v4791_v12 = vld [vmem:[%s6197_s18 + $0xb0] sm:$0xff] (%p5831_p13) }
 0x346   : > { %4527 = vst.msk [vmem:[%s6281_s24 + $0x70] sm:$0xff] %vm2528_vm1, %v4452_v37  ;;  %v3534_v13 = vsel %vm768_vm0, 0.0, %v3533_v27  ;;  %v4355_v26 = vperm.slane %v4351_v10, %v6088_v41  ;;  %v4356_v28 = vrot.slane %v3532_v54, 4  ;;  %v4367_v23 = vrot.slane %v3536_v36, 4  ;;  %v4785_v32 = vld [vmem:[%s6197_s18 + $0x98] sm:$0xff] (%p5831_p13)  ;;  %v4789_v11 = vld [vmem:[%s6197_s18 + $0xa8] sm:$0xff] (%p5831_p13) }
 0x347   : > { %v4387_v58 = vrot.slane %v4366_v57, 4  ;;  %4752 = vst [vmem:[%s8309_s9 + $0x10] sm:$0xff] (%p5831_p13), %v4751_v18  ;;  %v4793_v6 = vld [vmem:[%s6197_s18 + $0xb8] sm:$0xff] (%p5831_p13)  ;;  %v4795_v31 = vld [vmem:[%s6197_s18 + $0xc0] sm:$0xff] (%p5831_p13)  ;;  %v4797_v51 = vld [vmem:[%s6197_s18 + $0xc8] sm:$0xff] (%p5831_p13) }
 0x348   : > { %v4357_v2 = vsel %vm768_vm0, %v4356_v28, %v3530_v39  ;;  %v4375_v61 = vrot.slane %v4355_v26, 4  ;;  %v4368_v47 = vsel %vm768_vm0, %v4367_v23, %v3534_v13  ;;  %4754 = vst [vmem:[%s8309_s9 + $0x18] sm:$0xff] (%p5831_p13), %v4753_v15  ;;  %v4799_v38 = vld [vmem:[%s6197_s18 + $0xd0] sm:$0xff] (%p5831_p13)  ;;  %v4801_v59 = vld [vmem:[%s6197_s18 + $0xd8] sm:$0xff] (%p5831_p13)  ;;  %v4803_v27 = vld [vmem:[%s6197_s18 + $0xe0] sm:$0xff] (%p5831_p13) }
 0x349   : > { %v4361_v3 = vperm.slane %v4357_v2, %v6088_v41  ;;  %v4372_v63 = vperm.slane %v4368_v47, %v6088_v41  ;;  %4764 = vst [vmem:[%s8309_s9 + $0x40] sm:$0xff] (%p5831_p13), %v4763_v53  ;;  %v4805_v36 = vld [vmem:[%s6197_s18 + $0xe8] sm:$0xff] (%p5831_p13)  ;;  %v4807_v49 = vld [vmem:[%s6197_s18 + $0xf0] sm:$0xff] (%p5831_p13)  ;;  %v4809_v37 = vld [vmem:[%s6197_s18 + $0xf8] sm:$0xff] (%p5831_p13) }
 0x34a   : > { %4766 = vst [vmem:[%s8309_s9 + $0x48] sm:$0xff] (%p5831_p13), %v4765_v60  ;;  %v4811_v39 = vld [vmem:[%s6197_s18 + $0x100] sm:$0xff] (%p5831_p13)  ;;  %v4813_v54 = vld [vmem:[%s6197_s18 + $0x108] sm:$0xff] (%p5831_p13)  ;;  %v4815_v10 = vld [vmem:[%s6197_s18 + $0x110] sm:$0xff] (%p5831_p13) }
 0x34b   : > { %v4373_v17 = vrot.slane %v4361_v3, 4  ;;  %v4376_v16 = vsel %vm768_vm0, %v4361_v3, %v4375_v61  ;;  %v4385_v50 = vrot.slane %v4372_v63, 4  ;;  %v4388_v7 = vsel %vm768_vm0, %v4372_v63, %v4387_v58  ;;  %4768 = vst [vmem:[%s8309_s9 + $0x50] sm:$0xff] (%p5831_p13), %v4767_v52  ;;  %v4817_v13 = vld [vmem:[%s6197_s18 + $0x118] sm:$0xff] (%p5831_p13)  ;;  %v4821_v28 = vld [vmem:[%s6197_s18 + $0x128] sm:$0xff] (%p5831_p13)  ;;  %v4827_v2 = vld [vmem:[%s6197_s18 + $0x140] sm:$0xff] (%p5831_p13) }
 0x34c   : > { %v4384_v35 = vperm.slane %v4376_v16, %v6110_v8  ;;  %v4396_v30 = vperm.slane %v4388_v7, %v6110_v8  ;;  %4770 = vst [vmem:[%s8309_s9 + $0x58] sm:$0xff] (%p5831_p13), %v4769_v9  ;;  %v4825_v23 = vld [vmem:[%s6197_s18 + $0x138] sm:$0xff] (%p5831_p13)  ;;  %v4829_v61 = vld [vmem:[%s6197_s18 + $0x148] sm:$0xff] (%p5831_p13)  ;;  %v4831_v58 = vld [vmem:[%s6197_s18 + $0x150] sm:$0xff] (%p5831_p13) }
 0x34d   : > { %v4374_v40 = vsel %vm768_vm0, %v4373_v17, %v4355_v26  ;;  %v4386_v41 = vsel %vm768_vm0, %v4385_v50, %v4366_v57  ;;  %4772 = vst [vmem:[%s8309_s9 + $0x60] sm:$0xff] (%p5831_p13), %v4771_v48  ;;  %v4819_v26 = vld [vmem:[%s6197_s18 + $0x120] sm:$0xff] (%p5831_p13)  ;;  %v4823_v57 = vld [vmem:[%s6197_s18 + $0x130] sm:$0xff] (%p5831_p13)  ;;  %v4833_v3 = vld [vmem:[%s6197_s18 + $0x158] sm:$0xff] (%p5831_p13) }
 0x34e   : > { %v4380_v25 = vperm.slane %v4374_v40, %v6110_v8  ;;  %v4403_v0 = vrot.slane %v4384_v35, 4  ;;  %v4392_v4 = vperm.slane %v4386_v41, %v6110_v8  ;;  %v4401_v14 = vrot.slane %v4396_v30, 4  ;;  %v4747_v8 = vld [vmem:[%s6197_s18] sm:$0xff] (%p5831_p13)  ;;  %4774 = vst [vmem:[%s8309_s9 + $0x68] sm:$0xff] (%p5831_p13), %v4773_v33  ;;  %v4837_v63 = vld [vmem:[%s6197_s18 + $0x168] sm:$0xff] (%p5831_p13)  ;;  %v4839_v17 = vld [vmem:[%s6197_s18 + $0x170] sm:$0xff] (%p5831_p13) }
 0x34f   : > { %4748 = vst [vmem:[%s8309_s9] sm:$0xff] (%p5831_p13), %v4747_v8  ;;  %v4835_v47 = vld [vmem:[%s6197_s18 + $0x160] sm:$0xff] (%p5831_p13)  ;;  %v4841_v16 = vld [vmem:[%s6197_s18 + $0x178] sm:$0xff] (%p5831_p13)  ;;  %v4845_v50 = vld [vmem:[%s6197_s18 + $0x188] sm:$0xff] (%p5831_p13) }
 0x350   : > { %v4399_v24 = vrot.slane %v4380_v25, 4  ;;  %v4404_v5 = vsel %vm768_vm0, %v4396_v30, %v4403_v0  ;;  %v4397_v20 = vrot.slane %v4392_v4, 4  ;;  %v4402_v44 = vsel %vm768_vm0, %v4401_v14, %v4384_v35  ;;  %4587 = sbr.rel (!%p5831_p13) target bundleno = 902 (0x386), region = 64  ;;  %4776 = vst [vmem:[%s8309_s9 + $0x70] sm:$0xff] (%p5831_p13), %v4775_v1  ;;  %v4843_v35 = vld [vmem:[%s6197_s18 + $0x180] sm:$0xff] (%p5831_p13)  ;;  %v4847_v7 = vld [vmem:[%s6197_s18 + $0x190] sm:$0xff] (%p5831_p13) }
 0x351   : > { %4574 = vst.msk [vmem:[%s6281_s24 + $0x1e8] sm:$0xff] %vm2528_vm1, %v4404_v5  ;;  %v4849_v40 = vld [vmem:[%s6197_s18 + $0x198] sm:$0xff] (%p5831_p13)  ;;  %v4851_v30 = vld [vmem:[%s6197_s18 + $0x1a0] sm:$0xff] (%p5831_p13)  ;;  %v4855_v41 = vld [vmem:[%s6197_s18 + $0x1b0] sm:$0xff] (%p5831_p13) }
 0x352   : > { %v4400_v56 = vsel %vm768_vm0, %v4392_v4, %v4399_v24  ;;  %4558 = vst.msk [vmem:[%s6281_s24 + $0x168] sm:$0xff] %vm2528_vm1, %v4402_v44  ;;  %v4398_v21 = vsel %vm768_vm0, %v4397_v20, %v4380_v25  ;;  %v4853_v25 = vld [vmem:[%s6197_s18 + $0x1a8] sm:$0xff] (%p5831_p13)  ;;  %v4857_v0 = vld [vmem:[%s6197_s18 + $0x1b8] sm:$0xff] (%p5831_p13)  ;;  %v4859_v4 = vld [vmem:[%s6197_s18 + $0x1c0] sm:$0xff] (%p5831_p13) }
 0x353   : > { %4542 = vst.msk [vmem:[%s6281_s24 + $0xe8] sm:$0xff] %vm2528_vm1, %v4400_v56  ;;  %v4861_v14 = vld [vmem:[%s6197_s18 + $0x1c8] sm:$0xff] (%p5831_p13)  ;;  %v4863_v24 = vld [vmem:[%s6197_s18 + $0x1d0] sm:$0xff] (%p5831_p13)  ;;  %v4865_v5 = vld [vmem:[%s6197_s18 + $0x1d8] sm:$0xff] (%p5831_p13) }
 0x354   : > { %4526 = vst.msk [vmem:[%s6281_s24 + $0x68] sm:$0xff] %vm2528_vm1, %v4398_v21  ;;  %v4867_v20 = vld [vmem:[%s6197_s18 + $0x1e0] sm:$0xff] (%p5831_p13)  ;;  %v4869_v44 = vld [vmem:[%s6197_s18 + $0x1e8] sm:$0xff] (%p5831_p13)  ;;  %v4871_v56 = vld [vmem:[%s6197_s18 + $0x1f0] sm:$0xff] (%p5831_p13) }
 0x355   : > { %4778 = vst [vmem:[%s8309_s9 + $0x78] sm:$0xff] %v4777_v55  ;;  %v4873_v21 = vld [vmem:[%s6197_s18 + $0x1f8] sm:$0xff] }
 0x356   : > { %4780 = vst [vmem:[%s8309_s9 + $0x100] sm:$0xff] %v4779_v29 }
 0x357   : > { %4782 = vst [vmem:[%s8309_s9 + $0x108] sm:$0xff] %v4781_v42 }
 0x358   : > { %4784 = vst [vmem:[%s8309_s9 + $0x110] sm:$0xff] %v4783_v46 }
 0x359   : > { %4786 = vst [vmem:[%s8309_s9 + $0x118] sm:$0xff] %v4785_v32 }
 0x35a   : > { %4788 = vst [vmem:[%s8309_s9 + $0x120] sm:$0xff] %v4787_v19 }
 0x35b   : > { %4790 = vst [vmem:[%s8309_s9 + $0x128] sm:$0xff] %v4789_v11 }
 0x35c   : > { %4792 = vst [vmem:[%s8309_s9 + $0x130] sm:$0xff] %v4791_v12 }
 0x35d   : > { %4794 = vst [vmem:[%s8309_s9 + $0x138] sm:$0xff] %v4793_v6 }
 0x35e   : > { %4796 = vst [vmem:[%s8309_s9 + $0x140] sm:$0xff] %v4795_v31 }
 0x35f   : > { %4798 = vst [vmem:[%s8309_s9 + $0x148] sm:$0xff] %v4797_v51 }
 0x360   : > { %4800 = vst [vmem:[%s8309_s9 + $0x150] sm:$0xff] %v4799_v38 }
 0x361   : > { %4802 = vst [vmem:[%s8309_s9 + $0x158] sm:$0xff] %v4801_v59 }
 0x362   : > { %4804 = vst [vmem:[%s8309_s9 + $0x160] sm:$0xff] %v4803_v27 }
 0x363   : > { %4806 = vst [vmem:[%s8309_s9 + $0x168] sm:$0xff] %v4805_v36 }
 0x364   : > { %4808 = vst [vmem:[%s8309_s9 + $0x170] sm:$0xff] %v4807_v49 }
 0x365   : > { %4810 = vst [vmem:[%s8309_s9 + $0x178] sm:$0xff] %v4809_v37 }
 0x366   : > { %4812 = vst [vmem:[%s8309_s9 + $0x200] sm:$0xff] %v4811_v39 }
 0x367   : > { %4814 = vst [vmem:[%s8309_s9 + $0x208] sm:$0xff] %v4813_v54 }
 0x368   : > { %4816 = vst [vmem:[%s8309_s9 + $0x210] sm:$0xff] %v4815_v10 }
 0x369   : > { %4818 = vst [vmem:[%s8309_s9 + $0x218] sm:$0xff] %v4817_v13 }
 0x36a   : > { %4820 = vst [vmem:[%s8309_s9 + $0x220] sm:$0xff] %v4819_v26 }
 0x36b   : > { %4822 = vst [vmem:[%s8309_s9 + $0x228] sm:$0xff] %v4821_v28 }
 0x36c   : > { %4824 = vst [vmem:[%s8309_s9 + $0x230] sm:$0xff] %v4823_v57 }
 0x36d   : > { %4826 = vst [vmem:[%s8309_s9 + $0x238] sm:$0xff] %v4825_v23 }
 0x36e   : > { %4828 = vst [vmem:[%s8309_s9 + $0x240] sm:$0xff] %v4827_v2 }
 0x36f   : > { %4830 = vst [vmem:[%s8309_s9 + $0x248] sm:$0xff] %v4829_v61 }
 0x370   : > { %4832 = vst [vmem:[%s8309_s9 + $0x250] sm:$0xff] %v4831_v58 }
 0x371   : > { %4834 = vst [vmem:[%s8309_s9 + $0x258] sm:$0xff] %v4833_v3 }
 0x372   : > { %4836 = vst [vmem:[%s8309_s9 + $0x260] sm:$0xff] %v4835_v47 }
 0x373   : > { %4838 = vst [vmem:[%s8309_s9 + $0x268] sm:$0xff] %v4837_v63 }
 0x374   : > { %4840 = vst [vmem:[%s8309_s9 + $0x270] sm:$0xff] %v4839_v17 }
 0x375   : > { %4842 = vst [vmem:[%s8309_s9 + $0x278] sm:$0xff] %v4841_v16 }
 0x376   : > { %4844 = vst [vmem:[%s8309_s9 + $0x300] sm:$0xff] %v4843_v35 }
 0x377   : > { %4846 = vst [vmem:[%s8309_s9 + $0x308] sm:$0xff] %v4845_v50 }
 0x378   : > { %4848 = vst [vmem:[%s8309_s9 + $0x310] sm:$0xff] %v4847_v7 }
 0x379   : > { %4850 = vst [vmem:[%s8309_s9 + $0x318] sm:$0xff] %v4849_v40 }
 0x37a   : > { %4852 = vst [vmem:[%s8309_s9 + $0x320] sm:$0xff] %v4851_v30 }
 0x37b   : > { %4854 = vst [vmem:[%s8309_s9 + $0x328] sm:$0xff] %v4853_v25 }
 0x37c   : > { %4856 = vst [vmem:[%s8309_s9 + $0x330] sm:$0xff] %v4855_v41 }
 0x37d   : > { %4858 = vst [vmem:[%s8309_s9 + $0x338] sm:$0xff] %v4857_v0 }
 0x37e   : > { %4860 = vst [vmem:[%s8309_s9 + $0x340] sm:$0xff] %v4859_v4 }
 0x37f   : > { %4862 = vst [vmem:[%s8309_s9 + $0x348] sm:$0xff] %v4861_v14 }
 0x380   : > { %4864 = vst [vmem:[%s8309_s9 + $0x350] sm:$0xff] %v4863_v24 }
 0x381   : > { %4866 = vst [vmem:[%s8309_s9 + $0x358] sm:$0xff] %v4865_v5 }
 0x382   : > { %4868 = vst [vmem:[%s8309_s9 + $0x360] sm:$0xff] %v4867_v20 }
 0x383   : > { %4870 = vst [vmem:[%s8309_s9 + $0x368] sm:$0xff] %v4869_v44 }
 0x384   : > { %4872 = vst [vmem:[%s8309_s9 + $0x370] sm:$0xff] %v4871_v56 }
 0x385   : > { %4874 = vst [vmem:[%s8309_s9 + $0x378] sm:$0xff] %v4873_v21 }
 0x386 PF: > { %4880 = sbr.rel (!%p5831_p13) target bundleno = 974 (0x3ce), region = 102  ;;  %s5352_s10 = sshll.u32 (%p5831_p13), %s5679_s27, 4  ;;  %v5040_v8 = vld [vmem:[%s6281_s24] sm:$0xff] (%p5831_p13)  ;;  %v5042_v22 = vld [vmem:[%s6281_s24 + $0x8] sm:$0xff] (%p5831_p13)  ;;  %v5044_v18 = vld [vmem:[%s6281_s24 + $0x10] sm:$0xff] (%p5831_p13) }
 0x387   : > { %s5353_s23 = sshll.u32 (%p5831_p13), %s5683_s28, 7  ;;  %s8664_s13 = sld [smem:[#allocation24_spill]] (%p5831_p13)  ;;  %v5046_v15 = vld [vmem:[%s6281_s24 + $0x18] sm:$0xff] (%p5831_p13)  ;;  %v5048_v43 = vld [vmem:[%s6281_s24 + $0x20] sm:$0xff] (%p5831_p13)  ;;  %v5050_v45 = vld [vmem:[%s6281_s24 + $0x28] sm:$0xff] (%p5831_p13) }
 0x388   : > { %s4883_s14 = sadd.s32 (%p5831_p13), %s5353_s23, %s5352_s10  ;;  %v5052_v34 = vld [vmem:[%s6281_s24 + $0x30] sm:$0xff] (%p5831_p13)  ;;  %v5054_v62 = vld [vmem:[%s6281_s24 + $0x38] sm:$0xff] (%p5831_p13)  ;;  %v5056_v53 = vld [vmem:[%s6281_s24 + $0x40] sm:$0xff] (%p5831_p13) }
 0x389   : > { %s5354_s19 = sshll.u32 (%p5831_p13), %s4883_s14, 3  ;;  %v5058_v60 = vld [vmem:[%s6281_s24 + $0x48] sm:$0xff] (%p5831_p13)  ;;  %v5060_v52 = vld [vmem:[%s6281_s24 + $0x50] sm:$0xff] (%p5831_p13)  ;;  %v5062_v9 = vld [vmem:[%s6281_s24 + $0x58] sm:$0xff] (%p5831_p13) }
 0x38a   : > { %v5064_v48 = vld [vmem:[%s6281_s24 + $0x60] sm:$0xff] (%p5831_p13)  ;;  %v5068_v1 = vld [vmem:[%s6281_s24 + $0x70] sm:$0xff] (%p5831_p13)  ;;  %v5070_v55 = vld [vmem:[%s6281_s24 + $0x78] sm:$0xff] (%p5831_p13) }
 0x38b   : > { %v5072_v29 = vld [vmem:[%s6281_s24 + $0x80] sm:$0xff]  ;;  %v5074_v42 = vld [vmem:[%s6281_s24 + $0x88] sm:$0xff]  ;;  %v5076_v46 = vld [vmem:[%s6281_s24 + $0x90] sm:$0xff] }
 0x38c   : > { %v5066_v33 = vld [vmem:[%s6281_s24 + $0x68] sm:$0xff]  ;;  %v5078_v32 = vld [vmem:[%s6281_s24 + $0x98] sm:$0xff]  ;;  %v5080_v19 = vld [vmem:[%s6281_s24 + $0xa0] sm:$0xff] }
 0x38d   : > { %s8446_s20 = scalar_lea.vmem %s8664_s13, %s5354_s19  ;;  %v5082_v11 = vld [vmem:[%s6281_s24 + $0xa8] sm:$0xff]  ;;  %v5084_v12 = vld [vmem:[%s6281_s24 + $0xb0] sm:$0xff]  ;;  %v5086_v6 = vld [vmem:[%s6281_s24 + $0xb8] sm:$0xff] }
 0x38e   : > { %5041 = vst [vmem:[%s8446_s20] sm:$0xff] %v5040_v8  ;;  %v5088_v31 = vld [vmem:[%s6281_s24 + $0xc0] sm:$0xff]  ;;  %v5090_v51 = vld [vmem:[%s6281_s24 + $0xc8] sm:$0xff]  ;;  %v5092_v38 = vld [vmem:[%s6281_s24 + $0xd0] sm:$0xff] }
 0x38f   : > { %5043 = vst [vmem:[%s8446_s20 + $0x8] sm:$0xff] %v5042_v22  ;;  %v5094_v59 = vld [vmem:[%s6281_s24 + $0xd8] sm:$0xff]  ;;  %v5096_v27 = vld [vmem:[%s6281_s24 + $0xe0] sm:$0xff]  ;;  %v5098_v36 = vld [vmem:[%s6281_s24 + $0xe8] sm:$0xff] }
 0x390   : > { %5045 = vst [vmem:[%s8446_s20 + $0x10] sm:$0xff] %v5044_v18  ;;  %v5100_v49 = vld [vmem:[%s6281_s24 + $0xf0] sm:$0xff]  ;;  %v5102_v37 = vld [vmem:[%s6281_s24 + $0xf8] sm:$0xff]  ;;  %v5104_v39 = vld [vmem:[%s6281_s24 + $0x100] sm:$0xff] }
 0x391   : > { %5047 = vst [vmem:[%s8446_s20 + $0x18] sm:$0xff] %v5046_v15  ;;  %v5106_v54 = vld [vmem:[%s6281_s24 + $0x108] sm:$0xff]  ;;  %v5108_v10 = vld [vmem:[%s6281_s24 + $0x110] sm:$0xff]  ;;  %v5110_v13 = vld [vmem:[%s6281_s24 + $0x118] sm:$0xff] }
 0x392   : > { %5049 = vst [vmem:[%s8446_s20 + $0x20] sm:$0xff] %v5048_v43  ;;  %v5112_v26 = vld [vmem:[%s6281_s24 + $0x120] sm:$0xff]  ;;  %v5114_v28 = vld [vmem:[%s6281_s24 + $0x128] sm:$0xff]  ;;  %v5116_v57 = vld [vmem:[%s6281_s24 + $0x130] sm:$0xff] }
 0x393   : > { %5051 = vst [vmem:[%s8446_s20 + $0x28] sm:$0xff] %v5050_v45  ;;  %v5118_v23 = vld [vmem:[%s6281_s24 + $0x138] sm:$0xff]  ;;  %v5120_v2 = vld [vmem:[%s6281_s24 + $0x140] sm:$0xff]  ;;  %v5122_v61 = vld [vmem:[%s6281_s24 + $0x148] sm:$0xff] }
 0x394   : > { %5053 = vst [vmem:[%s8446_s20 + $0x30] sm:$0xff] %v5052_v34  ;;  %v5124_v58 = vld [vmem:[%s6281_s24 + $0x150] sm:$0xff]  ;;  %v5126_v3 = vld [vmem:[%s6281_s24 + $0x158] sm:$0xff]  ;;  %v5128_v47 = vld [vmem:[%s6281_s24 + $0x160] sm:$0xff] }
 0x395   : > { %5055 = vst [vmem:[%s8446_s20 + $0x38] sm:$0xff] %v5054_v62  ;;  %v5130_v63 = vld [vmem:[%s6281_s24 + $0x168] sm:$0xff]  ;;  %v5132_v17 = vld [vmem:[%s6281_s24 + $0x170] sm:$0xff]  ;;  %v5134_v16 = vld [vmem:[%s6281_s24 + $0x178] sm:$0xff] }
 0x396   : > { %5057 = vst [vmem:[%s8446_s20 + $0x40] sm:$0xff] %v5056_v53  ;;  %v5136_v35 = vld [vmem:[%s6281_s24 + $0x180] sm:$0xff]  ;;  %v5138_v50 = vld [vmem:[%s6281_s24 + $0x188] sm:$0xff]  ;;  %v5140_v7 = vld [vmem:[%s6281_s24 + $0x190] sm:$0xff] }
 0x397   : > { %5059 = vst [vmem:[%s8446_s20 + $0x48] sm:$0xff] %v5058_v60  ;;  %v5142_v40 = vld [vmem:[%s6281_s24 + $0x198] sm:$0xff]  ;;  %v5144_v30 = vld [vmem:[%s6281_s24 + $0x1a0] sm:$0xff]  ;;  %v5146_v25 = vld [vmem:[%s6281_s24 + $0x1a8] sm:$0xff] }
 0x398   : > { %5061 = vst [vmem:[%s8446_s20 + $0x50] sm:$0xff] %v5060_v52  ;;  %v5148_v41 = vld [vmem:[%s6281_s24 + $0x1b0] sm:$0xff]  ;;  %v5150_v0 = vld [vmem:[%s6281_s24 + $0x1b8] sm:$0xff]  ;;  %v5152_v4 = vld [vmem:[%s6281_s24 + $0x1c0] sm:$0xff] }
 0x399   : > { %5063 = vst [vmem:[%s8446_s20 + $0x58] sm:$0xff] %v5062_v9  ;;  %v5154_v14 = vld [vmem:[%s6281_s24 + $0x1c8] sm:$0xff]  ;;  %v5156_v24 = vld [vmem:[%s6281_s24 + $0x1d0] sm:$0xff]  ;;  %v5158_v5 = vld [vmem:[%s6281_s24 + $0x1d8] sm:$0xff] }
 0x39a   : > { %5065 = vst [vmem:[%s8446_s20 + $0x60] sm:$0xff] %v5064_v48  ;;  %v5160_v20 = vld [vmem:[%s6281_s24 + $0x1e0] sm:$0xff]  ;;  %v5162_v44 = vld [vmem:[%s6281_s24 + $0x1e8] sm:$0xff]  ;;  %v5164_v56 = vld [vmem:[%s6281_s24 + $0x1f0] sm:$0xff] }
 0x39b   : > { %5067 = vst [vmem:[%s8446_s20 + $0x68] sm:$0xff] %v5066_v33  ;;  %v5166_v21 = vld [vmem:[%s6281_s24 + $0x1f8] sm:$0xff] }
 0x39c   : > { %5069 = vst [vmem:[%s8446_s20 + $0x70] sm:$0xff] %v5068_v1 }
 0x39d   : > { %5071 = vst [vmem:[%s8446_s20 + $0x78] sm:$0xff] %v5070_v55 }
 0x39e   : > { %5073 = vst [vmem:[%s8446_s20 + $0x100] sm:$0xff] %v5072_v29 }
 0x39f   : > { %5075 = vst [vmem:[%s8446_s20 + $0x108] sm:$0xff] %v5074_v42 }
 0x3a0   : > { %5077 = vst [vmem:[%s8446_s20 + $0x110] sm:$0xff] %v5076_v46 }
 0x3a1   : > { %5079 = vst [vmem:[%s8446_s20 + $0x118] sm:$0xff] %v5078_v32 }
 0x3a2   : > { %5081 = vst [vmem:[%s8446_s20 + $0x120] sm:$0xff] %v5080_v19 }
 0x3a3   : > { %5083 = vst [vmem:[%s8446_s20 + $0x128] sm:$0xff] %v5082_v11 }
 0x3a4   : > { %5085 = vst [vmem:[%s8446_s20 + $0x130] sm:$0xff] %v5084_v12 }
 0x3a5   : > { %5087 = vst [vmem:[%s8446_s20 + $0x138] sm:$0xff] %v5086_v6 }
 0x3a6   : > { %5089 = vst [vmem:[%s8446_s20 + $0x140] sm:$0xff] %v5088_v31 }
 0x3a7   : > { %5091 = vst [vmem:[%s8446_s20 + $0x148] sm:$0xff] %v5090_v51 }
 0x3a8   : > { %5093 = vst [vmem:[%s8446_s20 + $0x150] sm:$0xff] %v5092_v38 }
 0x3a9   : > { %5095 = vst [vmem:[%s8446_s20 + $0x158] sm:$0xff] %v5094_v59 }
 0x3aa   : > { %5097 = vst [vmem:[%s8446_s20 + $0x160] sm:$0xff] %v5096_v27 }
 0x3ab   : > { %5099 = vst [vmem:[%s8446_s20 + $0x168] sm:$0xff] %v5098_v36 }
 0x3ac   : > { %5101 = vst [vmem:[%s8446_s20 + $0x170] sm:$0xff] %v5100_v49 }
 0x3ad   : > { %5103 = vst [vmem:[%s8446_s20 + $0x178] sm:$0xff] %v5102_v37 }
 0x3ae   : > { %5105 = vst [vmem:[%s8446_s20 + $0x200] sm:$0xff] %v5104_v39 }
 0x3af   : > { %5107 = vst [vmem:[%s8446_s20 + $0x208] sm:$0xff] %v5106_v54 }
 0x3b0   : > { %5109 = vst [vmem:[%s8446_s20 + $0x210] sm:$0xff] %v5108_v10 }
 0x3b1   : > { %5111 = vst [vmem:[%s8446_s20 + $0x218] sm:$0xff] %v5110_v13 }
 0x3b2   : > { %5113 = vst [vmem:[%s8446_s20 + $0x220] sm:$0xff] %v5112_v26 }
 0x3b3   : > { %5115 = vst [vmem:[%s8446_s20 + $0x228] sm:$0xff] %v5114_v28 }
 0x3b4   : > { %5117 = vst [vmem:[%s8446_s20 + $0x230] sm:$0xff] %v5116_v57 }
 0x3b5   : > { %5119 = vst [vmem:[%s8446_s20 + $0x238] sm:$0xff] %v5118_v23 }
 0x3b6   : > { %5121 = vst [vmem:[%s8446_s20 + $0x240] sm:$0xff] %v5120_v2 }
 0x3b7   : > { %5123 = vst [vmem:[%s8446_s20 + $0x248] sm:$0xff] %v5122_v61 }
 0x3b8   : > { %5125 = vst [vmem:[%s8446_s20 + $0x250] sm:$0xff] %v5124_v58 }
 0x3b9   : > { %5127 = vst [vmem:[%s8446_s20 + $0x258] sm:$0xff] %v5126_v3 }
 0x3ba   : > { %5129 = vst [vmem:[%s8446_s20 + $0x260] sm:$0xff] %v5128_v47 }
 0x3bb   : > { %5131 = vst [vmem:[%s8446_s20 + $0x268] sm:$0xff] %v5130_v63 }
 0x3bc   : > { %5133 = vst [vmem:[%s8446_s20 + $0x270] sm:$0xff] %v5132_v17 }
 0x3bd   : > { %5135 = vst [vmem:[%s8446_s20 + $0x278] sm:$0xff] %v5134_v16 }
 0x3be   : > { %5137 = vst [vmem:[%s8446_s20 + $0x300] sm:$0xff] %v5136_v35 }
 0x3bf   : > { %5139 = vst [vmem:[%s8446_s20 + $0x308] sm:$0xff] %v5138_v50 }
 0x3c0   : > { %5141 = vst [vmem:[%s8446_s20 + $0x310] sm:$0xff] %v5140_v7 }
 0x3c1   : > { %5143 = vst [vmem:[%s8446_s20 + $0x318] sm:$0xff] %v5142_v40 }
 0x3c2   : > { %5145 = vst [vmem:[%s8446_s20 + $0x320] sm:$0xff] %v5144_v30 }
 0x3c3   : > { %5147 = vst [vmem:[%s8446_s20 + $0x328] sm:$0xff] %v5146_v25 }
 0x3c4   : > { %5149 = vst [vmem:[%s8446_s20 + $0x330] sm:$0xff] %v5148_v41 }
 0x3c5   : > { %5151 = vst [vmem:[%s8446_s20 + $0x338] sm:$0xff] %v5150_v0 }
 0x3c6   : > { %5153 = vst [vmem:[%s8446_s20 + $0x340] sm:$0xff] %v5152_v4 }
 0x3c7   : > { %5155 = vst [vmem:[%s8446_s20 + $0x348] sm:$0xff] %v5154_v14 }
 0x3c8   : > { %5157 = vst [vmem:[%s8446_s20 + $0x350] sm:$0xff] %v5156_v24 }
 0x3c9   : > { %5159 = vst [vmem:[%s8446_s20 + $0x358] sm:$0xff] %v5158_v5 }
 0x3ca   : > { %5161 = vst [vmem:[%s8446_s20 + $0x360] sm:$0xff] %v5160_v20 }
 0x3cb   : > { %5163 = vst [vmem:[%s8446_s20 + $0x368] sm:$0xff] %v5162_v44 }
 0x3cc   : > { %5165 = vst [vmem:[%s8446_s20 + $0x370] sm:$0xff] %v5164_v56 }
 0x3cd   : > { %5167 = vst [vmem:[%s8446_s20 + $0x378] sm:$0xff] %v5166_v21 }
 0x3ce PF: > { %s25_s8 = sadd.s32 1, %s5695_s8   ;;  %s8665_s27 = sld [smem:[#allocation19_spill]] }
 0x3cf   : > { %p22_p1 = scmp.ge.s32.totalorder %s25_s8, 6   ;;  %s8666_s28 = sld [smem:[#allocation15_spill]] }
 0x3d0   : > { %s8667_s18 = sld [smem:[#allocation16_spill]]  ;;  %s8670_s24 = smov %s5671_s25 }
 0x3d1   : > { %s8668_s29 = sld [smem:[#allocation17_spill]]  ;;  %s8671_s25 = smov %s5675_s26 }
 0x3d2   : > { %s8669_s30 = sld [smem:[#allocation18_spill]]  ;;  %24 = sbr.rel (!%p22_p1) target bundleno = 13 (0xd), region = 193 }
 0x3d4   : > { %s8672_s26 = smov %s8665_s27 }
 0x3d5   : > { %s8673_s27 = smov %s8666_s28 }
 0x3d6   : > { %s8674_s28 = smov %s8667_s18 }
 0x3d7   :  { %5190 = vsyncpa [#allocation3], 1 }
 0x3d8   :  { %5192 = vsyncpa [#allocation3 + $0x1], 1 }
 0x3d9   :  { %5193 = vsyncpa [#allocation5], 1 }
 0x3da   :  { %5195 = vsyncpa [#allocation5 + $0x1], 1 }
 0x3db   :  { %5196 = vsyncpa [#allocation8], 1 }

</bundles_post_ra>
